<compile_context>
chip_gen: v7x
topology: tpu7x:2x2x1
jax: 0.10.0
libtpu: 0.0.40
codegen_flags: <defaults>
</compile_context>

<pallas_src>
import numpy as np
import jax
import jax.numpy as jnp
from jax.experimental import pallas as pl
from jax.experimental.pallas import tpu as pltpu

D_MODEL = 50          # real model width
D_IN = 64             # contraction-dim padding for Q/K/V projection (halves weight bytes)
D_PAD = 128           # lane-dense width for the output / LayerNorm side
N_HEADS = 12
D_K = 64
HD = N_HEADS * D_K    # 768
LN_EPS = 1e-5
SCALE = 1.0 / np.sqrt(64.0)


def mha_kernel(q_ref, k_ref, v_ref, mask_ref,
               wqkv_ref, bqkv_ref, wfc_ref, bfc_ref, gamma_ref, beta_ref,
               out_ref, attn_ref):
    S = q_ref.shape[0]
    H = N_HEADS

    residual = q_ref[...].astype(jnp.float32)            # (S, D_PAD); pad cols are zero
    q_in = residual[:, :D_IN]                            # (S, 64) projection input
    k_in = k_ref[...].astype(jnp.float32)                # (S, 64)
    v_in = v_ref[...].astype(jnp.float32)                # (S, 64)

    # Fused Q/K/V projection: one batched (3H, S, 64) @ (3H, 64, 64) matmul.
    # Weight slab order is [q heads | k heads | v heads]; 1/sqrt(d_k) already folded into q.
    xb = jnp.concatenate([
        jnp.broadcast_to(q_in[None], (H, S, D_IN)),
        jnp.broadcast_to(k_in[None], (H, S, D_IN)),
        jnp.broadcast_to(v_in[None], (H, S, D_IN)),
    ], axis=0)                                            # (3H, S, 64)
    qkv = jnp.einsum('nsd,ndk->nsk', xb, wqkv_ref[...],
                     preferred_element_type=jnp.float32) + bqkv_ref[...]   # (3H, S, DK)

    q_h = qkv[:H]                                         # (H, S, DK)
    k_h = qkv[H:2 * H]
    v_h = qkv[2 * H:]

    # Batched-head scaled-dot-product attention (scale folded into wq/bq).
    scores = jnp.einsum('hqd,hkd->hqk', q_h, k_h,
                        preferred_element_type=jnp.float32)                # (H, S, S)
    scores = scores + mask_ref[...]                       # additive (-1e9) mask, hoisted

    m = jnp.max(scores, axis=-1, keepdims=True)
    e = jnp.exp(scores - m)
    # TODO(synk): pl.reciprocal(..., approx=True) is effectively free (EUP slot) but needs
    # on-hardware re-verification of the 1e-4 tolerance before switching from the exact path.
    attn = e * pl.reciprocal(jnp.sum(e, axis=-1, keepdims=True), approx=False)
    attn_ref[...] = attn.astype(attn_ref.dtype)           # single batched (H, S, S) store

    ctx = jnp.einsum('hqk,hkd->hqd', attn, v_h,
                     preferred_element_type=jnp.float32)                   # (H, S, DK)

    # Output projection: batched per-head (S, DK) @ (DK, D_PAD), then reduce over heads.
    out_h = jnp.einsum('hsd,hdo->hso', ctx, wfc_ref[...],
                       preferred_element_type=jnp.float32)                 # (H, S, D_PAD)
    out = jnp.sum(out_h, axis=0) + bfc_ref[...] + residual                 # (S, D_PAD)

    # LayerNorm over the first D_MODEL (=50) real columns of the 128-wide slab.
    lane = jax.lax.broadcasted_iota(jnp.int32, (1, D_PAD), 1)
    dmask = (lane < D_MODEL).astype(jnp.float32)          # (1, D_PAD)
    inv_d = jnp.float32(1.0 / D_MODEL)
    mu = jnp.sum(out * dmask, axis=-1, keepdims=True) * inv_d
    centered = (out - mu) * dmask
    var = jnp.sum(centered * centered, axis=-1, keepdims=True) * inv_d
    norm = centered * jax.lax.rsqrt(var + LN_EPS)
    out_ref[...] = (norm * gamma_ref[...] + beta_ref[...]).astype(out_ref.dtype)


def multi_head_attention(Q, K, V, attn_mask, params):
    B, S, D = Q.shape
    H, DK = N_HEADS, D_K

    # ---- wrapper-side layout plumbing (zero padding / reshapes only, no math) ----
    Qp = jnp.pad(Q, ((0, 0), (0, 0), (0, D_PAD - D)))     # (B, S, 128): residual + proj input
    Kp = jnp.pad(K, ((0, 0), (0, 0), (0, D_IN - D)))      # (B, S, 64)
    Vp = jnp.pad(V, ((0, 0), (0, 0), (0, D_IN - D)))      # (B, S, 64)
    neg_mask = attn_mask.astype(jnp.float32) * jnp.float32(-1e9)   # additive mask (B, S, S)

    def per_head(w):      # (D, H*DK) -> (H, D_IN, DK), contraction dim zero-padded 50 -> 64
        w3 = w.reshape(D, H, DK).transpose(1, 0, 2)
        return jnp.pad(w3, ((0, 0), (0, D_IN - D), (0, 0)))

    wqkv = jnp.concatenate([per_head(params["wq"]) * SCALE,
                            per_head(params["wk"]),
                            per_head(params["wv"])], axis=0)          # (3H, 64, 64)
    bqkv = jnp.concatenate([params["bq"].reshape(H, 1, DK) * SCALE,
                            params["bk"].reshape(H, 1, DK),
                            params["bv"].reshape(H, 1, DK)], axis=0)  # (3H, 1, 64)
    wfc = jnp.pad(params["wfc"].reshape(H, DK, D),
                  ((0, 0), (0, 0), (0, D_PAD - D)))                   # (H, 64, 128)
    bfc = jnp.pad(params["bfc"], (0, D_PAD - D)).reshape(1, D_PAD)
    gamma = jnp.pad(params["gamma"], (0, D_PAD - D)).reshape(1, D_PAD)
    beta = jnp.pad(params["beta"], (0, D_PAD - D)).reshape(1, D_PAD)

    batch3 = lambda b: (b, 0, 0)
    const2 = lambda b: (0, 0)
    const3 = lambda b: (0, 0, 0)

    out_pad, attn = pl.pallas_call(
        mha_kernel,
        out_shape=(
            jax.ShapeDtypeStruct((B, S, D_PAD), Q.dtype),
            jax.ShapeDtypeStruct((B, H, S, S), jnp.float32),
        ),
        grid=(B,),
        in_specs=[
            pl.BlockSpec((None, S, D_PAD), batch3),       # Q (residual + projection input)
            pl.BlockSpec((None, S, D_IN), batch3),        # K
            pl.BlockSpec((None, S, D_IN), batch3),        # V
            pl.BlockSpec((None, S, S), batch3),           # additive mask
            pl.BlockSpec((3 * H, D_IN, DK), const3),      # fused per-head QKV weights
            pl.BlockSpec((3 * H, 1, DK), const3),         # fused per-head QKV biases
            pl.BlockSpec((H, DK, D_PAD), const3),         # per-head output projection
            pl.BlockSpec((1, D_PAD), const2),             # bfc
            pl.BlockSpec((1, D_PAD), const2),             # gamma
            pl.BlockSpec((1, D_PAD), const2),             # beta
        ],
        out_specs=(
            pl.BlockSpec((None, S, D_PAD), batch3),
            pl.BlockSpec((None, H, S, S), lambda b: (b, 0, 0, 0)),
        ),
        compiler_params=pltpu.CompilerParams(
            dimension_semantics=("parallel",)),
    )(Qp, Kp, Vp, neg_mask, wqkv, bqkv, wfc, bfc, gamma, beta)

    return out_pad[:, :, :D], attn


def reference_mha(Q, K, V, attn_mask, params):
    B, S, D = Q.shape
    H, DK = N_HEADS, D_K
    q = (Q @ params["wq"] + params["bq"]).reshape(B, S, H, DK).transpose(0, 2, 1, 3)
    k = (K @ params["wk"] + params["bk"]).reshape(B, S, H, DK).transpose(0, 2, 1, 3)
    v = (V @ params["wv"] + params["bv"]).reshape(B, S, H, DK).transpose(0, 2, 1, 3)
    scores = jnp.einsum("bhqd,bhkd->bhqk", q, k) * SCALE
    mask = attn_mask[:, None, :, :].astype(bool)
    scores = jnp.where(mask, -1e9, scores)
    attn = jax.nn.softmax(scores, axis=-1)
    ctx = jnp.einsum("bhqk,bhkd->bhqd", attn, v)
    ctx = ctx.transpose(0, 2, 1, 3).reshape(B, S, H * DK)
    out = ctx @ params["wfc"] + params["bfc"] + Q
    mu = jnp.mean(out, axis=-1, keepdims=True)
    var = jnp.mean((out - mu) ** 2, axis=-1, keepdims=True)
    out = (out - mu) / jnp.sqrt(var + LN_EPS) * params["gamma"] + params["beta"]
    return out, attn


if __name__ == "__main__":
    B, S = 2, 8
    key = jax.random.PRNGKey(0)
    ks = jax.random.split(key, 12)

    # Deterministic parameter init (math layout: y = x @ W + b).
    bound_in = 1.0 / np.sqrt(D_MODEL)
    bound_fc = 1.0 / np.sqrt(N_HEADS * D_K)
    params = {
        "wq": jax.random.uniform(ks[0], (D_MODEL, HD), jnp.float32, -bound_in, bound_in),
        "bq": jax.random.uniform(ks[1], (HD,), jnp.float32, -bound_in, bound_in),
        "wk": jax.random.uniform(ks[2], (D_MODEL, HD), jnp.float32, -bound_in, bound_in),
        "bk": jax.random.uniform(ks[3], (HD,), jnp.float32, -bound_in, bound_in),
        "wv": jax.random.uniform(ks[4], (D_MODEL, HD), jnp.float32, -bound_in, bound_in),
        "bv": jax.random.uniform(ks[5], (HD,), jnp.float32, -bound_in, bound_in),
        "wfc": jax.random.uniform(ks[6], (HD, D_MODEL), jnp.float32, -bound_fc, bound_fc),
        "bfc": jax.random.uniform(ks[7], (D_MODEL,), jnp.float32, -bound_fc, bound_fc),
        "gamma": jnp.ones((D_MODEL,), jnp.float32),
        "beta": jnp.zeros((D_MODEL,), jnp.float32),
    }

    Q = jax.random.normal(ks[8], (B, S, D_MODEL), jnp.float32)
    K = jax.random.normal(ks[9], (B, S, D_MODEL), jnp.float32)
    V = jax.random.normal(ks[10], (B, S, D_MODEL), jnp.float32)
    # Padding mask: last 2 key positions masked for batch 1 (1/True = masked).
    valid = jnp.array([S, S - 2])
    key_pos = jnp.arange(S)[None, None, :]                 # (1, 1, S)
    attn_mask = (key_pos >= valid[:, None, None])          # (B, 1, S)
    attn_mask = jnp.broadcast_to(attn_mask, (B, S, S))

    out, attn = multi_head_attention(Q, K, V, attn_mask, params)
    out = jax.block_until_ready(out)
    attn = jax.block_until_ready(attn)

    ref_out, ref_attn = reference_mha(Q, K, V, attn_mask, params)
    np.testing.assert_allclose(np.asarray(out), np.asarray(ref_out), rtol=1e-4, atol=1e-4)
    np.testing.assert_allclose(np.asarray(attn), np.asarray(ref_attn), rtol=1e-4, atol=1e-4)

    print("KERNEL_OK")
</pallas_src>

<mosaic_0001>
module attributes {stable_mosaic.version = 11 : i64} {
  func.func @mha_kernel(%arg0: i32, %arg1: memref<1x8x128xf32, #tpu.memory_space<vmem>>, %arg2: memref<1x8x64xf32, #tpu.memory_space<vmem>>, %arg3: memref<1x8x64xf32, #tpu.memory_space<vmem>>, %arg4: memref<1x8x8xf32, #tpu.memory_space<vmem>>, %arg5: memref<36x64x64xf32, #tpu.memory_space<vmem>>, %arg6: memref<36x1x64xf32, #tpu.memory_space<vmem>>, %arg7: memref<12x64x128xf32, #tpu.memory_space<vmem>>, %arg8: memref<1x128xf32, #tpu.memory_space<vmem>>, %arg9: memref<1x128xf32, #tpu.memory_space<vmem>>, %arg10: memref<1x128xf32, #tpu.memory_space<vmem>>, %arg11: memref<1x8x128xf32, #tpu.memory_space<vmem>>, %arg12: memref<1x12x8x8xf32, #tpu.memory_space<vmem>>) attributes {dimension_semantics = [#tpu.dimension_semantics<parallel>], iteration_bounds = array<i64: 2>, scalar_prefetch = 0 : i64, scratch_operands = 0 : i64, tpu.core_type = #tpu.core_type<tc>, window_params = [{transform_indices = @transform_0, window_bounds = array<i64: 1, 8, 128>}, {transform_indices = @transform_1, window_bounds = array<i64: 1, 8, 64>}, {transform_indices = @transform_2, window_bounds = array<i64: 1, 8, 64>}, {transform_indices = @transform_3, window_bounds = array<i64: 1, 8, 8>}, {pipeline_mode = #tpu.pipeline_mode<synchronous>, transform_indices = @transform_4, window_bounds = array<i64: 36, 64, 64>}, {pipeline_mode = #tpu.pipeline_mode<synchronous>, transform_indices = @transform_5, window_bounds = array<i64: 36, 1, 64>}, {pipeline_mode = #tpu.pipeline_mode<synchronous>, transform_indices = @transform_6, window_bounds = array<i64: 12, 64, 128>}, {pipeline_mode = #tpu.pipeline_mode<synchronous>, transform_indices = @transform_7, window_bounds = array<i64: 1, 128>}, {pipeline_mode = #tpu.pipeline_mode<synchronous>, transform_indices = @transform_8, window_bounds = array<i64: 1, 128>}, {pipeline_mode = #tpu.pipeline_mode<synchronous>, transform_indices = @transform_9, window_bounds = array<i64: 1, 128>}, {transform_indices = @transform_10, window_bounds = array<i64: 1, 8, 128>}, {transform_indices = @transform_11, window_bounds = array<i64: 1, 12, 8, 8>}]} {
    %c0 = arith.constant 0 : index
    %c0_0 = arith.constant 0 : index
    %c0_1 = arith.constant 0 : index
    %0 = vector.load %arg1[%c0, %c0_0, %c0_1] : memref<1x8x128xf32, #tpu.memory_space<vmem>>, vector<1x8x128xf32>
    %1 = vector.shape_cast %0 : vector<1x8x128xf32> to vector<8x128xf32>
    %2 = vector.extract_strided_slice %1 {offsets = [0, 0], sizes = [8, 64], strides = [1, 1]} : vector<8x128xf32> to vector<8x64xf32>
    %c0_2 = arith.constant 0 : index
    %c0_3 = arith.constant 0 : index
    %c0_4 = arith.constant 0 : index
    %3 = vector.load %arg2[%c0_2, %c0_3, %c0_4] : memref<1x8x64xf32, #tpu.memory_space<vmem>>, vector<1x8x64xf32>
    %4 = vector.shape_cast %3 : vector<1x8x64xf32> to vector<8x64xf32>
    %c0_5 = arith.constant 0 : index
    %c0_6 = arith.constant 0 : index
    %c0_7 = arith.constant 0 : index
    %5 = vector.load %arg3[%c0_5, %c0_6, %c0_7] : memref<1x8x64xf32, #tpu.memory_space<vmem>>, vector<1x8x64xf32>
    %6 = vector.shape_cast %5 : vector<1x8x64xf32> to vector<8x64xf32>
    %7 = vector.shape_cast %2 : vector<8x64xf32> to vector<1x8x64xf32>
    %8 = vector.shape_cast %7 : vector<1x8x64xf32> to vector<1x8x64xf32>
    %9 = vector.broadcast %8 : vector<1x8x64xf32> to vector<12x8x64xf32>
    %10 = vector.shape_cast %4 : vector<8x64xf32> to vector<1x8x64xf32>
    %11 = vector.shape_cast %10 : vector<1x8x64xf32> to vector<1x8x64xf32>
    %12 = vector.broadcast %11 : vector<1x8x64xf32> to vector<12x8x64xf32>
    %13 = vector.shape_cast %6 : vector<8x64xf32> to vector<1x8x64xf32>
    %14 = vector.shape_cast %13 : vector<1x8x64xf32> to vector<1x8x64xf32>
    %15 = vector.broadcast %14 : vector<1x8x64xf32> to vector<12x8x64xf32>
    %16 = tpu.concatenate %9, %12, %15 in 0 : vector<12x8x64xf32>, vector<12x8x64xf32>, vector<12x8x64xf32> -> vector<36x8x64xf32>
    %c0_8 = arith.constant 0 : index
    %c0_9 = arith.constant 0 : index
    %c0_10 = arith.constant 0 : index
    %17 = vector.load %arg5[%c0_8, %c0_9, %c0_10] : memref<36x64x64xf32, #tpu.memory_space<vmem>>, vector<36x64x64xf32>
    "tpu.trace_start"() <{level = 10 : i32, message = "nsd,ndk->nsk"}> : () -> ()
    %cst = arith.constant dense<0.000000e+00> : vector<36x8x64xf32>
    %18 = tpu.matmul %16, %17, %cst {dimension_numbers = #tpu.dot_dimension_numbers<[2], [1], [1], [2], [0, 0, 0, 1, 1, 2], [0], [0]>} : vector<36x8x64xf32>, vector<36x64x64xf32>, vector<36x8x64xf32> -> vector<36x8x64xf32>
    "tpu.trace_stop"() : () -> ()
    %c0_11 = arith.constant 0 : index
    %c0_12 = arith.constant 0 : index
    %c0_13 = arith.constant 0 : index
    %19 = vector.load %arg6[%c0_11, %c0_12, %c0_13] : memref<36x1x64xf32, #tpu.memory_space<vmem>>, vector<36x1x64xf32>
    %20 = vector.broadcast %19 : vector<36x1x64xf32> to vector<36x8x64xf32>
    %21 = arith.addf %18, %20 : vector<36x8x64xf32>
    %22 = vector.extract_strided_slice %21 {offsets = [0, 0, 0], sizes = [12, 8, 64], strides = [1, 1, 1]} : vector<36x8x64xf32> to vector<12x8x64xf32>
    %23 = vector.extract_strided_slice %21 {offsets = [12, 0, 0], sizes = [12, 8, 64], strides = [1, 1, 1]} : vector<36x8x64xf32> to vector<12x8x64xf32>
    %24 = vector.extract_strided_slice %21 {offsets = [24, 0, 0], sizes = [12, 8, 64], strides = [1, 1, 1]} : vector<36x8x64xf32> to vector<12x8x64xf32>
    "tpu.trace_start"() <{level = 10 : i32, message = "hqd,hkd->hqk"}> : () -> ()
    %cst_14 = arith.constant dense<0.000000e+00> : vector<12x8x8xf32>
    %25 = tpu.matmul %22, %23, %cst_14 {dimension_numbers = #tpu.dot_dimension_numbers<[2], [2], [1], [1], [0, 0, 0, 1, 1, 1], [0], [0]>} : vector<12x8x64xf32>, vector<12x8x64xf32>, vector<12x8x8xf32> -> vector<12x8x8xf32>
    "tpu.trace_stop"() : () -> ()
    %c0_15 = arith.constant 0 : index
    %c0_16 = arith.constant 0 : index
    %c0_17 = arith.constant 0 : index
    %26 = vector.load %arg4[%c0_15, %c0_16, %c0_17] : memref<1x8x8xf32, #tpu.memory_space<vmem>>, vector<1x8x8xf32>
    %27 = vector.shape_cast %26 : vector<1x8x8xf32> to vector<8x8xf32>
    %28 = vector.shape_cast %27 : vector<8x8xf32> to vector<1x8x8xf32>
    %29 = vector.broadcast %28 : vector<1x8x8xf32> to vector<12x8x8xf32>
    %30 = arith.addf %25, %29 : vector<12x8x8xf32>
    %cst_18 = arith.constant dense<0xFF800000> : vector<12x8xf32>
    %31 = vector.multi_reduction <maximumf>, %30, %cst_18 [2] : vector<12x8x8xf32> to vector<12x8xf32>
    %32 = vector.shape_cast %31 : vector<12x8xf32> to vector<12x8x1xf32>
    %33 = vector.broadcast %32 : vector<12x8x1xf32> to vector<12x8x8xf32>
    %34 = arith.subf %30, %33 : vector<12x8x8xf32>
    %35 = math.exp %34 : vector<12x8x8xf32>
    %cst_19 = arith.constant dense<0.000000e+00> : vector<12x8xf32>
    %36 = vector.multi_reduction <add>, %35, %cst_19 [2] : vector<12x8x8xf32> to vector<12x8xf32>
    %37 = vector.shape_cast %36 : vector<12x8xf32> to vector<12x8x1xf32>
    %38 = tpu.reciprocal %37 : vector<12x8x1xf32> -> vector<12x8x1xf32>
    %39 = vector.broadcast %38 : vector<12x8x1xf32> to vector<12x8x8xf32>
    %40 = arith.mulf %35, %39 : vector<12x8x8xf32>
    %c0_20 = arith.constant 0 : index
    %c0_21 = arith.constant 0 : index
    %c0_22 = arith.constant 0 : index
    %c0_23 = arith.constant 0 : index
    %41 = vector.load %arg12[%c0_20, %c0_21, %c0_22, %c0_23] : memref<1x12x8x8xf32, #tpu.memory_space<vmem>>, vector<1x12x8x8xf32>
    %42 = vector.shape_cast %41 : vector<1x12x8x8xf32> to vector<12x8x8xf32>
    %43 = vector.shape_cast %40 : vector<12x8x8xf32> to vector<1x12x8x8xf32>
    tpu.vector_store %arg12[%c0_20, %c0_21, %c0_22, %c0_23], %43 {strides = array<i32>} : memref<1x12x8x8xf32, #tpu.memory_space<vmem>>, vector<1x12x8x8xf32>,
    "tpu.trace_start"() <{level = 10 : i32, message = "hqk,hkd->hqd"}> : () -> ()
    %cst_24 = arith.constant dense<0.000000e+00> : vector<12x8x64xf32>
    %44 = tpu.matmul %40, %24, %cst_24 {dimension_numbers = #tpu.dot_dimension_numbers<[2], [1], [1], [2], [0, 0, 0, 1, 1, 2], [0], [0]>} : vector<12x8x8xf32>, vector<12x8x64xf32>, vector<12x8x64xf32> -> vector<12x8x64xf32>
    "tpu.trace_stop"() : () -> ()
    %c0_25 = arith.constant 0 : index
    %c0_26 = arith.constant 0 : index
    %c0_27 = arith.constant 0 : index
    %45 = vector.load %arg7[%c0_25, %c0_26, %c0_27] : memref<12x64x128xf32, #tpu.memory_space<vmem>>, vector<12x64x128xf32>
    "tpu.trace_start"() <{level = 10 : i32, message = "hsd,hdo->hso"}> : () -> ()
    %cst_28 = arith.constant dense<0.000000e+00> : vector<12x8x128xf32>
    %46 = tpu.matmul %44, %45, %cst_28 {dimension_numbers = #tpu.dot_dimension_numbers<[2], [1], [1], [2], [0, 0, 0, 1, 1, 2], [0], [0]>} : vector<12x8x64xf32>, vector<12x64x128xf32>, vector<12x8x128xf32> -> vector<12x8x128xf32>
    "tpu.trace_stop"() : () -> ()
    %cst_29 = arith.constant dense<0.000000e+00> : vector<8x128xf32>
    %47 = vector.multi_reduction <add>, %46, %cst_29 [0] : vector<12x8x128xf32> to vector<8x128xf32>
    %c0_30 = arith.constant 0 : index
    %c0_31 = arith.constant 0 : index
    %48 = vector.load %arg8[%c0_30, %c0_31] : memref<1x128xf32, #tpu.memory_space<vmem>>, vector<1x128xf32>
    %49 = vector.broadcast %48 : vector<1x128xf32> to vector<8x128xf32>
    %50 = arith.addf %47, %49 : vector<8x128xf32>
    %51 = arith.addf %50, %1 : vector<8x128xf32>
    %52 = tpu.iota {dimensions = array<i32: 1>} : vector<1x128xi32>
    %c50_i32 = arith.constant 50 : i32
    %53 = vector.broadcast %c50_i32 : i32 to vector<1x128xi32>
    %54 = arith.cmpi slt, %52, %53 : vector<1x128xi32>
    %55 = arith.extui %54 : vector<1x128xi1> to vector<1x128xi32>
    %56 = arith.sitofp %55 : vector<1x128xi32> to vector<1x128xf32>
    %57 = vector.broadcast %56 : vector<1x128xf32> to vector<8x128xf32>
    %58 = arith.mulf %51, %57 : vector<8x128xf32>
    %cst_32 = arith.constant dense<0.000000e+00> : vector<8xf32>
    %59 = vector.multi_reduction <add>, %58, %cst_32 [1] : vector<8x128xf32> to vector<8xf32>
    %60 = vector.shape_cast %59 : vector<8xf32> to vector<8x1xf32>
    %cst_33 = arith.constant 2.000000e-02 : f32
    %61 = vector.broadcast %cst_33 : f32 to vector<8x1xf32>
    %62 = arith.mulf %60, %61 : vector<8x1xf32>
    %63 = vector.broadcast %62 : vector<8x1xf32> to vector<8x128xf32>
    %64 = arith.subf %51, %63 : vector<8x128xf32>
    %65 = vector.broadcast %56 : vector<1x128xf32> to vector<8x128xf32>
    %66 = arith.mulf %64, %65 : vector<8x128xf32>
    %67 = arith.mulf %66, %66 : vector<8x128xf32>
    %cst_34 = arith.constant dense<0.000000e+00> : vector<8xf32>
    %68 = vector.multi_reduction <add>, %67, %cst_34 [1] : vector<8x128xf32> to vector<8xf32>
    %69 = vector.shape_cast %68 : vector<8xf32> to vector<8x1xf32>
    %cst_35 = arith.constant 2.000000e-02 : f32
    %70 = vector.broadcast %cst_35 : f32 to vector<8x1xf32>
    %71 = arith.mulf %69, %70 : vector<8x1xf32>
    %cst_36 = arith.constant 9.99999974E-6 : f32
    %72 = vector.broadcast %cst_36 : f32 to vector<8x1xf32>
    %73 = arith.addf %71, %72 : vector<8x1xf32>
    %74 = math.rsqrt %73 : vector<8x1xf32>
    %75 = vector.broadcast %74 : vector<8x1xf32> to vector<8x128xf32>
    %76 = arith.mulf %66, %75 : vector<8x128xf32>
    %c0_37 = arith.constant 0 : index
    %c0_38 = arith.constant 0 : index
    %77 = vector.load %arg9[%c0_37, %c0_38] : memref<1x128xf32, #tpu.memory_space<vmem>>, vector<1x128xf32>
    %78 = vector.broadcast %77 : vector<1x128xf32> to vector<8x128xf32>
    %79 = arith.mulf %76, %78 : vector<8x128xf32>
    %c0_39 = arith.constant 0 : index
    %c0_40 = arith.constant 0 : index
    %80 = vector.load %arg10[%c0_39, %c0_40] : memref<1x128xf32, #tpu.memory_space<vmem>>, vector<1x128xf32>
    %81 = vector.broadcast %80 : vector<1x128xf32> to vector<8x128xf32>
    %82 = arith.addf %79, %81 : vector<8x128xf32>
    %c0_41 = arith.constant 0 : index
    %c0_42 = arith.constant 0 : index
    %c0_43 = arith.constant 0 : index
    %83 = vector.load %arg11[%c0_41, %c0_42, %c0_43] : memref<1x8x128xf32, #tpu.memory_space<vmem>>, vector<1x8x128xf32>
    %84 = vector.shape_cast %83 : vector<1x8x128xf32> to vector<8x128xf32>
    %85 = vector.shape_cast %82 : vector<8x128xf32> to vector<1x8x128xf32>
    tpu.vector_store %arg11[%c0_41, %c0_42, %c0_43], %85 {strides = array<i32>} : memref<1x8x128xf32, #tpu.memory_space<vmem>>, vector<1x8x128xf32>,
    return
  }
  func.func @transform_0(%arg0: i32) -> (i32, i32, i32) {
    %c0_i32 = arith.constant 0 : i32
    %c0_i32_0 = arith.constant 0 : i32
    %c0_i32_1 = arith.constant 0 : i32
    return %arg0, %c0_i32, %c0_i32_0 : i32, i32, i32
  }
  func.func @transform_1(%arg0: i32) -> (i32, i32, i32) {
    %c0_i32 = arith.constant 0 : i32
    %c0_i32_0 = arith.constant 0 : i32
    %c0_i32_1 = arith.constant 0 : i32
    return %arg0, %c0_i32, %c0_i32_0 : i32, i32, i32
  }
  func.func @transform_2(%arg0: i32) -> (i32, i32, i32) {
    %c0_i32 = arith.constant 0 : i32
    %c0_i32_0 = arith.constant 0 : i32
    %c0_i32_1 = arith.constant 0 : i32
    return %arg0, %c0_i32, %c0_i32_0 : i32, i32, i32
  }
  func.func @transform_3(%arg0: i32) -> (i32, i32, i32) {
    %c0_i32 = arith.constant 0 : i32
    %c0_i32_0 = arith.constant 0 : i32
    %c0_i32_1 = arith.constant 0 : i32
    return %arg0, %c0_i32, %c0_i32_0 : i32, i32, i32
  }
  func.func @transform_4(%arg0: i32) -> (i32, i32, i32) {
    %c0_i32 = arith.constant 0 : i32
    %c0_i32_0 = arith.constant 0 : i32
    %c0_i32_1 = arith.constant 0 : i32
    %c0_i32_2 = arith.constant 0 : i32
    return %c0_i32, %c0_i32_0, %c0_i32_1 : i32, i32, i32
  }
  func.func @transform_5(%arg0: i32) -> (i32, i32, i32) {
    %c0_i32 = arith.constant 0 : i32
    %c0_i32_0 = arith.constant 0 : i32
    %c0_i32_1 = arith.constant 0 : i32
    %c0_i32_2 = arith.constant 0 : i32
    return %c0_i32, %c0_i32_0, %c0_i32_1 : i32, i32, i32
  }
  func.func @transform_6(%arg0: i32) -> (i32, i32, i32) {
    %c0_i32 = arith.constant 0 : i32
    %c0_i32_0 = arith.constant 0 : i32
    %c0_i32_1 = arith.constant 0 : i32
    %c0_i32_2 = arith.constant 0 : i32
    return %c0_i32, %c0_i32_0, %c0_i32_1 : i32, i32, i32
  }
  func.func @transform_7(%arg0: i32) -> (i32, i32) {
    %c0_i32 = arith.constant 0 : i32
    %c0_i32_0 = arith.constant 0 : i32
    %c0_i32_1 = arith.constant 0 : i32
    return %c0_i32, %c0_i32_0 : i32, i32
  }
  func.func @transform_8(%arg0: i32) -> (i32, i32) {
    %c0_i32 = arith.constant 0 : i32
    %c0_i32_0 = arith.constant 0 : i32
    %c0_i32_1 = arith.constant 0 : i32
    return %c0_i32, %c0_i32_0 : i32, i32
  }
  func.func @transform_9(%arg0: i32) -> (i32, i32) {
    %c0_i32 = arith.constant 0 : i32
    %c0_i32_0 = arith.constant 0 : i32
    %c0_i32_1 = arith.constant 0 : i32
    return %c0_i32, %c0_i32_0 : i32, i32
  }
  func.func @transform_10(%arg0: i32) -> (i32, i32, i32) {
    %c0_i32 = arith.constant 0 : i32
    %c0_i32_0 = arith.constant 0 : i32
    %c0_i32_1 = arith.constant 0 : i32
    return %arg0, %c0_i32, %c0_i32_0 : i32, i32, i32
  }
  func.func @transform_11(%arg0: i32) -> (i32, i32, i32, i32) {
    %c0_i32 = arith.constant 0 : i32
    %c0_i32_0 = arith.constant 0 : i32
    %c0_i32_1 = arith.constant 0 : i32
    %c0_i32_2 = arith.constant 0 : i32
    return %arg0, %c0_i32, %c0_i32_0, %c0_i32_1 : i32, i32, i32, i32
  }
}

</mosaic_0001>

<bundles_post_ra>
// kernel: tpu_custom_call.1
= control target key start
LH: loop header
LB: loop body
LE: loop exit
PB: predicated region body
PF: predicated region fallthrough
CT: control target
= control target key end

     0   :  { %s10912_s0 = inlined_call_operand.hbm [shape: f32[2,8,128], index: 0, kind: input, shape index: {}]   ;;  %s10913_s1 = inlined_call_operand.hbm [shape: f32[2,8,64], index: 1, kind: input, shape index: {}]   ;;  %s10914_s2 = inlined_call_operand.hbm [shape: f32[2,8,64], index: 2, kind: input, shape index: {}]   ;;  %s10915_s3 = inlined_call_operand.hbm [shape: f32[2,8,8], index: 3, kind: input, shape index: {}]   ;;  %s10916_s4 = inlined_call_operand.hbm [shape: f32[36,64,64], index: 4, kind: input, shape index: {}]   ;;  %s10917_s5 = inlined_call_operand.hbm [shape: f32[36,1,64], index: 5, kind: input, shape index: {}]   ;;  %s10918_s6 = inlined_call_operand.hbm [shape: f32[12,64,128], index: 6, kind: input, shape index: {}]   ;;  %s10919_s7 = inlined_call_operand.hbm [shape: f32[1,128], index: 7, kind: input, shape index: {}]   ;;  %s10920_s8 = inlined_call_operand.hbm [shape: f32[1,128], index: 8, kind: input, shape index: {}]   ;;  %s10921_s9 = inlined_call_operand.hbm [shape: f32[1,128], index: 9, kind: input, shape index: {}]   ;;  %s10922_s10 = inlined_call_operand.hbm [shape: f32[2,8,128], index: 10, kind: output, shape index: {0}]   ;;  %s10923_s11 = inlined_call_operand.vmem [shape: f32[2,12,8,8], index: 11, kind: output, shape index: {1}]  }
   0x1   :  { %10948 = sst [smem:[#allocation34_spill]] %s10913_s1 }
   0x2   :  { %10949 = sst [smem:[#allocation35_spill]] %s10916_s4 }
   0x3   :  { %10950 = sst [smem:[#allocation36_spill]] %s10917_s5 }
   0x4   :  { %10951 = sst [smem:[#allocation37_spill]] %s10919_s7 }
   0x5   :  { %10952 = sst [smem:[#allocation38_spill]] %s10922_s10 }
   0x6   :  { %10953 = sst [smem:[#allocation39_spill]] %s10923_s11 }
   0x7   :  { %17 = vsyncpa [#allocation3], 0 }
   0x8   :  { %19 = vsyncpa [#allocation3 + $0x1], 0 }
   0x9   :  { %20 = vsyncpa [#allocation6], 0 }
   0xa   :  { %22 = vsyncpa [#allocation6 + $0x1], 0 }
   0xb   :  { %23 = vsyncpa [#allocation9], 0 }
   0xc   :  { %25 = vsyncpa [#allocation9 + $0x1], 0 }
   0xd   :  { %26 = vsyncpa [#allocation12], 0 }
   0xe   :  { %27 = vsyncpa [#allocation15], 0 }
   0xf   :  { %28 = vsyncpa [#allocation18], 0 }
  0x10   :  { %29 = vsyncpa [#allocation4], 0 }
  0x11   :  { %31 = vsyncpa [#allocation4 + $0x1], 0  ;;  %s9763_s17 = smov 0   ;;  %s9765_s18 = smov 0  }
  0x12   :  { %s9767_s19 = smov 0   ;;  %s9769_s20 = smov 0  }
  0x13 LB: > { %10954 = sst [smem:[#allocation28_spill]] %s9671_s17  ;;  %s9685_s21 = smov [#allocation10]   ;;  %s9683_s20 = sphi %s9769_s20, %s11002_s20   ;;  %s9679_s19 = sphi %s9767_s19, %s11006_s19   ;;  %s9675_s18 = sphi %s9765_s18, %s11005_s18   ;;  %s9671_s17 = sphi %s9763_s17, %s11004_s17  }
  0x14   : > { %s336_s22 = sshll.u32 %s9685_s21, 4  ;;  %s9784_s23 = sadd.s32 4294967295, %s9683_s20   ;;  %s9789_s22 = int_to_ptr.vmem [resolvable:$true] %s336_s22 }
  0x15   : > { %p6879_p0 = scmp.ge.s32.totalorder %s9683_s20, 1  ;;  %p10927_p1 = scmp.eq.s32.totalorder %s9784_s23, 0 }
  0x16   : > { %p324_p2 = scmp.lt.s32.totalorder %s9683_s20, 3  ;;  %s9686_s25 = smov [#allocation11]  }
  0x17   : > { %s349_s26 = sshll.u32 %s9686_s25, 4  ;;  %s9687_s28 = smov [#allocation14]   ;;  %s9804_s26 = int_to_ptr.vmem [resolvable:$true] %s349_s26 }
  0x18   : > { %p9791_p3 = pnand %p6879_p0, %p324_p2  ;;  %s9806_s29 = sshll.u32 %s9687_s28, 4  ;;  %s377_s29 = int_to_ptr.vmem [resolvable:$true] %s9806_s29 }
  0x19   : > { %s10958_s4 = sld [smem:[#allocation35_spill]] }
  0x1a   : > { %s10955_s24 = scalar_select %p9791_p3, 1, 0 }
  0x1b   : > { %p9159_p5 = pneg %p9791_p3 }
  0x1c   : > { %10956 = sst [smem:[#allocation29_spill]] %s10955_s24 }
  0x1d   : > { %p9800_p6 = pnand %p9159_p5, %p10927_p1 }
  0x1f   : > { %s10957_s27 = scalar_select %p9800_p6, 1, 0 }
  0x20   : > { %s9305_s13 = scalar_lea.hbm %s10958_s4, 36864  ;;  %p9816_p8 = pneg %p9800_p6 }
  0x21   : > { %p9306_p7 = scmp.ne.s32.totalorder %s10958_s4, %s9305_s13  ;;  %p9312_p11 = scmp.lt.u32.totalorder %s9305_s13, %s10958_s4 }
  0x22   : > { %s10959_s16 = scalar_select %p9816_p8, 1, 0 }
  0x23   : > { %p9308_p9 = pnand %p9816_p8, %p9306_p7 }
  0x25   : > { %p9309_p10 = pneg %p9308_p9 }
  0x27   : > { %p9314_p12 = pnand %p9312_p11, %p9309_p10 }
  0x29   : > { %9317 = shalt.err (!%p9314_p12)
}
  0x2a   : > { %s9318_s28 = scalar_lea.vmem %s9789_s22, 36864  ;;  %p9326_p5 = scmp.lt.s32.totalorder %s9789_s22, %s9789_s22 }
  0x2b   : > { %p9319_p13 = scmp.ne.s32.totalorder %s9789_s22, %s9318_s28  ;;  %p9327_p4 = scmp.lt.s32.totalorder %s9318_s28, %s9318_s28 }
  0x2d   : > { %p9321_p0 = pnand %p9319_p13, %p9816_p8  ;;  %p9328_p7 = por %p9327_p4, %p9326_p5 }
  0x2f   : > { %p9322_p2 = pneg %p9321_p0 }
  0x31   : > { %p9329_p9 = pnand %p9328_p7, %p9322_p2 }
  0x33   : > { %9332 = shalt.err (!%p9329_p9)
}
  0x34   : > { %s10926_s30 = smov 128   ;;  %s10930_s12 = smov 8  }
  0x35   : > { %9162 = dma.hbm_to_vmem [thread:$0]  (!%p9800_p6), %s10958_s4, 36864, %s9789_s22, [#allocation9], %s10926_s30, %s10926_s30, %s10930_s12  }
  0x36   : > { %s10960_s5 = sld [smem:[#allocation36_spill]] }
  0x3c   : > { %s9333_s25 = scalar_lea.hbm %s10960_s5, 576 }
  0x3d   : > { %p9334_p4 = scmp.ne.s32.totalorder %s10960_s5, %s9333_s25  ;;  %p9340_p12 = scmp.lt.u32.totalorder %s9333_s25, %s10960_s5 }
  0x3f   : > { %p9336_p10 = pnand %p9334_p4, %p9816_p8 }
  0x41   : > { %p9337_p11 = pneg %p9336_p10 }
  0x43   : > { %p9342_p13 = pnand %p9340_p12, %p9337_p11 }
  0x45   : > { %9345 = shalt.err (!%p9342_p13)
}
  0x46   : > { %s9346_s22 = scalar_lea.vmem %s9804_s26, 576  ;;  %p9354_p7 = scmp.lt.s32.totalorder %s9804_s26, %s9804_s26 }
  0x47   : > { %p9347_p0 = scmp.ne.s32.totalorder %s9804_s26, %s9346_s22  ;;  %p9355_p9 = scmp.lt.s32.totalorder %s9346_s22, %s9346_s22 }
  0x49   : > { %p9349_p2 = pnand %p9347_p0, %p9816_p8  ;;  %p9356_p4 = por %p9355_p9, %p9354_p7 }
  0x4b   : > { %p9350_p5 = pneg %p9349_p2 }
  0x4d   : > { %p9357_p10 = pnand %p9356_p4, %p9350_p5 }
  0x4f   : > { %9360 = shalt.err (!%p9357_p10)
}
  0x50   : > { %s9690_s10 = smov 16   ;;  %s9691_s11 = smov 1  }
  0x51   : > { %9165 = dma.hbm_to_vmem [thread:$0]  (!%p9800_p6), %s10960_s5, 576, %s9804_s26, [#allocation12], %s9690_s10, %s9690_s10, %s9691_s11  }
  0x52   : > { %s10961_s7 = sld [smem:[#allocation37_spill]] }
  0x58   : > { %s9361_s21 = scalar_lea.hbm %s10961_s7, 16 }
  0x59   : > { %p9362_p11 = scmp.ne.s32.totalorder %s10961_s7, %s9361_s21  ;;  %p9368_p0 = scmp.lt.u32.totalorder %s9361_s21, %s10961_s7 }
  0x5b   : > { %p9364_p12 = pnand %p9362_p11, %p9816_p8 }
  0x5d   : > { %p9365_p13 = pneg %p9364_p12 }
  0x5f   : > { %p9370_p2 = pnand %p9368_p0, %p9365_p13 }
  0x61   : > { %9373 = shalt.err (!%p9370_p2)
}
  0x62   : > { %s9374_s24 = scalar_lea.vmem %s377_s29, 16  ;;  %s9381_s26 = scalar_lea.vmem %s377_s29, 32 }
  0x63   : > { %p9375_p5 = scmp.ne.s32.totalorder %s377_s29, %s9374_s24  ;;  %p9382_p4 = scmp.lt.s32.totalorder %s377_s29, %s377_s29 }
  0x64   : > { %p9383_p10 = scmp.lt.s32.totalorder %s9381_s26, %s9374_s24 }
  0x65   : > { %p9377_p7 = pnand %p9375_p5, %p9816_p8 }
  0x66   : > { %p9384_p1 = por %p9383_p10, %p9382_p4 }
  0x67   : > { %p9378_p9 = pneg %p9377_p7 }
  0x69   : > { %p9385_p3 = pnand %p9384_p1, %p9378_p9 }
  0x6b   : > { %9388 = shalt.err (!%p9385_p3)
}
  0x6c   : > { %9171 = dma.hbm_to_vmem [thread:$0]  (!%p9800_p6), %s10961_s7, 16, %s377_s29, [#allocation15]  }
  0x6d   : > { %s6878_s30 = sadd.s32 4294967294, %s9683_s20   ;;  %s9884_s13 = sadd.s32 1, %s9683_s20  }
  0x6e   : > { %10962 = sst [smem:[#allocation30_spill]] %s9884_s13  ;;  %s44_s14 = sadd.s32 1, %s9679_s19 }
  0x6f   : > { %s41_s15 = ssub.s32 %s9683_s20, %s9884_s13  ;;  %p51_p1 = scmp.ne.s32.totalorder %s9679_s19, %s9675_s18 }
  0x70   : > { %p42_p3 = scmp.eq.s32.totalorder %s41_s15, 0  ;;  %p52_p11 = scmp.eq.s32.totalorder %s9683_s20, 0 }
  0x71   : > { %p57_p12 = scmp.ne.s32.totalorder %s9675_s18, %s9671_s17  ;;  %p285_p13 = scmp.eq.s32.totalorder %s9784_s23, 1 }
  0x72   : > { %s9896_s21 = scalar_select %p42_p3, %s9679_s19, %s44_s14  }
  0x73   : > { %p53_p0 = por %p52_p11, %p51_p1  ;;  %p10964_p2 = scmp.eq.s32.totalorder %s9784_s23, 0 }
  0x74   : > { %10963 = sst [smem:[#allocation31_spill]] %s9896_s21  ;;  %p9904_p7 = por %p285_p13, %p51_p1 }
  0x75   : > { %p9900_p5 = por %p10964_p2, %p57_p12  ;;  %p291_p9 = scmp.eq.s32.totalorder %s6878_s30, 1 }
  0x76   : > { %s10966_s25 = scalar_select %p9904_p7, 1, 0 }
  0x77   : > { %s10965_s29 = scalar_select %p9900_p5, 1, 0 }
  0x78   : > { %10967 = sst [smem:[#allocation32_spill]] %s10966_s25  ;;  %p9201_p4 = scmp.lt.s32.totalorder %s9683_s20, 2 }
  0x79   : > { %s10929_s28 = sand.u32 1, %s9679_s19   ;;  %p9910_p10 = por %p291_p9, %p57_p12 }
  0x7a   : > { %s9916_s24 = sshll.u32 %s10929_s28, 3  ;;  %s9919_s26 = sshll.u32 %s9683_s20, 7 }
  0x7b   : > { %s10968_s22 = scalar_select %p9910_p10, 1, 0 }
  0x7c   : > { %p9921_p3 = pnand %p9201_p4, %p53_p0  ;;  %s10934_s11 = sand.u32 1, %s9683_s20  }
  0x7d   : > { %10969 = sst [smem:[#allocation33_spill]] %s10968_s22  ;;  %s10971_s1 = sld [smem:[#allocation34_spill]] }
  0x7e   : > { %s10970_s10 = scalar_select %p9921_p3, 1, 0 }
  0x7f   : > { %s431_s28 = scalar_lea.vmem [#allocation5], %s9916_s24  ;;  %s9937_s4 = scalar_lea.sflag [#allocation6], %s10934_s11 }
  0x80   : > { %s438_s12 = sshll.u32 %s431_s28, 4  ;;  %p9943_p11 = pneg %p9921_p3  ;;  %s9933_s12 = int_to_ptr.vmem [resolvable:$true] %s438_s12 }
  0x82   : > { %s10972_s7 = scalar_select %p9943_p11, 1, 0 }
  0x83   : > { %s9930_s15 = scalar_lea.hbm %s10971_s1, %s9919_s26  ;;  %s9394_s28 = scalar_lea.hbm %s10971_s1, 256 }
  0x84   : > { %s9389_s5 = scalar_lea.hbm %s9930_s15, 128  ;;  %p9395_p0 = scmp.lt.u32.totalorder %s9930_s15, %s10971_s1 }
  0x85   : > { %p9390_p1 = scmp.ne.s32.totalorder %s9930_s15, %s9389_s5  ;;  %p9396_p2 = scmp.lt.u32.totalorder %s9394_s28, %s9389_s5 }
  0x86   : > { %p9398_p4 = scmp.lt.u32.totalorder %s9389_s5, %s9930_s15 }
  0x87   : > { %p9392_p12 = pnand %p9943_p11, %p9390_p1  ;;  %p9397_p9 = por %p9396_p2, %p9395_p0 }
  0x89   : > { %p9393_p13 = pneg %p9392_p12  ;;  %p9399_p10 = por %p9398_p4, %p9397_p9 }
  0x8b   : > { %p9400_p7 = pnand %p9399_p10, %p9393_p13 }
  0x8d   : > { %9403 = shalt.err (!%p9400_p7)
}
  0x8e   : > { %s9404_s11 = scalar_lea.vmem %s9933_s12, 128  ;;  %s9692_s30 = smov [#allocation5]  }
  0x8f   : > { %p9405_p1 = scmp.ne.s32.totalorder %s9933_s12, %s9404_s11  ;;  %s9409_s14 = sshll.u32 %s9692_s30, 4  ;;  %s9410_s14 = int_to_ptr.vmem [resolvable:$false] %s9409_s14 }
  0x90   : > { %s9411_s13 = scalar_lea.vmem %s9410_s14, 256  ;;  %p9412_p6 = scmp.lt.s32.totalorder %s9933_s12, %s9410_s14 }
  0x91   : > { %p9407_p12 = pnand %p9405_p1, %p9943_p11  ;;  %p9413_p8 = scmp.lt.s32.totalorder %s9411_s13, %s9404_s11 }
  0x93   : > { %p9408_p5 = pneg %p9407_p12  ;;  %p9414_p0 = por %p9413_p8, %p9412_p6 }
  0x95   : > { %p9415_p2 = pnand %p9414_p0, %p9408_p5 }
  0x97   : > { %9418 = shalt.err (!%p9415_p2)
}
  0x98   : > { %9184 = dma.hbm_to_vmem [thread:$0]  (!%p9921_p3), %s9930_s15, 128, %s9933_s12, %s9937_s4  }
  0x99   : > { %s9693_s5 = smov [#allocation13]   ;;  %s9694_s28 = smov [#allocation16]  }
  0x9a   : > { %s362_s21 = sshll.u32 %s9693_s5, 4  ;;  %s387_s1 = sshll.u32 %s9694_s28, 4  ;;  %s363_s21 = int_to_ptr.vmem [resolvable:$true] %s362_s21  ;;  %s9967_s1 = int_to_ptr.vmem [resolvable:$true] %s387_s1 }
  0x9b   : > { %s9419_s11 = scalar_lea.hbm %s10918_s6, 12288  ;;  %p10973_p8 = scmp.ne.s32.totalorder %s10959_s16, 0 }
  0x9c   : > { %p9420_p6 = scmp.ne.s32.totalorder %s10918_s6, %s9419_s11  ;;  %p9426_p10 = scmp.lt.u32.totalorder %s9419_s11, %s10918_s6 }
  0x9e   : > { %p9422_p5 = pnand %p9420_p6, %p10973_p8 }
  0xa0   : > { %p9423_p7 = pneg %p9422_p5 }
  0xa2   : > { %p9428_p13 = pnand %p9426_p10, %p9423_p7 }
  0xa4   : > { %9431 = shalt.err (!%p9428_p13)
}
  0xa5   : > { %s9432_s15 = scalar_lea.vmem %s363_s21, 12288  ;;  %p9440_p12 = scmp.lt.s32.totalorder %s363_s21, %s363_s21 }
  0xa6   : > { %p9433_p9 = scmp.ne.s32.totalorder %s363_s21, %s9432_s15  ;;  %p9441_p0 = scmp.lt.s32.totalorder %s9432_s15, %s9432_s15 }
  0xa8   : > { %p9435_p4 = pnand %p9433_p9, %p10973_p8  ;;  %p9442_p2 = por %p9441_p0, %p9440_p12 }
  0xaa   : > { %p9436_p1 = pneg %p9435_p4 }
  0xac   : > { %p9443_p3 = pnand %p9442_p2, %p9436_p1 }
  0xae   : > { %9446 = shalt.err (!%p9443_p3)
}
  0xaf   : > { %p10974_p6 = scmp.ne.s32.totalorder %s10957_s27, 0  ;;  %s10975_s22 = smov 8  }
  0xb0   : > { %s10976_s5 = smov 128   ;;  %s9447_s11 = scalar_lea.hbm %s10920_s8, 16 }
  0xb1   : > { %9168 = dma.hbm_to_vmem [thread:$0]  (!%p10974_p6), %s10918_s6, 12288, %s363_s21, [#allocation12], %s10976_s5, %s10976_s5, %s10975_s22  }
  0xb2   : > { %p9448_p5 = scmp.ne.s32.totalorder %s10920_s8, %s9447_s11  ;;  %p9454_p10 = scmp.lt.u32.totalorder %s9447_s11, %s10920_s8 }
  0xb4   : > { %p9450_p3 = pnand %p9448_p5, %p10973_p8 }
  0xb6   : > { %p9451_p7 = pneg %p9450_p3 }
  0xb8   : > { %p9456_p13 = pnand %p9454_p10, %p9451_p7 }
  0xba   : > { %9459 = shalt.err (!%p9456_p13)
}
  0xbb   : > { %s9460_s21 = scalar_lea.vmem %s9967_s1, 16  ;;  %s9467_s22 = scalar_lea.vmem %s9967_s1, 32 }
  0xbc   : > { %p9461_p9 = scmp.ne.s32.totalorder %s9967_s1, %s9460_s21  ;;  %p9468_p12 = scmp.lt.s32.totalorder %s9967_s1, %s9967_s1 }
  0xbd   : > { %p9469_p0 = scmp.lt.s32.totalorder %s9467_s22, %s9460_s21 }
  0xbe   : > { %p9463_p4 = pnand %p9461_p9, %p10973_p8 }
  0xbf   : > { %p9470_p2 = por %p9469_p0, %p9468_p12 }
  0xc0   : > { %p9464_p1 = pneg %p9463_p4 }
  0xc2   : > { %p9471_p5 = pnand %p9470_p2, %p9464_p1 }
  0xc4   : > { %9474 = shalt.err (!%p9471_p5)
}
  0xc5   : > { %9174 = dma.hbm_to_vmem [thread:$0]  (!%p10974_p6), %s10920_s8, 16, %s9967_s1, [#allocation15]  }
  0xc6   : > { %s9695_s17 = smov [#allocation17]   ;;  %s10018_s11 = scalar_lea.hbm %s10912_s0, %s9919_s26 }
  0xc7   : > { %s398_s28 = sshll.u32 %s9695_s17, 4  ;;  %s9475_s15 = scalar_lea.hbm %s10921_s9, 16  ;;  %s399_s28 = int_to_ptr.vmem [resolvable:$true] %s398_s28 }
  0xc8   : > { %p9476_p3 = scmp.ne.s32.totalorder %s10921_s9, %s9475_s15  ;;  %p9482_p13 = scmp.lt.u32.totalorder %s9475_s15, %s10921_s9 }
  0xca   : > { %p9478_p7 = pnand %p9476_p3, %p10973_p8 }
  0xcc   : > { %p9479_p10 = pneg %p9478_p7 }
  0xce   : > { %p9484_p9 = pnand %p9482_p13, %p9479_p10 }
  0xd0   : > { %9487 = shalt.err (!%p9484_p9)
}
  0xd1   : > { %s9488_s5 = scalar_lea.vmem %s399_s28, 16  ;;  %s9495_s17 = scalar_lea.vmem %s399_s28, 32 }
  0xd2   : > { %p9489_p4 = scmp.ne.s32.totalorder %s399_s28, %s9488_s5  ;;  %p9496_p0 = scmp.lt.s32.totalorder %s399_s28, %s399_s28 }
  0xd3   : > { %p9497_p2 = scmp.lt.s32.totalorder %s9495_s17, %s9488_s5 }
  0xd4   : > { %p9491_p1 = pnand %p9489_p4, %p10973_p8 }
  0xd5   : > { %p9498_p5 = por %p9497_p2, %p9496_p0 }
  0xd6   : > { %p9492_p12 = pneg %p9491_p1 }
  0xd8   : > { %p9499_p11 = pnand %p9498_p5, %p9492_p12 }
  0xda   : > { %9502 = shalt.err (!%p9499_p11)
}
  0xdb   : > { %9177 = dma.hbm_to_vmem [thread:$0]  (!%p10974_p6), %s10921_s9, 16, %s399_s28, [#allocation18]  }
  0xdc   : > { %s413_s16 = scalar_lea.vmem [#allocation2], %s9916_s24  ;;  %s10045_s27 = scalar_lea.hbm %s10914_s2, %s9919_s26 }
  0xdd   : > { %s420_s13 = sshll.u32 %s413_s16, 4  ;;  %s10977_s21 = sand.u32 1, %s9679_s19   ;;  %s10039_s13 = int_to_ptr.vmem [resolvable:$true] %s420_s13 }
  0xde   : > { %s410_s22 = scalar_lea.sflag [#allocation3], %s10977_s21  ;;  %s9503_s1 = scalar_lea.hbm %s10018_s11, 128 }
  0xdf   : > { %p9504_p11 = scmp.ne.s32.totalorder %s10018_s11, %s9503_s1  ;;  %p10978_p8 = scmp.ne.s32.totalorder %s10972_s7, 0 }
  0xe0   : > { %s9508_s28 = scalar_lea.hbm %s10912_s0, 256  ;;  %p9509_p6 = scmp.lt.u32.totalorder %s10018_s11, %s10912_s0 }
  0xe1   : > { %p9506_p3 = pnand %p9504_p11, %p10978_p8  ;;  %p9510_p10 = scmp.lt.u32.totalorder %s9508_s28, %s9503_s1 }
  0xe2   : > { %p9512_p9 = scmp.lt.u32.totalorder %s9503_s1, %s10018_s11 }
  0xe3   : > { %p9507_p7 = pneg %p9506_p3  ;;  %p9511_p13 = por %p9510_p10, %p9509_p6 }
  0xe5   : > { %p9513_p4 = por %p9512_p9, %p9511_p13 }
  0xe7   : > { %p9514_p1 = pnand %p9513_p4, %p9507_p7 }
  0xe9   : > { %9517 = shalt.err (!%p9514_p1)
}
  0xea   : > { %s9518_s14 = scalar_lea.vmem %s10039_s13, 128  ;;  %s9696_s16 = smov [#allocation2]  }
  0xeb   : > { %p9519_p12 = scmp.ne.s32.totalorder %s10039_s13, %s9518_s14  ;;  %s9523_s12 = sshll.u32 %s9696_s16, 4  ;;  %s9524_s12 = int_to_ptr.vmem [resolvable:$false] %s9523_s12 }
  0xec   : > { %s9525_s15 = scalar_lea.vmem %s9524_s12, 256  ;;  %p9526_p5 = scmp.lt.s32.totalorder %s10039_s13, %s9524_s12 }
  0xed   : > { %p9521_p0 = pnand %p9519_p12, %p10978_p8  ;;  %p9527_p11 = scmp.lt.s32.totalorder %s9525_s15, %s9518_s14 }
  0xef   : > { %p9522_p2 = pneg %p9521_p0  ;;  %p9528_p3 = por %p9527_p11, %p9526_p5 }
  0xf1   : > { %p9529_p6 = pnand %p9528_p3, %p9522_p2 }
  0xf3   : > { %9532 = shalt.err (!%p9529_p6)
}
  0xf4   : > { %p10979_p7 = scmp.ne.s32.totalorder %s10970_s10, 0  ;;  %s449_s21 = scalar_lea.vmem [#allocation7], %s9916_s24 }
  0xf5   : > { %s456_s1 = sshll.u32 %s449_s21, 4  ;;  %s10075_s28 = scalar_lea.hbm %s10915_s3, %s9919_s26  ;;  %s457_s1 = int_to_ptr.vmem [resolvable:$true] %s456_s1 }
  0xf6   : > { %9181 = dma.hbm_to_vmem [thread:$0]  (!%p10979_p7), %s10018_s11, 128, %s10039_s13, %s410_s22  }
  0xf7   : > { %s9533_s17 = scalar_lea.hbm %s10045_s27, 128  ;;  %s9538_s16 = scalar_lea.hbm %s10914_s2, 256 }
  0xf8   : > { %p9534_p10 = scmp.ne.s32.totalorder %s10045_s27, %s9533_s17  ;;  %p9539_p4 = scmp.lt.u32.totalorder %s10045_s27, %s10914_s2 }
  0xf9   : > { %p9540_p1 = scmp.lt.u32.totalorder %s9538_s16, %s9533_s17  ;;  %p9542_p0 = scmp.lt.u32.totalorder %s9533_s17, %s10045_s27 }
  0xfa   : > { %p9536_p13 = pnand %p9534_p10, %p10978_p8 }
  0xfb   : > { %p9541_p12 = por %p9540_p1, %p9539_p4 }
  0xfc   : > { %p9537_p9 = pneg %p9536_p13 }
  0xfd   : > { %p9543_p2 = por %p9542_p0, %p9541_p12 }
  0xff   : > { %p9544_p5 = pnand %p9543_p2, %p9537_p9 }
 0x101   : > { %9547 = shalt.err (!%p9544_p5)
}
 0x102   : > { %s9548_s26 = scalar_lea.vmem %s457_s1, 128  ;;  %s9697_s11 = smov [#allocation7]  }
 0x103   : > { %p9549_p11 = scmp.ne.s32.totalorder %s457_s1, %s9548_s26  ;;  %s9553_s13 = sshll.u32 %s9697_s11, 4  ;;  %s9554_s13 = int_to_ptr.vmem [resolvable:$false] %s9553_s13 }
 0x104   : > { %s9555_s22 = scalar_lea.vmem %s9554_s13, 256  ;;  %p9556_p10 = scmp.lt.s32.totalorder %s457_s1, %s9554_s13 }
 0x105   : > { %p9551_p3 = pnand %p9549_p11, %p10978_p8  ;;  %p9557_p13 = scmp.lt.s32.totalorder %s9555_s22, %s9548_s26 }
 0x107   : > { %p9552_p6 = pneg %p9551_p3  ;;  %p9558_p7 = por %p9557_p13, %p9556_p10 }
 0x109   : > { %p9559_p1 = pnand %p9558_p7, %p9552_p6 }
 0x10b   : > { %9562 = shalt.err (!%p9559_p1)
}
 0x10c   : > { %p10980_p4 = scmp.ne.s32.totalorder %s10970_s10, 0  ;;  %s467_s21 = scalar_lea.vmem [#allocation8], %s9916_s24 }
 0x10d   : > { %s474_s25 = sshll.u32 %s467_s21, 4  ;;  %s10981_s5 = sand.u32 1, %s9683_s20   ;;  %s475_s25 = int_to_ptr.vmem [resolvable:$true] %s474_s25 }
 0x10e   : > { %9187 = dma.hbm_to_vmem [thread:$0]  (!%p10980_p4), %s10045_s27, 128, %s457_s1, %s9937_s4  }
 0x10f   : > { %s464_s17 = scalar_lea.sflag [#allocation9], %s10981_s5  ;;  %s9563_s30 = scalar_lea.hbm %s10075_s28, 128 }
 0x110   : > { %p9564_p7 = scmp.ne.s32.totalorder %s10075_s28, %s9563_s30  ;;  %s9568_s12 = scalar_lea.hbm %s10915_s3, 256 }
 0x111   : > { %p9569_p0 = scmp.lt.u32.totalorder %s10075_s28, %s10915_s3  ;;  %p9570_p2 = scmp.lt.u32.totalorder %s9568_s12, %s9563_s30 }
 0x112   : > { %p9566_p9 = pnand %p9564_p7, %p10978_p8  ;;  %p9572_p11 = scmp.lt.u32.totalorder %s9563_s30, %s10075_s28 }
 0x113   : > { %p9571_p5 = por %p9570_p2, %p9569_p0 }
 0x114   : > { %p9567_p12 = pneg %p9566_p9 }
 0x115   : > { %p9573_p3 = por %p9572_p11, %p9571_p5 }
 0x117   : > { %p9574_p6 = pnand %p9573_p3, %p9567_p12 }
 0x119   : > { %9577 = shalt.err (!%p9574_p6)
}
 0x11a   : > { %s9578_s4 = scalar_lea.vmem %s475_s25, 128  ;;  %s9698_s24 = smov [#allocation8]  }
 0x11b   : > { %p9579_p10 = scmp.ne.s32.totalorder %s475_s25, %s9578_s4  ;;  %s9583_s27 = sshll.u32 %s9698_s24, 4  ;;  %s9584_s27 = int_to_ptr.vmem [resolvable:$false] %s9583_s27 }
 0x11c   : > { %s9585_s1 = scalar_lea.vmem %s9584_s27, 256  ;;  %p9586_p7 = scmp.lt.s32.totalorder %s475_s25, %s9584_s27 }
 0x11d   : > { %p9581_p13 = pnand %p9579_p10, %p10978_p8  ;;  %p9587_p9 = scmp.lt.s32.totalorder %s9585_s1, %s9578_s4 }
 0x11f   : > { %p9582_p1 = pneg %p9581_p13  ;;  %p9588_p4 = por %p9587_p9, %p9586_p7 }
 0x121   : > { %p9589_p0 = pnand %p9588_p4, %p9582_p1 }
 0x123   : > { %9592 = shalt.err (!%p9589_p0)
}
 0x124   : > { %p10982_p2 = scmp.ne.s32.totalorder %s10970_s10, 0  ;;  %s10983_s11 = sld [smem:[#allocation29_spill]] }
 0x126   : > { %9190 = dma.hbm_to_vmem [thread:$0]  (!%p10982_p2), %s10075_s28, 128, %s475_s25, %s464_s17  }
 0x12a   : > { %p10984_p12 = scmp.ne.s32.totalorder %s10983_s11, 0 }
 0x12b   : > { %s10118_s7 = sand.u32 (!%p10984_p12), 1, %s9675_s18   ;;  %p10985_p8 = scmp.ne.s32.totalorder (!%p10984_p12), %s10965_s29, 0 }
 0x12c   : > { %483 = sbr.rel (%p10984_p12) target bundleno = 2030 (0x7ee), region = 60  ;;  %s10121_s13 = sshll.u32 (!%p10984_p12), %s10118_s7, 3 }
 0x12d   : > { %s486_s22 = scalar_lea.sflag (!%p10984_p12), [#allocation3], %s10118_s7  ;;  %s489_s21 = scalar_lea.vmem (!%p10984_p12), [#allocation2], %s10121_s13 }
 0x133   : > { %9638 = dma.done.wait (%p10985_p8), %s486_s22, 128  }
 0x134   : > { %9640 = vsyncadd (%p10985_p8), %s486_s22, 4294967168  ;;  %s494_s10 = sand.u32 1, %s9784_s23   ;;  %s498_s25 = scalar_lea.vmem [#allocation5], %s10121_s13 }
 0x135   : > { %s495_s28 = scalar_lea.sflag [#allocation6], %s494_s10 }
 0x136   : > { %9642 = dma.done.wait (%p10985_p8), %s495_s28, 256  }
 0x137   : > { %9644 = vsyncadd (%p10985_p8), %s495_s28, 4294967040  ;;  %s507_s5 = scalar_lea.vmem [#allocation7], %s10121_s13  ;;  %s513_s17 = scalar_lea.sflag [#allocation9], %s494_s10 }
 0x138   : > { %s516_s30 = scalar_lea.vmem [#allocation8], %s10121_s13 }
 0x139   : > { %9646 = dma.done.wait (%p10985_p8), %s513_s17, 128  }
 0x13a   : > { %9648 = vsyncadd (%p10985_p8), %s513_s17, 4294967168  ;;  %p10986_p4 = scmp.eq.s32.totalorder %s9784_s23, 0 }
 0x13c   : > { %9650 = dma.done.wait (%p10986_p4), [#allocation9], 36864   ;;  %p10987_p5 = pmov %p10986_p4 }
 0x13d   : > { %p10988_p11 = pmov %p10986_p4 }
 0x13e   : > { %9652 = vsyncadd (%p10987_p5), [#allocation9], 4294930432 }
 0x13f   : > { %9654 = dma.done.wait (%p10988_p11), [#allocation12], 12864   ;;  %p10989_p3 = pmov %p10986_p4 }
 0x141   : > { %9656 = vsyncadd (%p10989_p3), [#allocation12], 4294954432  ;;  %p10990_p6 = pmov %p10989_p3 }
 0x142   : > { %p10991_p10 = pmov %p10989_p3 }
 0x143   : > { %9658 = dma.done.wait (%p10990_p6), [#allocation15], 32  }
 0x144   : > { %9660 = vsyncadd (%p10991_p10), [#allocation15], 4294967264  ;;  %p10992_p13 = pmov %p10989_p3 }
 0x145   : > { %p10993_p1 = pmov %p10989_p3 }
 0x146   : > { %9662 = dma.done.wait (%p10992_p13), [#allocation18], 16  }
 0x147   : > { %9664 = vsyncadd (%p10993_p1), [#allocation18], 4294967280  ;;  %v9699_v0 = vmov 0.0|0.0   ;;  %vm9700_vm0 = vmmov 0   ;;  %v9701_v1 = vmov 0.0   ;;  %v607_v2 = vld [vmem:[#allocation10] sm:$0xff] }
 0x148   : > { %8548 = vmatprep.subr.bf16.mxu0 %v9699_v0  ;;  %8560 = vmatprep.subr.bf16.mxu1 %v9699_v0  ;;  %v608_v3 = vld [vmem:[#allocation10 + $0x8] sm:$0xff]  ;;  %v615_v4 = vld [vmem:[#allocation10 + $0x40] sm:$0xff]  ;;  %v609_v7 = vld [vmem:[#allocation10 + $0x10] sm:$0xff]  ;;  %vm1147_vm1 = vcmask 523264   ;;  %vm4590_vm2 = vcmask 64512   ;;  %p599_p7 = scmp.lt.s32.totalorder %s9784_s23, 1 }
 0x149   : > { %7532 = vmatprep.mubr.msk.f32.mxu0 %vm9700_vm0, %v9701_v1  ;;  %7551 = vmatprep.mubr.msk.f32.mxu1 %vm9700_vm0, %v9701_v1  ;;  %v8549_v5 = vpack.c.bf16 %v608_v3, %v607_v2  ;;  %v616_v6 = vld [vmem:[#allocation10 + $0x48] sm:$0xff]  ;;  %v610_v8 = vld [vmem:[#allocation10 + $0x18] sm:$0xff]  ;;  %v617_v10 = vld [vmem:[#allocation10 + $0x50] sm:$0xff]  ;;  %s10994_s15 = sld [smem:[#allocation39_spill]]  ;;  %s10995_s4 = sld [smem:[#allocation32_spill]] }
 0x14a   : > { %v8561_v9 = vpack.c.bf16 %v616_v6, %v615_v4  ;;  %v618_v11 = vld [vmem:[#allocation10 + $0x58] sm:$0xff]  ;;  %v8552_v12 = vpack.c.bf16 %v610_v8, %v609_v7  ;;  %v611_v14 = vld [vmem:[#allocation10 + $0x20] sm:$0xff]  ;;  %v612_v15 = vld [vmem:[#allocation10 + $0x28] sm:$0xff]  ;;  %s600_s29 = scalar_select %p599_p7, %s9784_s23, 1 }
 0x14b   : > { %8550 = vmatpush3.bf16.msra.mxu0 %v8549_v5  ;;  %v8564_v13 = vpack.c.bf16 %v618_v11, %v617_v10  ;;  %v619_v16 = vld [vmem:[#allocation10 + $0x60] sm:$0xff]  ;;  %v620_v17 = vld [vmem:[#allocation10 + $0x68] sm:$0xff]  ;;  %v8555_v18 = vpack.c.bf16 %v612_v15, %v611_v14  ;;  %v613_v20 = vld [vmem:[#allocation10 + $0x30] sm:$0xff]  ;;  %s7033_s24 = sshll.u32 %s9784_s23, 7  ;;  %s591_s27 = scalar_lea.vmem [#allocation19], %s10121_s13 }
 0x14c   : > { %8562 = vmatpush3.bf16.msra.mxu1 %v8561_v9  ;;  %8551 = vmatprep.subr.bf16.mxu0 %v9699_v0  ;;  %v8567_v19 = vpack.c.bf16 %v620_v17, %v619_v16  ;;  %v614_v21 = vld [vmem:[#allocation10 + $0x38] sm:$0xff]  ;;  %v621_v22 = vld [vmem:[#allocation10 + $0x70] sm:$0xff]  ;;  %v623_v26 = vld [vmem:[#allocation10 + $0x80] sm:$0xff]  ;;  %s9124_s14 = smul.u32 96, %s600_s29  ;;  %s6657_s1 = sshll.u32 %s591_s27, 4  ;;  %s10870_s1 = int_to_ptr.vmem [resolvable:$true] %s6657_s1 }
 0x14d   : > { %8563 = vmatprep.subr.bf16.mxu1 %v9699_v0  ;;  %v622_v23 = vld [vmem:[#allocation10 + $0x78] sm:$0xff]  ;;  %v8558_v24 = vpack.c.bf16 %v614_v21, %v613_v20  ;;  %v624_v27 = vld [vmem:[#allocation10 + $0x88] sm:$0xff]  ;;  %v631_v28 = vld [vmem:[#allocation10 + $0xc0] sm:$0xff]  ;;  %s6639_s28 = scalar_lea.sflag [#allocation4], %s10118_s7  ;;  %s9702_s23 = smov [#allocation19]  }
 0x14e   : > { %v8570_v25 = vpack.c.bf16 %v622_v23, %v621_v22  ;;  %v632_v29 = vld [vmem:[#allocation10 + $0xc8] sm:$0xff]  ;;  %v8573_v31 = vpack.c.bf16 %v624_v27, %v623_v26  ;;  %v625_v33 = vld [vmem:[#allocation10 + $0x90] sm:$0xff]  ;;  %v626_v34 = vld [vmem:[#allocation10 + $0x98] sm:$0xff]  ;;  %s9597_s13 = sshll.u32 %s9702_s23, 4  ;;  %s9598_s13 = int_to_ptr.vmem [resolvable:$false] %s9597_s13 }
 0x14f   : > { %8553 = vmatpush3.bf16.msra.mxu0 %v8552_v12  ;;  %v10171_v30 = vld [vmem:[%s489_s21] sm:$0xff]  ;;  %v8585_v32 = vpack.c.bf16 %v632_v29, %v631_v28  ;;  %v633_v35 = vld [vmem:[#allocation10 + $0xd0] sm:$0xff]  ;;  %v634_v36 = vld [vmem:[#allocation10 + $0xd8] sm:$0xff]  ;;  %v8576_v37 = vpack.c.bf16 %v626_v34, %v625_v33  ;;  %s10688_s26 = scalar_lea.vmem %s10994_s15, %s9124_s14  ;;  %p10997_p0 = scmp.ne.s32.totalorder %s10995_s4, 0 }
 0x150   : > { %8565 = vmatpush3.bf16.msra.mxu1 %v8564_v13  ;;  %8554 = vmatprep.subr.bf16.mxu0 %v9699_v0  ;;  %v8588_v38 = vpack.c.bf16 %v634_v36, %v633_v35  ;;  %v627_v39 = vld [vmem:[#allocation10 + $0xa0] sm:$0xff]  ;;  %v628_v40 = vld [vmem:[#allocation10 + $0xa8] sm:$0xff]  ;;  %v629_v45 = vld [vmem:[#allocation10 + $0xb0] sm:$0xff]  ;;  %p9600_p8 = scmp.lt.s32.totalorder %s10870_s1, %s9598_s13 }
 0x151   : > { %8566 = vmatprep.subr.bf16.mxu1 %v9699_v0  ;;  %v635_v41 = vld [vmem:[#allocation10 + $0xe0] sm:$0xff]  ;;  %v636_v42 = vld [vmem:[#allocation10 + $0xe8] sm:$0xff]  ;;  %v8579_v43 = vpack.c.bf16 %v628_v40, %v627_v39  ;;  %v630_v46 = vld [vmem:[#allocation10 + $0xb8] sm:$0xff] }
 0x152   : > { %v8591_v44 = vpack.c.bf16 %v636_v42, %v635_v41  ;;  %v637_v47 = vld [vmem:[#allocation10 + $0xf0] sm:$0xff]  ;;  %v638_v48 = vld [vmem:[#allocation10 + $0xf8] sm:$0xff]  ;;  %v8582_v49 = vpack.c.bf16 %v630_v46, %v629_v45  ;;  %v639_v51 = vld [vmem:[#allocation10 + $0x100] sm:$0xff] }
 0x153   : > { %8556 = vmatpush3.bf16.msra.mxu0 %v8555_v18  ;;  %v8594_v50 = vpack.c.bf16 %v638_v48, %v637_v47  ;;  %v640_v52 = vld [vmem:[#allocation10 + $0x108] sm:$0xff]  ;;  %v647_v53 = vld [vmem:[#allocation10 + $0x140] sm:$0xff]  ;;  %v641_v57 = vld [vmem:[#allocation10 + $0x110] sm:$0xff] }
 0x154   : > { %8568 = vmatpush3.bf16.msra.mxu1 %v8567_v19  ;;  %8557 = vmatprep.subr.bf16.mxu0 %v9699_v0  ;;  %v648_v54 = vld [vmem:[#allocation10 + $0x148] sm:$0xff]  ;;  %v8597_v55 = vpack.c.bf16 %v640_v52, %v639_v51  ;;  %v642_v58 = vld [vmem:[#allocation10 + $0x118] sm:$0xff]  ;;  %v649_v59 = vld [vmem:[#allocation10 + $0x150] sm:$0xff] }
 0x155   : > { %8569 = vmatprep.subr.bf16.mxu1 %v9699_v0  ;;  %v8609_v56 = vpack.c.bf16 %v648_v54, %v647_v53  ;;  %v650_v60 = vld [vmem:[#allocation10 + $0x158] sm:$0xff]  ;;  %v8600_v61 = vpack.c.bf16 %v642_v58, %v641_v57  ;;  %v643_v63 = vld [vmem:[#allocation10 + $0x120] sm:$0xff]  ;;  %v644_v2 = vld [vmem:[#allocation10 + $0x128] sm:$0xff] }
 0x156   : > { %v8612_v62 = vpack.c.bf16 %v650_v60, %v649_v59  ;;  %v651_v3 = vld [vmem:[#allocation10 + $0x160] sm:$0xff]  ;;  %v652_v4 = vld [vmem:[#allocation10 + $0x168] sm:$0xff]  ;;  %v8603_v5 = vpack.c.bf16 %v644_v2, %v643_v63  ;;  %v645_v7 = vld [vmem:[#allocation10 + $0x130] sm:$0xff] }
 0x157   : > { %8559 = vmatpush3.bf16.msra.mxu0 %v8558_v24  ;;  %v8615_v6 = vpack.c.bf16 %v652_v4, %v651_v3  ;;  %v646_v8 = vld [vmem:[#allocation10 + $0x138] sm:$0xff]  ;;  %v653_v9 = vld [vmem:[#allocation10 + $0x170] sm:$0xff]  ;;  %v655_v13 = vld [vmem:[#allocation10 + $0x180] sm:$0xff] }
 0x158   : > { %8571 = vmatpush3.bf16.msra.mxu1 %v8570_v25  ;;  %8572 = vmatprep.subr.bf16.mxu0 %v9699_v0  ;;  %v654_v10 = vld [vmem:[#allocation10 + $0x178] sm:$0xff]  ;;  %v8606_v11 = vpack.c.bf16 %v646_v8, %v645_v7  ;;  %v656_v14 = vld [vmem:[#allocation10 + $0x188] sm:$0xff]  ;;  %v663_v15 = vld [vmem:[#allocation10 + $0x1c0] sm:$0xff] }
 0x159   : > { %8584 = vmatprep.subr.bf16.mxu1 %v9699_v0  ;;  %v8618_v12 = vpack.c.bf16 %v654_v10, %v653_v9  ;;  %v664_v16 = vld [vmem:[#allocation10 + $0x1c8] sm:$0xff]  ;;  %v8621_v17 = vpack.c.bf16 %v656_v14, %v655_v13  ;;  %v657_v19 = vld [vmem:[#allocation10 + $0x190] sm:$0xff]  ;;  %v658_v20 = vld [vmem:[#allocation10 + $0x198] sm:$0xff] }
 0x15a   : > { %7533 = vmatmul.mubr.msk.f32.vlgmr.msra.gmra.mrb[0].mxu0 %vm1147_vm1, %v10171_v30  ;;  %v8633_v18 = vpack.c.bf16 %v664_v16, %v663_v15  ;;  %v665_v21 = vld [vmem:[#allocation10 + $0x1d0] sm:$0xff]  ;;  %v666_v22 = vld [vmem:[#allocation10 + $0x1d8] sm:$0xff]  ;;  %v8624_v23 = vpack.c.bf16 %v658_v20, %v657_v19  ;;  %v659_v25 = vld [vmem:[#allocation10 + $0x1a0] sm:$0xff] }
 0x15b   : > { %7552 = vmatmul.mubr.msk.f32.vlgmr.msra.gmra.mrb[0].mxu1 %vm1147_vm1, %v10171_v30  ;;  %8574 = vmatpush3.bf16.msra.mxu0 %v8573_v31  ;;  %v8636_v24 = vpack.c.bf16 %v666_v22, %v665_v21  ;;  %v660_v26 = vld [vmem:[#allocation10 + $0x1a8] sm:$0xff]  ;;  %v667_v27 = vld [vmem:[#allocation10 + $0x1e0] sm:$0xff]  ;;  %v662_v33 = vld [vmem:[#allocation10 + $0x1b8] sm:$0xff] }
 0x15c   : > { %8586 = vmatpush3.bf16.msra.mxu1 %v8585_v32  ;;  %8575 = vmatprep.subr.bf16.mxu0 %v9699_v0  ;;  %v668_v28 = vld [vmem:[#allocation10 + $0x1e8] sm:$0xff]  ;;  %v8627_v29 = vpack.c.bf16 %v660_v26, %v659_v25  ;;  %v661_v32 = vld [vmem:[#allocation10 + $0x1b0] sm:$0xff]  ;;  %v670_v35 = vld [vmem:[#allocation10 + $0x1f8] sm:$0xff] }
 0x15d   : > { %8587 = vmatprep.subr.bf16.mxu1 %v9699_v0  ;;  %7570 = vmatprep.mubr.msk.f32.mxu0 %vm9700_vm0, %v9701_v1  ;;  %v8639_v31 = vpack.c.bf16 %v668_v28, %v667_v27  ;;  %v669_v34 = vld [vmem:[#allocation10 + $0x1f0] sm:$0xff]  ;;  %v8630_v36 = vpack.c.bf16 %v662_v33, %v661_v32  ;;  %v672_v39 = vld [vmem:[#allocation10 + $0x208] sm:$0xff]  ;;  %v679_v40 = vld [vmem:[#allocation10 + $0x240] sm:$0xff] }
 0x15e   : > { %7589 = vmatprep.mubr.msk.f32.mxu1 %vm9700_vm0, %v9701_v1  ;;  %v680_v41 = vld [vmem:[#allocation10 + $0x248] sm:$0xff]  ;;  %v674_v45 = vld [vmem:[#allocation10 + $0x218] sm:$0xff]  ;;  %v681_v46 = vld [vmem:[#allocation10 + $0x250] sm:$0xff] }
 0x15f   : > { %8577 = vmatpush3.bf16.msra.mxu0 %v8576_v37  ;;  %v8642_v37 = vpack.c.bf16 %v670_v35, %v669_v34  ;;  %v682_v47 = vld [vmem:[#allocation10 + $0x258] sm:$0xff]  ;;  %v676_v51 = vld [vmem:[#allocation10 + $0x228] sm:$0xff]  ;;  %v683_v52 = vld [vmem:[#allocation10 + $0x260] sm:$0xff] }
 0x160   : > { %8589 = vmatpush3.bf16.msra.mxu1 %v8588_v38  ;;  %8578 = vmatprep.subr.bf16.mxu0 %v9699_v0  ;;  %v671_v38 = vld [vmem:[#allocation10 + $0x200] sm:$0xff]  ;;  %v684_v53 = vld [vmem:[#allocation10 + $0x268] sm:$0xff]  ;;  %v678_v57 = vld [vmem:[#allocation10 + $0x238] sm:$0xff] }
 0x161   : > { %8590 = vmatprep.subr.bf16.mxu1 %v9699_v0  ;;  %v8645_v42 = vpack.c.bf16 %v672_v39, %v671_v38  ;;  %v685_v58 = vld [vmem:[#allocation10 + $0x270] sm:$0xff]  ;;  %v686_v59 = vld [vmem:[#allocation10 + $0x278] sm:$0xff]  ;;  %v688_v63 = vld [vmem:[#allocation10 + $0x288] sm:$0xff] }
 0x162   : > { %v695_v2 = vld [vmem:[#allocation10 + $0x2c0] sm:$0xff]  ;;  %v696_v3 = vld [vmem:[#allocation10 + $0x2c8] sm:$0xff]  ;;  %v690_v7 = vld [vmem:[#allocation10 + $0x298] sm:$0xff] }
 0x163   : > { %8580 = vmatpush3.bf16.msra.mxu0 %v8579_v43  ;;  %v8657_v43 = vpack.c.bf16 %v680_v41, %v679_v40  ;;  %v697_v8 = vld [vmem:[#allocation10 + $0x2d0] sm:$0xff]  ;;  %v698_v9 = vld [vmem:[#allocation10 + $0x2d8] sm:$0xff]  ;;  %v692_v13 = vld [vmem:[#allocation10 + $0x2a8] sm:$0xff] }
 0x164   : > { %8592 = vmatpush3.bf16.msra.mxu1 %v8591_v44  ;;  %8581 = vmatprep.subr.bf16.mxu0 %v9699_v0  ;;  %v673_v44 = vld [vmem:[#allocation10 + $0x210] sm:$0xff]  ;;  %v699_v14 = vld [vmem:[#allocation10 + $0x2e0] sm:$0xff]  ;;  %v700_v15 = vld [vmem:[#allocation10 + $0x2e8] sm:$0xff] }
 0x165   : > { %8593 = vmatprep.subr.bf16.mxu1 %v9699_v0  ;;  %v8648_v48 = vpack.c.bf16 %v674_v45, %v673_v44  ;;  %v694_v19 = vld [vmem:[#allocation10 + $0x2b8] sm:$0xff]  ;;  %v701_v20 = vld [vmem:[#allocation10 + $0x2f0] sm:$0xff]  ;;  %v704_v25 = vld [vmem:[#allocation10 + $0x308] sm:$0xff] }
 0x166   : > { %v702_v21 = vld [vmem:[#allocation10 + $0x2f8] sm:$0xff]  ;;  %v711_v26 = vld [vmem:[#allocation10 + $0x340] sm:$0xff]  ;;  %v712_v27 = vld [vmem:[#allocation10 + $0x348] sm:$0xff] }
 0x167   : > { %8583 = vmatpush3.bf16.msra.mxu0 %v8582_v49  ;;  %v8660_v49 = vpack.c.bf16 %v682_v47, %v681_v46  ;;  %v706_v32 = vld [vmem:[#allocation10 + $0x318] sm:$0xff]  ;;  %v713_v33 = vld [vmem:[#allocation10 + $0x350] sm:$0xff]  ;;  %v708_v38 = vld [vmem:[#allocation10 + $0x328] sm:$0xff] }
 0x168   : > { %8595 = vmatpush3.bf16.msra.mxu1 %v8594_v50  ;;  %8596 = vmatprep.subr.bf16.mxu0 %v9699_v0  ;;  %v675_v50 = vld [vmem:[#allocation10 + $0x220] sm:$0xff]  ;;  %v714_v34 = vld [vmem:[#allocation10 + $0x358] sm:$0xff]  ;;  %v716_v40 = vld [vmem:[#allocation10 + $0x368] sm:$0xff] }
 0x169   : > { %8608 = vmatprep.subr.bf16.mxu1 %v9699_v0  ;;  %v8651_v54 = vpack.c.bf16 %v676_v51, %v675_v50  ;;  %v715_v39 = vld [vmem:[#allocation10 + $0x360] sm:$0xff]  ;;  %v717_v44 = vld [vmem:[#allocation10 + $0x370] sm:$0xff]  ;;  %v718_v45 = vld [vmem:[#allocation10 + $0x378] sm:$0xff] }
 0x16a   : > { %7571 = vmatmul.mubr.msk.f32.vlgmr.msra.gmra.mrb[2].mxu0 %vm1147_vm1, %v10171_v30  ;;  %v8711_v41 = vpack.c.bf16 %v716_v40, %v715_v39  ;;  %v8714_v47 = vpack.c.bf16 %v718_v45, %v717_v44  ;;  %v727_v50 = vld [vmem:[#allocation10 + $0x3c0] sm:$0xff]  ;;  %v728_v51 = vld [vmem:[#allocation10 + $0x3c8] sm:$0xff]  ;;  %v762_v44 = vld [vmem:[#allocation10 + $0x4d8] sm:$0xff] }
 0x16b   : > { %7590 = vmatmul.mubr.msk.f32.vlgmr.msra.gmra.mrb[2].mxu1 %vm1147_vm1, %v10171_v30  ;;  %8598 = vmatpush3.bf16.msra.mxu0 %v8597_v55  ;;  %v8663_v55 = vpack.c.bf16 %v684_v53, %v683_v52  ;;  %v10271_v52 = vld [vmem:[%s498_s25] sm:$0xff]  ;;  %v760_v39 = vld [vmem:[#allocation10 + $0x4c8] sm:$0xff]  ;;  %s9593_s25 = scalar_lea.vmem %s10870_s1, 128 }
 0x16c   : > { %8610 = vmatpush3.bf16.msra.mxu1 %v8609_v56  ;;  %8599 = vmatprep.subr.bf16.mxu0 %v9699_v0  ;;  %v677_v56 = vld [vmem:[#allocation10 + $0x230] sm:$0xff]  ;;  %p9594_p9 = scmp.ne.s32.totalorder %s10870_s1, %s9593_s25 }
 0x16d   : > { %8611 = vmatprep.subr.bf16.mxu1 %v9699_v0  ;;  %7608 = vmatprep.mubr.msk.f32.mxu0 %vm9700_vm0, %v9701_v1  ;;  %v8654_v60 = vpack.c.bf16 %v678_v57, %v677_v56  ;;  %v722_v56 = vld [vmem:[#allocation10 + $0x398] sm:$0xff]  ;;  %v729_v57 = vld [vmem:[#allocation10 + $0x3d0] sm:$0xff] }
 0x16e   : > { %7627 = vmatprep.mubr.msk.f32.mxu1 %vm9700_vm0, %v9701_v1  ;;  %p9595_p2 = pnand %p9594_p9, %p10997_p0 }
 0x16f   : > { %8601 = vmatpush3.bf16.msra.mxu0 %v8600_v61  ;;  %v8666_v61 = vpack.c.bf16 %v686_v59, %v685_v58  ;;  %v730_v58 = vld [vmem:[#allocation10 + $0x3d8] sm:$0xff] }
 0x170   : > { %8613 = vmatpush3.bf16.msra.mxu1 %v8612_v62  ;;  %8602 = vmatprep.subr.bf16.mxu0 %v9699_v0  ;;  %v687_v62 = vld [vmem:[#allocation10 + $0x280] sm:$0xff]  ;;  %p9596_p12 = pneg %p9595_p2 }
 0x171   : > { %8614 = vmatprep.subr.bf16.mxu1 %v9699_v0  ;;  %v8669_v4 = vpack.c.bf16 %v688_v63, %v687_v62  ;;  %v724_v62 = vld [vmem:[#allocation10 + $0x3a8] sm:$0xff]  ;;  %v731_v63 = vld [vmem:[#allocation10 + $0x3e0] sm:$0xff] }
 0x173   : > { %8604 = vmatpush3.bf16.msra.mxu0 %v8603_v5  ;;  %v8681_v5 = vpack.c.bf16 %v696_v3, %v695_v2  ;;  %v732_v2 = vld [vmem:[#allocation10 + $0x3e8] sm:$0xff] }
 0x174   : > { %8616 = vmatpush3.bf16.msra.mxu1 %v8615_v6  ;;  %8605 = vmatprep.subr.bf16.mxu0 %v9699_v0  ;;  %v689_v6 = vld [vmem:[#allocation10 + $0x290] sm:$0xff] }
 0x175   : > { %8617 = vmatprep.subr.bf16.mxu1 %v9699_v0  ;;  %v8672_v10 = vpack.c.bf16 %v690_v7, %v689_v6  ;;  %v726_v6 = vld [vmem:[#allocation10 + $0x3b8] sm:$0xff]  ;;  %v733_v7 = vld [vmem:[#allocation10 + $0x3f0] sm:$0xff] }
 0x177   : > { %8607 = vmatpush3.bf16.msra.mxu0 %v8606_v11  ;;  %v8684_v11 = vpack.c.bf16 %v698_v9, %v697_v8  ;;  %v734_v8 = vld [vmem:[#allocation10 + $0x3f8] sm:$0xff] }
 0x178   : > { %8619 = vmatpush3.bf16.msra.mxu1 %v8618_v12  ;;  %8620 = vmatprep.subr.bf16.mxu0 %v9699_v0  ;;  %v691_v12 = vld [vmem:[#allocation10 + $0x2a0] sm:$0xff] }
 0x179   : > { %8632 = vmatprep.subr.bf16.mxu1 %v9699_v0  ;;  %v8675_v16 = vpack.c.bf16 %v692_v13, %v691_v12  ;;  %v736_v12 = vld [vmem:[#allocation10 + $0x408] sm:$0xff]  ;;  %v743_v13 = vld [vmem:[#allocation10 + $0x440] sm:$0xff] }
 0x17a   : > { %7609 = vmatmul.mubr.msk.f32.vlgmr.msra.gmra.mrb[4].mxu0 %vm1147_vm1, %v10171_v30 }
 0x17b   : > { %7628 = vmatmul.mubr.msk.f32.vlgmr.msra.gmra.mrb[4].mxu1 %vm1147_vm1, %v10171_v30  ;;  %8622 = vmatpush3.bf16.msra.mxu0 %v8621_v17  ;;  %v8687_v17 = vpack.c.bf16 %v700_v15, %v699_v14  ;;  %v744_v14 = vld [vmem:[#allocation10 + $0x448] sm:$0xff] }
 0x17c   : > { %8634 = vmatpush3.bf16.msra.mxu1 %v8633_v18  ;;  %8623 = vmatprep.subr.bf16.mxu0 %v9699_v0  ;;  %v693_v18 = vld [vmem:[#allocation10 + $0x2b0] sm:$0xff] }
 0x17d   : > { %8635 = vmatprep.subr.bf16.mxu1 %v9699_v0  ;;  %7646 = vmatprep.mubr.msk.f32.mxu0 %vm9700_vm0, %v9701_v1  ;;  %v8678_v22 = vpack.c.bf16 %v694_v19, %v693_v18  ;;  %v738_v18 = vld [vmem:[#allocation10 + $0x418] sm:$0xff]  ;;  %v745_v19 = vld [vmem:[#allocation10 + $0x450] sm:$0xff] }
 0x17e   : > { %7665 = vmatprep.mubr.msk.f32.mxu1 %vm9700_vm0, %v9701_v1 }
 0x17f   : > { %8625 = vmatpush3.bf16.msra.mxu0 %v8624_v23  ;;  %v8690_v23 = vpack.c.bf16 %v702_v21, %v701_v20  ;;  %v746_v20 = vld [vmem:[#allocation10 + $0x458] sm:$0xff] }
 0x180   : > { %8637 = vmatpush3.bf16.msra.mxu1 %v8636_v24  ;;  %8626 = vmatprep.subr.bf16.mxu0 %v9699_v0  ;;  %v703_v24 = vld [vmem:[#allocation10 + $0x300] sm:$0xff] }
 0x181   : > { %8638 = vmatprep.subr.bf16.mxu1 %v9699_v0  ;;  %v8693_v28 = vpack.c.bf16 %v704_v25, %v703_v24  ;;  %v740_v24 = vld [vmem:[#allocation10 + $0x428] sm:$0xff]  ;;  %v747_v25 = vld [vmem:[#allocation10 + $0x460] sm:$0xff] }
 0x183   : > { %8628 = vmatpush3.bf16.msra.mxu0 %v8627_v29  ;;  %v8705_v29 = vpack.c.bf16 %v712_v27, %v711_v26  ;;  %v748_v26 = vld [vmem:[#allocation10 + $0x468] sm:$0xff] }
 0x184   : > { %8640 = vmatpush3.bf16.msra.mxu1 %v8639_v31  ;;  %8629 = vmatprep.subr.bf16.mxu0 %v9699_v0  ;;  %v705_v31 = vld [vmem:[#allocation10 + $0x310] sm:$0xff] }
 0x185   : > { %8641 = vmatprep.subr.bf16.mxu1 %v9699_v0  ;;  %v8696_v35 = vpack.c.bf16 %v706_v32, %v705_v31  ;;  %v742_v31 = vld [vmem:[#allocation10 + $0x438] sm:$0xff]  ;;  %v749_v32 = vld [vmem:[#allocation10 + $0x470] sm:$0xff] }
 0x187   : > { %8631 = vmatpush3.bf16.msra.mxu0 %v8630_v36  ;;  %v8708_v36 = vpack.c.bf16 %v714_v34, %v713_v33  ;;  %v750_v33 = vld [vmem:[#allocation10 + $0x478] sm:$0xff] }
 0x188   : > { %8643 = vmatpush3.bf16.msra.mxu1 %v8642_v37  ;;  %8644 = vmatprep.subr.bf16.mxu0 %v9699_v0  ;;  %v707_v37 = vld [vmem:[#allocation10 + $0x320] sm:$0xff] }
 0x189   : > { %8656 = vmatprep.subr.bf16.mxu1 %v9699_v0 }
 0x18a   : > { %7647 = vmatmul.mubr.msk.f32.vlgmr.msra.gmra.mrb[6].mxu0 %vm1147_vm1, %v10171_v30 }
 0x18b   : > { %7666 = vmatmul.mubr.msk.f32.vlgmr.msra.gmra.mrb[6].mxu1 %vm1147_vm1, %v10171_v30  ;;  %8646 = vmatpush3.bf16.msra.mxu0 %v8645_v42  ;;  %v709_v42 = vld [vmem:[#allocation10 + $0x330] sm:$0xff] }
 0x18c   : > { %8658 = vmatpush3.bf16.msra.mxu1 %v8657_v43  ;;  %8647 = vmatprep.subr.bf16.mxu0 %v9699_v0  ;;  %v710_v43 = vld [vmem:[#allocation10 + $0x338] sm:$0xff] }
 0x18d   : > { %8659 = vmatprep.subr.bf16.mxu1 %v9699_v0  ;;  %7684 = vmatprep.mubr.msk.f32.mxu0 %vm9700_vm0, %v9701_v1  ;;  %v8702_v46 = vpack.c.bf16 %v710_v43, %v709_v42  ;;  %v754_v42 = vld [vmem:[#allocation10 + $0x498] sm:$0xff]  ;;  %v761_v43 = vld [vmem:[#allocation10 + $0x4d0] sm:$0xff] }
 0x18e   : > { %7703 = vmatprep.mubr.msk.f32.mxu1 %vm9700_vm0, %v9701_v1 }
 0x18f   : > { %8649 = vmatpush3.bf16.msra.mxu0 %v8648_v48  ;;  %v719_v48 = vld [vmem:[#allocation10 + $0x380] sm:$0xff] }
 0x190   : > { %8661 = vmatpush3.bf16.msra.mxu1 %v8660_v49  ;;  %8650 = vmatprep.subr.bf16.mxu0 %v9699_v0  ;;  %v720_v49 = vld [vmem:[#allocation10 + $0x388] sm:$0xff] }
 0x191   : > { %8662 = vmatprep.subr.bf16.mxu1 %v9699_v0  ;;  %v8717_v53 = vpack.c.bf16 %v720_v49, %v719_v48  ;;  %v756_v48 = vld [vmem:[#allocation10 + $0x4a8] sm:$0xff]  ;;  %v763_v49 = vld [vmem:[#allocation10 + $0x4e0] sm:$0xff] }
 0x193   : > { %8652 = vmatpush3.bf16.msra.mxu0 %v8651_v54  ;;  %v8729_v54 = vpack.c.bf16 %v728_v51, %v727_v50  ;;  %v764_v50 = vld [vmem:[#allocation10 + $0x4e8] sm:$0xff] }
 0x194   : > { %8664 = vmatpush3.bf16.msra.mxu1 %v8663_v55  ;;  %8653 = vmatprep.subr.bf16.mxu0 %v9699_v0  ;;  %v721_v55 = vld [vmem:[#allocation10 + $0x390] sm:$0xff] }
 0x195   : > { %8665 = vmatprep.subr.bf16.mxu1 %v9699_v0  ;;  %v8720_v59 = vpack.c.bf16 %v722_v56, %v721_v55  ;;  %v758_v55 = vld [vmem:[#allocation10 + $0x4b8] sm:$0xff]  ;;  %v765_v56 = vld [vmem:[#allocation10 + $0x4f0] sm:$0xff] }
 0x197   : > { %8655 = vmatpush3.bf16.msra.mxu0 %v8654_v60  ;;  %v8732_v60 = vpack.c.bf16 %v730_v58, %v729_v57  ;;  %v766_v57 = vld [vmem:[#allocation10 + $0x4f8] sm:$0xff] }
 0x198   : > { %8667 = vmatpush3.bf16.msra.mxu1 %v8666_v61  ;;  %8668 = vmatprep.subr.bf16.mxu0 %v9699_v0  ;;  %v723_v61 = vld [vmem:[#allocation10 + $0x3a0] sm:$0xff] }
 0x199   : > { %8680 = vmatprep.subr.bf16.mxu1 %v9699_v0  ;;  %v8723_v3 = vpack.c.bf16 %v724_v62, %v723_v61  ;;  %v768_v61 = vld [vmem:[#allocation10 + $0x508] sm:$0xff]  ;;  %v775_v62 = vld [vmem:[#allocation10 + $0x540] sm:$0xff] }
 0x19a   : > { %7685 = vmatmul.mubr.msk.f32.vlgmr.msra.gmra.mrb[8].mxu0 %vm1147_vm1, %v10171_v30 }
 0x19b   : > { %7704 = vmatmul.mubr.msk.f32.vlgmr.msra.gmra.mrb[8].mxu1 %vm1147_vm1, %v10171_v30  ;;  %8670 = vmatpush3.bf16.msra.mxu0 %v8669_v4  ;;  %v8735_v4 = vpack.c.bf16 %v732_v2, %v731_v63  ;;  %v776_v63 = vld [vmem:[#allocation10 + $0x548] sm:$0xff] }
 0x19c   : > { %8682 = vmatpush3.bf16.msra.mxu1 %v8681_v5  ;;  %8671 = vmatprep.subr.bf16.mxu0 %v9699_v0  ;;  %v725_v5 = vld [vmem:[#allocation10 + $0x3b0] sm:$0xff] }
 0x19d   : > { %8683 = vmatprep.subr.bf16.mxu1 %v9699_v0  ;;  %7722 = vmatprep.mubr.msk.f32.mxu0 %vm9700_vm0, %v9701_v1  ;;  %v8726_v9 = vpack.c.bf16 %v726_v6, %v725_v5  ;;  %v770_v5 = vld [vmem:[#allocation10 + $0x518] sm:$0xff]  ;;  %v777_v6 = vld [vmem:[#allocation10 + $0x550] sm:$0xff] }
 0x19e   : > { %7741 = vmatprep.mubr.msk.f32.mxu1 %vm9700_vm0, %v9701_v1 }
 0x19f   : > { %8673 = vmatpush3.bf16.msra.mxu0 %v8672_v10  ;;  %v8738_v10 = vpack.c.bf16 %v734_v8, %v733_v7  ;;  %v778_v7 = vld [vmem:[#allocation10 + $0x558] sm:$0xff] }
 0x1a0   : > { %8685 = vmatpush3.bf16.msra.mxu1 %v8684_v11  ;;  %8674 = vmatprep.subr.bf16.mxu0 %v9699_v0  ;;  %v735_v11 = vld [vmem:[#allocation10 + $0x400] sm:$0xff] }
 0x1a1   : > { %8686 = vmatprep.subr.bf16.mxu1 %v9699_v0  ;;  %v8741_v15 = vpack.c.bf16 %v736_v12, %v735_v11  ;;  %v772_v11 = vld [vmem:[#allocation10 + $0x528] sm:$0xff]  ;;  %v779_v12 = vld [vmem:[#allocation10 + $0x560] sm:$0xff] }
 0x1a3   : > { %8676 = vmatpush3.bf16.msra.mxu0 %v8675_v16  ;;  %v8753_v16 = vpack.c.bf16 %v744_v14, %v743_v13  ;;  %v780_v13 = vld [vmem:[#allocation10 + $0x568] sm:$0xff] }
 0x1a4   : > { %8688 = vmatpush3.bf16.msra.mxu1 %v8687_v17  ;;  %8677 = vmatprep.subr.bf16.mxu0 %v9699_v0  ;;  %v737_v17 = vld [vmem:[#allocation10 + $0x410] sm:$0xff] }
 0x1a5   : > { %8689 = vmatprep.subr.bf16.mxu1 %v9699_v0  ;;  %v8744_v21 = vpack.c.bf16 %v738_v18, %v737_v17  ;;  %v774_v17 = vld [vmem:[#allocation10 + $0x538] sm:$0xff]  ;;  %v781_v18 = vld [vmem:[#allocation10 + $0x570] sm:$0xff] }
 0x1a7   : > { %8679 = vmatpush3.bf16.msra.mxu0 %v8678_v22  ;;  %v8756_v22 = vpack.c.bf16 %v746_v20, %v745_v19  ;;  %v782_v19 = vld [vmem:[#allocation10 + $0x578] sm:$0xff] }
 0x1a8   : > { %8691 = vmatpush3.bf16.msra.mxu1 %v8690_v23  ;;  %8692 = vmatprep.subr.bf16.mxu0 %v9699_v0  ;;  %v739_v23 = vld [vmem:[#allocation10 + $0x420] sm:$0xff] }
 0x1a9   : > { %8704 = vmatprep.subr.bf16.mxu1 %v9699_v0  ;;  %v8747_v27 = vpack.c.bf16 %v740_v24, %v739_v23  ;;  %v784_v23 = vld [vmem:[#allocation10 + $0x588] sm:$0xff]  ;;  %v791_v24 = vld [vmem:[#allocation10 + $0x5c0] sm:$0xff] }
 0x1aa   : > { %7723 = vmatmul.mubr.msk.f32.vlgmr.msra.gmra.mrb[10].mxu0 %vm1147_vm1, %v10171_v30 }
 0x1ab   : > { %7742 = vmatmul.mubr.msk.f32.vlgmr.msra.gmra.mrb[10].mxu1 %vm1147_vm1, %v10171_v30  ;;  %8694 = vmatpush3.bf16.msra.mxu0 %v8693_v28  ;;  %v8699_v30 = vpack.c.bf16 %v708_v38, %v707_v37  ;;  %v8759_v28 = vpack.c.bf16 %v748_v26, %v747_v25  ;;  %v752_v37 = vld [vmem:[#allocation10 + $0x488] sm:$0xff]  ;;  %v759_v38 = vld [vmem:[#allocation10 + $0x4c0] sm:$0xff] }
 0x1ac   : > { %8706 = vmatpush3.bf16.msra.mxu1 %v8705_v29  ;;  %8695 = vmatprep.subr.bf16.mxu0 %v9699_v0  ;;  %v741_v29 = vld [vmem:[#allocation10 + $0x430] sm:$0xff]  ;;  %v792_v25 = vld [vmem:[#allocation10 + $0x5c8] sm:$0xff] }
 0x1ad   : > { %8707 = vmatprep.subr.bf16.mxu1 %v9699_v0  ;;  %7760 = vmatprep.mubr.msk.f32.mxu0 %vm9700_vm0, %v9701_v1  ;;  %v8750_v34 = vpack.c.bf16 %v742_v31, %v741_v29  ;;  %v786_v29 = vld [vmem:[#allocation10 + $0x598] sm:$0xff]  ;;  %v793_v31 = vld [vmem:[#allocation10 + $0x5d0] sm:$0xff] }
 0x1ae   : > { %7779 = vmatprep.mubr.msk.f32.mxu1 %vm9700_vm0, %v9701_v1 }
 0x1af   : > { %8697 = vmatpush3.bf16.msra.mxu0 %v8696_v35  ;;  %v8762_v35 = vpack.c.bf16 %v750_v33, %v749_v32  ;;  %v794_v32 = vld [vmem:[#allocation10 + $0x5d8] sm:$0xff] }
 0x1b0   : > { %8709 = vmatpush3.bf16.msra.mxu1 %v8708_v36  ;;  %8698 = vmatprep.subr.bf16.mxu0 %v9699_v0  ;;  %v751_v36 = vld [vmem:[#allocation10 + $0x480] sm:$0xff] }
 0x1b1   : > { %8710 = vmatprep.subr.bf16.mxu1 %v9699_v0  ;;  %v8765_v40 = vpack.c.bf16 %v752_v37, %v751_v36  ;;  %v788_v36 = vld [vmem:[#allocation10 + $0x5a8] sm:$0xff]  ;;  %v795_v37 = vld [vmem:[#allocation10 + $0x5e0] sm:$0xff] }
 0x1b3   : > { %8700 = vmatpush3.bf16.msra.mxu0 %v8699_v30  ;;  %v8777_v30 = vpack.c.bf16 %v760_v39, %v759_v38  ;;  %v796_v38 = vld [vmem:[#allocation10 + $0x5e8] sm:$0xff] }
 0x1b4   : > { %8712 = vmatpush3.bf16.msra.mxu1 %v8711_v41  ;;  %8701 = vmatprep.subr.bf16.mxu0 %v9699_v0  ;;  %v753_v41 = vld [vmem:[#allocation10 + $0x490] sm:$0xff] }
 0x1b5   : > { %8713 = vmatprep.subr.bf16.mxu1 %v9699_v0  ;;  %v8768_v45 = vpack.c.bf16 %v754_v42, %v753_v41  ;;  %v790_v41 = vld [vmem:[#allocation10 + $0x5b8] sm:$0xff]  ;;  %v797_v42 = vld [vmem:[#allocation10 + $0x5f0] sm:$0xff] }
 0x1b7   : > { %8703 = vmatpush3.bf16.msra.mxu0 %v8702_v46  ;;  %v8780_v46 = vpack.c.bf16 %v762_v44, %v761_v43  ;;  %v798_v43 = vld [vmem:[#allocation10 + $0x5f8] sm:$0xff] }
 0x1b8   : > { %8715 = vmatpush3.bf16.msra.mxu1 %v8714_v47  ;;  %8716 = vmatprep.subr.bf16.mxu0 %v9699_v0  ;;  %v755_v47 = vld [vmem:[#allocation10 + $0x4a0] sm:$0xff] }
 0x1b9   : > { %8728 = vmatprep.subr.bf16.mxu1 %v9699_v0  ;;  %v8771_v51 = vpack.c.bf16 %v756_v48, %v755_v47  ;;  %v800_v47 = vld [vmem:[#allocation10 + $0x608] sm:$0xff]  ;;  %v807_v48 = vld [vmem:[#allocation10 + $0x640] sm:$0xff] }
 0x1ba   : > { %7761 = vmatmul.mubr.msk.f32.vlgmr.msra.gmra.mrb[12].mxu0 %vm1147_vm1, %v10271_v52 }
 0x1bb   : > { %7780 = vmatmul.mubr.msk.f32.vlgmr.msra.gmra.mrb[12].mxu1 %vm1147_vm1, %v10271_v52  ;;  %8718 = vmatpush3.bf16.msra.mxu0 %v8717_v53  ;;  %v8783_v53 = vpack.c.bf16 %v764_v50, %v763_v49  ;;  %v808_v49 = vld [vmem:[#allocation10 + $0x648] sm:$0xff] }
 0x1bc   : > { %8730 = vmatpush3.bf16.msra.mxu1 %v8729_v54  ;;  %8719 = vmatprep.subr.bf16.mxu0 %v9699_v0  ;;  %v757_v54 = vld [vmem:[#allocation10 + $0x4b0] sm:$0xff] }
 0x1bd   : > { %8731 = vmatprep.subr.bf16.mxu1 %v9699_v0  ;;  %7798 = vmatprep.mubr.msk.f32.mxu0 %vm9700_vm0, %v9701_v1  ;;  %v8774_v58 = vpack.c.bf16 %v758_v55, %v757_v54  ;;  %v802_v54 = vld [vmem:[#allocation10 + $0x618] sm:$0xff]  ;;  %v809_v55 = vld [vmem:[#allocation10 + $0x650] sm:$0xff] }
 0x1be   : > { %7817 = vmatprep.mubr.msk.f32.mxu1 %vm9700_vm0, %v9701_v1 }
 0x1bf   : > { %8721 = vmatpush3.bf16.msra.mxu0 %v8720_v59  ;;  %v8786_v59 = vpack.c.bf16 %v766_v57, %v765_v56  ;;  %v810_v56 = vld [vmem:[#allocation10 + $0x658] sm:$0xff] }
 0x1c0   : > { %8733 = vmatpush3.bf16.msra.mxu1 %v8732_v60  ;;  %8722 = vmatprep.subr.bf16.mxu0 %v9699_v0  ;;  %v767_v60 = vld [vmem:[#allocation10 + $0x500] sm:$0xff] }
 0x1c1   : > { %8734 = vmatprep.subr.bf16.mxu1 %v9699_v0  ;;  %v8789_v2 = vpack.c.bf16 %v768_v61, %v767_v60  ;;  %v804_v60 = vld [vmem:[#allocation10 + $0x628] sm:$0xff]  ;;  %v811_v61 = vld [vmem:[#allocation10 + $0x660] sm:$0xff] }
 0x1c3   : > { %8724 = vmatpush3.bf16.msra.mxu0 %v8723_v3  ;;  %v8801_v3 = vpack.c.bf16 %v776_v63, %v775_v62  ;;  %v812_v62 = vld [vmem:[#allocation10 + $0x668] sm:$0xff] }
 0x1c4   : > { %8736 = vmatpush3.bf16.msra.mxu1 %v8735_v4  ;;  %8725 = vmatprep.subr.bf16.mxu0 %v9699_v0  ;;  %v769_v4 = vld [vmem:[#allocation10 + $0x510] sm:$0xff]  ;;  %v8855_v63 = vpack.c.bf16 %v812_v62, %v811_v61  ;;  %v847_v62 = vld [vmem:[#allocation10 + $0x780] sm:$0xff] }
 0x1c5   : > { %8737 = vmatprep.subr.bf16.mxu1 %v9699_v0  ;;  %v8792_v8 = vpack.c.bf16 %v770_v5, %v769_v4  ;;  %v813_v4 = vld [vmem:[#allocation10 + $0x670] sm:$0xff]  ;;  %v814_v5 = vld [vmem:[#allocation10 + $0x678] sm:$0xff] }
 0x1c7   : > { %8727 = vmatpush3.bf16.msra.mxu0 %v8726_v9  ;;  %v8804_v9 = vpack.c.bf16 %v778_v7, %v777_v6  ;;  %v8858_v7 = vpack.c.bf16 %v814_v5, %v813_v4  ;;  %v849_v5 = vld [vmem:[#allocation10 + $0x790] sm:$0xff] }
 0x1c8   : > { %8739 = vmatpush3.bf16.msra.mxu1 %v8738_v10  ;;  %8740 = vmatprep.subr.bf16.mxu0 %v9699_v0  ;;  %v771_v10 = vld [vmem:[#allocation10 + $0x520] sm:$0xff] }
 0x1c9   : > { %8752 = vmatprep.subr.bf16.mxu1 %v9699_v0  ;;  %v8795_v14 = vpack.c.bf16 %v772_v11, %v771_v10  ;;  %v823_v10 = vld [vmem:[#allocation10 + $0x6c0] sm:$0xff]  ;;  %v824_v11 = vld [vmem:[#allocation10 + $0x6c8] sm:$0xff] }
 0x1ca   : > { %7799 = vmatmul.mubr.msk.f32.vlgmr.msra.gmra.mrb[14].mxu0 %vm1147_vm1, %v10271_v52 }
 0x1cb   : > { %7818 = vmatmul.mubr.msk.f32.vlgmr.msra.gmra.mrb[14].mxu1 %vm1147_vm1, %v10271_v52  ;;  %8742 = vmatpush3.bf16.msra.mxu0 %v8741_v15  ;;  %v8807_v15 = vpack.c.bf16 %v780_v13, %v779_v12  ;;  %v10371_v12 = vld [vmem:[%s507_s5] sm:$0xff]  ;;  %s9599_s5 = scalar_lea.vmem %s9598_s13, 256 }
 0x1cc   : > { %8754 = vmatpush3.bf16.msra.mxu1 %v8753_v16  ;;  %8743 = vmatprep.subr.bf16.mxu0 %v9699_v0  ;;  %v773_v16 = vld [vmem:[#allocation10 + $0x530] sm:$0xff]  ;;  %p9601_p4 = scmp.lt.s32.totalorder %s9599_s5, %s9593_s25 }
 0x1cd   : > { %8755 = vmatprep.subr.bf16.mxu1 %v9699_v0  ;;  %7836 = vmatprep.mubr.msk.f32.mxu0 %vm9700_vm0, %v9701_v1  ;;  %v8798_v20 = vpack.c.bf16 %v774_v17, %v773_v16  ;;  %v818_v16 = vld [vmem:[#allocation10 + $0x698] sm:$0xff]  ;;  %v825_v17 = vld [vmem:[#allocation10 + $0x6d0] sm:$0xff] }
 0x1ce   : > { %7855 = vmatprep.mubr.msk.f32.mxu1 %vm9700_vm0, %v9701_v1  ;;  %p9602_p5 = por %p9601_p4, %p9600_p8 }
 0x1cf   : > { %8745 = vmatpush3.bf16.msra.mxu0 %v8744_v21  ;;  %v8810_v21 = vpack.c.bf16 %v782_v19, %v781_v18  ;;  %v826_v18 = vld [vmem:[#allocation10 + $0x6d8] sm:$0xff] }
 0x1d0   : > { %8757 = vmatpush3.bf16.msra.mxu1 %v8756_v22  ;;  %8746 = vmatprep.subr.bf16.mxu0 %v9699_v0  ;;  %v783_v22 = vld [vmem:[#allocation10 + $0x580] sm:$0xff]  ;;  %p9603_p11 = pnand %p9602_p5, %p9596_p12 }
 0x1d1   : > { %8758 = vmatprep.subr.bf16.mxu1 %v9699_v0  ;;  %v8813_v26 = vpack.c.bf16 %v784_v23, %v783_v22  ;;  %v820_v22 = vld [vmem:[#allocation10 + $0x6a8] sm:$0xff]  ;;  %v827_v23 = vld [vmem:[#allocation10 + $0x6e0] sm:$0xff] }
 0x1d3   : > { %8748 = vmatpush3.bf16.msra.mxu0 %v8747_v27  ;;  %v8825_v27 = vpack.c.bf16 %v792_v25, %v791_v24  ;;  %v828_v24 = vld [vmem:[#allocation10 + $0x6e8] sm:$0xff] }
 0x1d4   : > { %8760 = vmatpush3.bf16.msra.mxu1 %v8759_v28  ;;  %8749 = vmatprep.subr.bf16.mxu0 %v9699_v0  ;;  %v785_v28 = vld [vmem:[#allocation10 + $0x590] sm:$0xff] }
 0x1d5   : > { %8761 = vmatprep.subr.bf16.mxu1 %v9699_v0  ;;  %v8816_v33 = vpack.c.bf16 %v786_v29, %v785_v28  ;;  %v822_v28 = vld [vmem:[#allocation10 + $0x6b8] sm:$0xff]  ;;  %v829_v29 = vld [vmem:[#allocation10 + $0x6f0] sm:$0xff] }
 0x1d7   : > { %8751 = vmatpush3.bf16.msra.mxu0 %v8750_v34  ;;  %v8828_v34 = vpack.c.bf16 %v794_v32, %v793_v31  ;;  %v830_v31 = vld [vmem:[#allocation10 + $0x6f8] sm:$0xff] }
 0x1d8   : > { %8763 = vmatpush3.bf16.msra.mxu1 %v8762_v35  ;;  %8764 = vmatprep.subr.bf16.mxu0 %v9699_v0  ;;  %v787_v35 = vld [vmem:[#allocation10 + $0x5a0] sm:$0xff] }
 0x1d9   : > { %8776 = vmatprep.subr.bf16.mxu1 %v9699_v0  ;;  %v8819_v39 = vpack.c.bf16 %v788_v36, %v787_v35  ;;  %v832_v35 = vld [vmem:[#allocation10 + $0x708] sm:$0xff]  ;;  %v839_v36 = vld [vmem:[#allocation10 + $0x740] sm:$0xff] }
 0x1da   : > { %7837 = vmatmul.mubr.msk.f32.vlgmr.msra.gmra.mrb[16].mxu0 %vm1147_vm1, %v10271_v52 }
 0x1db   : > { %7856 = vmatmul.mubr.msk.f32.vlgmr.msra.gmra.mrb[16].mxu1 %vm1147_vm1, %v10271_v52  ;;  %8766 = vmatpush3.bf16.msra.mxu0 %v8765_v40  ;;  %v8831_v40 = vpack.c.bf16 %v796_v38, %v795_v37  ;;  %v840_v37 = vld [vmem:[#allocation10 + $0x748] sm:$0xff] }
 0x1dc   : > { %8778 = vmatpush3.bf16.msra.mxu1 %v8777_v30  ;;  %8767 = vmatprep.subr.bf16.mxu0 %v9699_v0  ;;  %v789_v30 = vld [vmem:[#allocation10 + $0x5b0] sm:$0xff] }
 0x1dd   : > { %8779 = vmatprep.subr.bf16.mxu1 %v9699_v0  ;;  %7874 = vmatprep.mubr.msk.f32.mxu0 %vm9700_vm0, %v9701_v1  ;;  %v8822_v44 = vpack.c.bf16 %v790_v41, %v789_v30  ;;  %v834_v30 = vld [vmem:[#allocation10 + $0x718] sm:$0xff]  ;;  %v841_v41 = vld [vmem:[#allocation10 + $0x750] sm:$0xff] }
 0x1de   : > { %7893 = vmatprep.mubr.msk.f32.mxu1 %vm9700_vm0, %v9701_v1 }
 0x1df   : > { %8769 = vmatpush3.bf16.msra.mxu0 %v8768_v45  ;;  %v8834_v45 = vpack.c.bf16 %v798_v43, %v797_v42  ;;  %v842_v42 = vld [vmem:[#allocation10 + $0x758] sm:$0xff] }
 0x1e0   : > { %8781 = vmatpush3.bf16.msra.mxu1 %v8780_v46  ;;  %8770 = vmatprep.subr.bf16.mxu0 %v9699_v0  ;;  %v799_v46 = vld [vmem:[#allocation10 + $0x600] sm:$0xff] }
 0x1e1   : > { %8782 = vmatprep.subr.bf16.mxu1 %v9699_v0  ;;  %v8837_v50 = vpack.c.bf16 %v800_v47, %v799_v46  ;;  %v836_v46 = vld [vmem:[#allocation10 + $0x728] sm:$0xff] }
 0x1e3   : > { %8772 = vmatpush3.bf16.msra.mxu0 %v8771_v51  ;;  %v8849_v51 = vpack.c.bf16 %v808_v49, %v807_v48  ;;  %v843_v48 = vld [vmem:[#allocation10 + $0x760] sm:$0xff]  ;;  %v844_v49 = vld [vmem:[#allocation10 + $0x768] sm:$0xff] }
 0x1e4   : > { %8784 = vmatpush3.bf16.msra.mxu1 %v8783_v53  ;;  %8773 = vmatprep.subr.bf16.mxu0 %v9699_v0  ;;  %v801_v53 = vld [vmem:[#allocation10 + $0x610] sm:$0xff] }
 0x1e5   : > { %8785 = vmatprep.subr.bf16.mxu1 %v9699_v0  ;;  %v8840_v57 = vpack.c.bf16 %v802_v54, %v801_v53 }
 0x1e7   : > { %8775 = vmatpush3.bf16.msra.mxu0 %v8774_v58  ;;  %v8852_v58 = vpack.c.bf16 %v810_v56, %v809_v55  ;;  %v8903_v55 = vpack.c.bf16 %v844_v49, %v843_v48  ;;  %v837_v56 = vld [vmem:[#allocation10 + $0x730] sm:$0xff] }
 0x1e8   : > { %8787 = vmatpush3.bf16.msra.mxu1 %v8786_v59  ;;  %8788 = vmatprep.subr.bf16.mxu0 %v9699_v0  ;;  %v803_v59 = vld [vmem:[#allocation10 + $0x620] sm:$0xff] }
 0x1e9   : > { %8800 = vmatprep.subr.bf16.mxu1 %v9699_v0 }
 0x1ea   : > { %7875 = vmatmul.mubr.msk.f32.vlgmr.msra.gmra.mrb[18].mxu0 %vm1147_vm1, %v10271_v52 }
 0x1eb   : > { %7894 = vmatmul.mubr.msk.f32.vlgmr.msra.gmra.mrb[18].mxu1 %vm1147_vm1, %v10271_v52  ;;  %8790 = vmatpush3.bf16.msra.mxu0 %v8789_v2  ;;  %v805_v2 = vld [vmem:[#allocation10 + $0x630] sm:$0xff] }
 0x1ec   : > { %8802 = vmatpush3.bf16.msra.mxu1 %v8801_v3  ;;  %8791 = vmatprep.subr.bf16.mxu0 %v9699_v0  ;;  %v806_v3 = vld [vmem:[#allocation10 + $0x638] sm:$0xff] }
 0x1ed   : > { %8803 = vmatprep.subr.bf16.mxu1 %v9699_v0  ;;  %7912 = vmatprep.mubr.msk.f32.mxu0 %vm9700_vm0, %v9701_v1  ;;  %v8846_v6 = vpack.c.bf16 %v806_v3, %v805_v2  ;;  %v856_v2 = vld [vmem:[#allocation10 + $0x7c8] sm:$0xff] }
 0x1ee   : > { %7931 = vmatprep.mubr.msk.f32.mxu1 %vm9700_vm0, %v9701_v1 }
 0x1ef   : > { %8793 = vmatpush3.bf16.msra.mxu0 %v8792_v8  ;;  %v815_v8 = vld [vmem:[#allocation10 + $0x680] sm:$0xff] }
 0x1f0   : > { %8805 = vmatpush3.bf16.msra.mxu1 %v8804_v9  ;;  %8794 = vmatprep.subr.bf16.mxu0 %v9699_v0  ;;  %v816_v9 = vld [vmem:[#allocation10 + $0x688] sm:$0xff] }
 0x1f1   : > { %8806 = vmatprep.subr.bf16.mxu1 %v9699_v0  ;;  %v8861_v13 = vpack.c.bf16 %v816_v9, %v815_v8  ;;  %v858_v8 = vld [vmem:[#allocation10 + $0x7d8] sm:$0xff] }
 0x1f3   : > { %8796 = vmatpush3.bf16.msra.mxu0 %v8795_v14  ;;  %v8873_v14 = vpack.c.bf16 %v824_v11, %v823_v10  ;;  %v851_v11 = vld [vmem:[#allocation10 + $0x7a0] sm:$0xff] }
 0x1f4   : > { %8808 = vmatpush3.bf16.msra.mxu1 %v8807_v15  ;;  %8797 = vmatprep.subr.bf16.mxu0 %v9699_v0  ;;  %v817_v15 = vld [vmem:[#allocation10 + $0x690] sm:$0xff] }
 0x1f5   : > { %8809 = vmatprep.subr.bf16.mxu1 %v9699_v0  ;;  %v8864_v19 = vpack.c.bf16 %v818_v16, %v817_v15  ;;  %v859_v15 = vld [vmem:[#allocation10 + $0x7e0] sm:$0xff]  ;;  %v860_v16 = vld [vmem:[#allocation10 + $0x7e8] sm:$0xff] }
 0x1f7   : > { %8799 = vmatpush3.bf16.msra.mxu0 %v8798_v20  ;;  %v8876_v20 = vpack.c.bf16 %v826_v18, %v825_v17 }
 0x1f8   : > { %8811 = vmatpush3.bf16.msra.mxu1 %v8810_v21  ;;  %8812 = vmatprep.subr.bf16.mxu0 %v9699_v0  ;;  %v819_v21 = vld [vmem:[#allocation10 + $0x6a0] sm:$0xff] }
 0x1f9   : > { %8824 = vmatprep.subr.bf16.mxu1 %v9699_v0  ;;  %v8867_v25 = vpack.c.bf16 %v820_v22, %v819_v21  ;;  %v8927_v21 = vpack.c.bf16 %v860_v16, %v859_v15  ;;  %v853_v22 = vld [vmem:[#allocation10 + $0x7b0] sm:$0xff] }
 0x1fa   : > { %7913 = vmatmul.mubr.msk.f32.vlgmr.msra.gmra.mrb[20].mxu0 %vm1147_vm1, %v10271_v52 }
 0x1fb   : > { %7932 = vmatmul.mubr.msk.f32.vlgmr.msra.gmra.mrb[20].mxu1 %vm1147_vm1, %v10271_v52  ;;  %8814 = vmatpush3.bf16.msra.mxu0 %v8813_v26  ;;  %v8879_v26 = vpack.c.bf16 %v828_v24, %v827_v23  ;;  %v854_v23 = vld [vmem:[#allocation10 + $0x7b8] sm:$0xff]  ;;  %v861_v24 = vld [vmem:[#allocation10 + $0x7f0] sm:$0xff] }
 0x1fc   : > { %8826 = vmatpush3.bf16.msra.mxu1 %v8825_v27  ;;  %8815 = vmatprep.subr.bf16.mxu0 %v9699_v0  ;;  %v821_v27 = vld [vmem:[#allocation10 + $0x6b0] sm:$0xff] }
 0x1fd   : > { %8827 = vmatprep.subr.bf16.mxu1 %v9699_v0  ;;  %7950 = vmatprep.mubr.msk.f32.mxu0 %vm9700_vm0, %v9701_v1  ;;  %v8870_v32 = vpack.c.bf16 %v822_v28, %v821_v27  ;;  %v863_v28 = vld [vmem:[#allocation10 + $0x800] sm:$0xff] }
 0x1fe   : > { %7969 = vmatprep.mubr.msk.f32.mxu1 %vm9700_vm0, %v9701_v1 }
 0x1ff   : > { %8817 = vmatpush3.bf16.msra.mxu0 %v8816_v33  ;;  %v8882_v33 = vpack.c.bf16 %v830_v31, %v829_v29  ;;  %v864_v29 = vld [vmem:[#allocation10 + $0x808] sm:$0xff]  ;;  %v871_v31 = vld [vmem:[#allocation10 + $0x840] sm:$0xff] }
 0x200   : > { %8829 = vmatpush3.bf16.msra.mxu1 %v8828_v34  ;;  %8818 = vmatprep.subr.bf16.mxu0 %v9699_v0  ;;  %v831_v34 = vld [vmem:[#allocation10 + $0x700] sm:$0xff] }
 0x201   : > { %8830 = vmatprep.subr.bf16.mxu1 %v9699_v0  ;;  %v8885_v38 = vpack.c.bf16 %v832_v35, %v831_v34  ;;  %v865_v35 = vld [vmem:[#allocation10 + $0x810] sm:$0xff] }
 0x203   : > { %8820 = vmatpush3.bf16.msra.mxu0 %v8819_v39  ;;  %v8897_v39 = vpack.c.bf16 %v840_v37, %v839_v36  ;;  %v866_v36 = vld [vmem:[#allocation10 + $0x818] sm:$0xff]  ;;  %v873_v37 = vld [vmem:[#allocation10 + $0x850] sm:$0xff] }
 0x204   : > { %8832 = vmatpush3.bf16.msra.mxu1 %v8831_v40  ;;  %8821 = vmatprep.subr.bf16.mxu0 %v9699_v0  ;;  %v833_v40 = vld [vmem:[#allocation10 + $0x710] sm:$0xff] }
 0x205   : > { %8833 = vmatprep.subr.bf16.mxu1 %v9699_v0  ;;  %v8888_v43 = vpack.c.bf16 %v834_v30, %v833_v40  ;;  %v867_v30 = vld [vmem:[#allocation10 + $0x820] sm:$0xff] }
 0x207   : > { %8823 = vmatpush3.bf16.msra.mxu0 %v8822_v44  ;;  %v8900_v44 = vpack.c.bf16 %v842_v42, %v841_v41  ;;  %v868_v41 = vld [vmem:[#allocation10 + $0x828] sm:$0xff] }
 0x208   : > { %8835 = vmatpush3.bf16.msra.mxu1 %v8834_v45  ;;  %8836 = vmatprep.subr.bf16.mxu0 %v9699_v0  ;;  %v835_v45 = vld [vmem:[#allocation10 + $0x720] sm:$0xff]  ;;  %v8939_v49 = vpack.c.bf16 %v868_v41, %v867_v30 }
 0x209   : > { %8848 = vmatprep.subr.bf16.mxu1 %v9699_v0  ;;  %v8891_v54 = vpack.c.bf16 %v836_v46, %v835_v45  ;;  %v6909_v41 = vld [vmem:[#allocation11 + $0x1] ss:$0 sm:$0xff] }
 0x20a   : > { %7951 = vmatmul.mubr.msk.f32.vlgmr.msra.gmra.mrb[22].mxu0 %vm1147_vm1, %v10271_v52 }
 0x20b   : > { %7970 = vmatmul.mubr.msk.f32.vlgmr.msra.gmra.mrb[22].mxu1 %vm1147_vm1, %v10271_v52  ;;  %8838 = vmatpush3.bf16.msra.mxu0 %v8837_v50  ;;  %v8843_v52 = vpack.c.bf16 %v804_v60, %v803_v59  ;;  %v846_v59 = vld [vmem:[#allocation10 + $0x778] sm:$0xff] }
 0x20c   : > { %8850 = vmatpush3.bf16.msra.mxu1 %v8849_v51  ;;  %8839 = vmatprep.subr.bf16.mxu0 %v9699_v0 }
 0x20d   : > { %8851 = vmatprep.subr.bf16.mxu1 %v9699_v0  ;;  %7988 = vmatprep.mubr.msk.f32.mxu0 %vm9700_vm0, %v9701_v1 }
 0x20e   : > { %8007 = vmatprep.mubr.msk.f32.mxu1 %vm9700_vm0, %v9701_v1 }
 0x20f   : > { %8841 = vmatpush3.bf16.msra.mxu0 %v8840_v57  ;;  %v838_v57 = vld [vmem:[#allocation10 + $0x738] sm:$0xff] }
 0x210   : > { %8853 = vmatpush3.bf16.msra.mxu1 %v8852_v58  ;;  %8842 = vmatprep.subr.bf16.mxu0 %v9699_v0  ;;  %v845_v58 = vld [vmem:[#allocation10 + $0x770] sm:$0xff]  ;;  %v8894_v60 = vpack.c.bf16 %v838_v57, %v837_v56  ;;  %v878_v56 = vld [vmem:[#allocation10 + $0x878] sm:$0xff] }
 0x211   : > { %8854 = vmatprep.subr.bf16.mxu1 %v9699_v0  ;;  %v8906_v61 = vpack.c.bf16 %v846_v59, %v845_v58  ;;  %v879_v59 = vld [vmem:[#allocation10 + $0x880] sm:$0xff] }
 0x213   : > { %8844 = vmatpush3.bf16.msra.mxu0 %v8843_v52  ;;  %v848_v52 = vld [vmem:[#allocation10 + $0x788] sm:$0xff] }
 0x214   : > { %8856 = vmatpush3.bf16.msra.mxu1 %v8855_v63  ;;  %8845 = vmatprep.subr.bf16.mxu0 %v9699_v0  ;;  %v855_v63 = vld [vmem:[#allocation10 + $0x7c0] sm:$0xff]  ;;  %v8909_v3 = vpack.c.bf16 %v848_v52, %v847_v62  ;;  %v888_v62 = vld [vmem:[#allocation10 + $0x8c8] sm:$0xff] }
 0x215   : > { %8857 = vmatprep.subr.bf16.mxu1 %v9699_v0  ;;  %v8921_v4 = vpack.c.bf16 %v856_v2, %v855_v63  ;;  %v881_v2 = vld [vmem:[#allocation10 + $0x890] sm:$0xff] }
 0x217   : > { %8847 = vmatpush3.bf16.msra.mxu0 %v8846_v6  ;;  %v850_v6 = vld [vmem:[#allocation10 + $0x798] sm:$0xff] }
 0x218   : > { %8859 = vmatpush3.bf16.msra.mxu1 %v8858_v7  ;;  %8860 = vmatprep.subr.bf16.mxu0 %v9699_v0  ;;  %v857_v7 = vld [vmem:[#allocation10 + $0x7d0] sm:$0xff]  ;;  %v8912_v9 = vpack.c.bf16 %v850_v6, %v849_v5  ;;  %v890_v5 = vld [vmem:[#allocation10 + $0x8d8] sm:$0xff] }
 0x219   : > { %8872 = vmatprep.subr.bf16.mxu1 %v9699_v0  ;;  %v8924_v10 = vpack.c.bf16 %v858_v8, %v857_v7  ;;  %v883_v8 = vld [vmem:[#allocation10 + $0x8a0] sm:$0xff] }
 0x21a   : > { %7989 = vmatmul.mubr.msk.f32.vlgmr.msra.gmra.mrb[24].mxu0 %vm1147_vm1, %v10371_v12 }
 0x21b   : > { %8008 = vmatmul.mubr.msk.f32.vlgmr.msra.gmra.mrb[24].mxu1 %vm1147_vm1, %v10371_v12  ;;  %8862 = vmatpush3.bf16.msra.mxu0 %v8861_v13  ;;  %v852_v13 = vld [vmem:[#allocation10 + $0x7a8] sm:$0xff] }
 0x21c   : > { %8874 = vmatpush3.bf16.msra.mxu1 %v8873_v14  ;;  %8863 = vmatprep.subr.bf16.mxu0 %v9699_v0 }
 0x21d   : > { %8875 = vmatprep.subr.bf16.mxu1 %v9699_v0  ;;  %8026 = vmatprep.mubr.msk.f32.mxu0 %vm9700_vm0, %v9701_v1 }
 0x21e   : > { %8045 = vmatprep.mubr.msk.f32.mxu1 %vm9700_vm0, %v9701_v1 }
 0x21f   : > { %8865 = vmatpush3.bf16.msra.mxu0 %v8864_v19 }
 0x220   : > { %8877 = vmatpush3.bf16.msra.mxu1 %v8876_v20  ;;  %8866 = vmatprep.subr.bf16.mxu0 %v9699_v0  ;;  %v8915_v20 = vpack.c.bf16 %v852_v13, %v851_v11  ;;  %v891_v11 = vld [vmem:[#allocation10 + $0x8e0] sm:$0xff]  ;;  %v892_v13 = vld [vmem:[#allocation10 + $0x8e8] sm:$0xff] }
 0x221   : > { %8878 = vmatprep.subr.bf16.mxu1 %v9699_v0 }
 0x223   : > { %8868 = vmatpush3.bf16.msra.mxu0 %v8867_v25  ;;  %v862_v25 = vld [vmem:[#allocation10 + $0x7f8] sm:$0xff] }
 0x224   : > { %8880 = vmatpush3.bf16.msra.mxu1 %v8879_v26  ;;  %8869 = vmatprep.subr.bf16.mxu0 %v9699_v0  ;;  %v8918_v26 = vpack.c.bf16 %v854_v23, %v853_v22  ;;  %v8930_v27 = vpack.c.bf16 %v862_v25, %v861_v24  ;;  %v886_v22 = vld [vmem:[#allocation10 + $0x8b8] sm:$0xff]  ;;  %v893_v23 = vld [vmem:[#allocation10 + $0x8f0] sm:$0xff] }
 0x225   : > { %8881 = vmatprep.subr.bf16.mxu1 %v9699_v0  ;;  %v894_v24 = vld [vmem:[#allocation10 + $0x8f8] sm:$0xff] }
 0x227   : > { %8871 = vmatpush3.bf16.msra.mxu0 %v8870_v32  ;;  %v872_v32 = vld [vmem:[#allocation10 + $0x848] sm:$0xff] }
 0x228   : > { %8883 = vmatpush3.bf16.msra.mxu1 %v8882_v33  ;;  %8884 = vmatprep.subr.bf16.mxu0 %v9699_v0  ;;  %v8933_v33 = vpack.c.bf16 %v864_v29, %v863_v28  ;;  %v8945_v34 = vpack.c.bf16 %v872_v32, %v871_v31 }
 0x229   : > { %8896 = vmatprep.subr.bf16.mxu1 %v9699_v0 }
 0x22a   : > { %8027 = vmatmul.mubr.msk.f32.vlgmr.msra.gmra.mrb[26].mxu0 %vm1147_vm1, %v10371_v12 }
 0x22b   : > { %8046 = vmatmul.mubr.msk.f32.vlgmr.msra.gmra.mrb[26].mxu1 %vm1147_vm1, %v10371_v12  ;;  %8886 = vmatpush3.bf16.msra.mxu0 %v8885_v38  ;;  %v874_v38 = vld [vmem:[#allocation10 + $0x858] sm:$0xff] }
 0x22c   : > { %8898 = vmatpush3.bf16.msra.mxu1 %v8897_v39  ;;  %8887 = vmatprep.subr.bf16.mxu0 %v9699_v0  ;;  %v8936_v39 = vpack.c.bf16 %v866_v36, %v865_v35  ;;  %v8948_v40 = vpack.c.bf16 %v874_v38, %v873_v37  ;;  %v6920_v36 = vld [vmem:[#allocation11 + $0xc] ss:$0 sm:$0xff]  ;;  %v6908_v38 = vld [vmem:[#allocation11] ss:$0 sm:$0xff] }
 0x22d   : > { %v10396_v47 = vpop.f32.mrb[0].mxu0  ;;  %8899 = vmatprep.subr.bf16.mxu1 %v9699_v0  ;;  %8064 = vmatprep.mubr.msk.f32.mxu0 %vm9700_vm0, %v9701_v1 }
 0x22e   : > { %v7534_v50 = vpop.f32.mrb[1].mxu0  ;;  %v10401_v51 = vpop.f32.mrb[0].mxu1  ;;  %8083 = vmatprep.mubr.msk.f32.mxu1 %vm9700_vm0, %v9701_v1 }
 0x22f   : > { %v7553_v53 = vpop.f32.mrb[1].mxu1  ;;  %8889 = vmatpush3.bf16.msra.mxu0 %v8888_v43  ;;  %v875_v43 = vld [vmem:[#allocation10 + $0x860] sm:$0xff] }
 0x230   : > { %8901 = vmatpush3.bf16.msra.mxu1 %v8900_v44  ;;  %8890 = vmatprep.subr.bf16.mxu0 %v9699_v0  ;;  %v876_v44 = vld [vmem:[#allocation10 + $0x868] sm:$0xff]  ;;  %v869_v53 = vld [vmem:[#allocation10 + $0x830] sm:$0xff] }
 0x231   : > { %8902 = vmatprep.subr.bf16.mxu1 %v9699_v0  ;;  %v8951_v50 = vpack.c.bf16 %v876_v44, %v875_v43 }
 0x233   : > { %8892 = vmatpush3.bf16.msra.mxu0 %v8891_v54  ;;  %v870_v54 = vld [vmem:[#allocation10 + $0x838] sm:$0xff] }
 0x234   : > { %8904 = vmatpush3.bf16.msra.mxu1 %v8903_v55  ;;  %8893 = vmatprep.subr.bf16.mxu0 %v9699_v0  ;;  %v877_v55 = vld [vmem:[#allocation10 + $0x870] sm:$0xff]  ;;  %v8942_v57 = vpack.c.bf16 %v870_v54, %v869_v53  ;;  %v6910_v53 = vld [vmem:[#allocation11 + $0x2] ss:$0 sm:$0xff] }
 0x235   : > { %8905 = vmatprep.subr.bf16.mxu1 %v9699_v0  ;;  %v8954_v58 = vpack.c.bf16 %v878_v56, %v877_v55 }
 0x237   : > { %8895 = vmatpush3.bf16.msra.mxu0 %v8894_v60  ;;  %v880_v60 = vld [vmem:[#allocation10 + $0x888] sm:$0xff] }
 0x238   : > { %8907 = vmatpush3.bf16.msra.mxu1 %v8906_v61  ;;  %8908 = vmatprep.subr.bf16.mxu0 %v9699_v0  ;;  %v887_v61 = vld [vmem:[#allocation10 + $0x8c0] sm:$0xff]  ;;  %v8957_v52 = vpack.c.bf16 %v880_v60, %v879_v59 }
 0x239   : > { %8920 = vmatprep.subr.bf16.mxu1 %v9699_v0  ;;  %v8969_v63 = vpack.c.bf16 %v888_v62, %v887_v61  ;;  %v6924_v61 = vld [vmem:[#allocation11 + $0x10] ss:$0 sm:$0xff] }
 0x23a   : > { %8065 = vmatmul.mubr.msk.f32.vlgmr.msra.gmra.mrb[28].mxu0 %vm1147_vm1, %v10371_v12 }
 0x23b   : > { %8084 = vmatmul.mubr.msk.f32.vlgmr.msra.gmra.mrb[28].mxu1 %vm1147_vm1, %v10371_v12  ;;  %8910 = vmatpush3.bf16.msra.mxu0 %v8909_v3  ;;  %v882_v3 = vld [vmem:[#allocation10 + $0x898] sm:$0xff] }
 0x23c   : > { %8922 = vmatpush3.bf16.msra.mxu1 %v8921_v4  ;;  %8911 = vmatprep.subr.bf16.mxu0 %v9699_v0  ;;  %v889_v4 = vld [vmem:[#allocation10 + $0x8d0] sm:$0xff]  ;;  %v8960_v6 = vpack.c.bf16 %v882_v3, %v881_v2 }
 0x23d   : > { %v10416_v14 = vpop.f32.mrb[2].mxu0  ;;  %8923 = vmatprep.subr.bf16.mxu1 %v9699_v0  ;;  %8102 = vmatprep.mubr.msk.f32.mxu0 %vm9700_vm0, %v9701_v1  ;;  %v8972_v7 = vpack.c.bf16 %v890_v5, %v889_v4 }
 0x23e   : > { %v7572_v17 = vpop.f32.mrb[3].mxu0  ;;  %v10421_v18 = vpop.f32.mrb[2].mxu1  ;;  %8121 = vmatprep.mubr.msk.f32.mxu1 %vm9700_vm0, %v9701_v1  ;;  %v1358_v59 = vadd.f32 %v6910_v53, %v10416_v14  ;;  %v6925_v14 = vld [vmem:[#allocation11 + $0x11] ss:$0 sm:$0xff] }
 0x23f   : > { %v7591_v19 = vpop.f32.mrb[3].mxu1  ;;  %8913 = vmatpush3.bf16.msra.mxu0 %v8912_v9  ;;  %v884_v9 = vld [vmem:[#allocation10 + $0x8a8] sm:$0xff] }
 0x240   : > { %8925 = vmatpush3.bf16.msra.mxu1 %v8924_v10  ;;  %8914 = vmatprep.subr.bf16.mxu0 %v9699_v0  ;;  %v8963_v19 = vpack.c.bf16 %v884_v9, %v883_v8  ;;  %v6926_v8 = vld [vmem:[#allocation11 + $0x12] ss:$0 sm:$0xff] }
 0x241   : > { %8926 = vmatprep.subr.bf16.mxu1 %v9699_v0 }
 0x243   : > { %8916 = vmatpush3.bf16.msra.mxu0 %v8915_v20  ;;  %v8975_v20 = vpack.c.bf16 %v892_v13, %v891_v11  ;;  %v6914_v11 = vld [vmem:[#allocation11 + $0x6] ss:$0 sm:$0xff] }
 0x244   : > { %8928 = vmatpush3.bf16.msra.mxu1 %v8927_v21  ;;  %8917 = vmatprep.subr.bf16.mxu0 %v9699_v0  ;;  %v885_v21 = vld [vmem:[#allocation10 + $0x8b0] sm:$0xff] }
 0x245   : > { %8929 = vmatprep.subr.bf16.mxu1 %v9699_v0  ;;  %v8966_v25 = vpack.c.bf16 %v886_v22, %v885_v21 }
 0x247   : > { %8919 = vmatpush3.bf16.msra.mxu0 %v8918_v26  ;;  %v8978_v26 = vpack.c.bf16 %v894_v24, %v893_v23  ;;  %v6928_v23 = vld [vmem:[#allocation11 + $0x14] ss:$0 sm:$0xff] }
 0x248   : > { %8931 = vmatpush3.bf16.msra.mxu1 %v8930_v27  ;;  %8932 = vmatprep.subr.bf16.mxu0 %v9699_v0 }
 0x249   : > { %8944 = vmatprep.subr.bf16.mxu1 %v9699_v0 }
 0x24a   : > { %8103 = vmatmul.mubr.msk.f32.vlgmr.msra.gmra.mrb[30].mxu0 %vm1147_vm1, %v10371_v12 }
 0x24b   : > { %8122 = vmatmul.mubr.msk.f32.vlgmr.msra.gmra.mrb[30].mxu1 %vm1147_vm1, %v10371_v12  ;;  %8934 = vmatpush3.bf16.msra.mxu0 %v8933_v33 }
 0x24c   : > { %8946 = vmatpush3.bf16.msra.mxu1 %v8945_v34  ;;  %8935 = vmatprep.subr.bf16.mxu0 %v9699_v0 }
 0x24d   : > { %v10436_v42 = vpop.f32.mrb[4].mxu0  ;;  %8947 = vmatprep.subr.bf16.mxu1 %v9699_v0  ;;  %8140 = vmatprep.mubr.msk.f32.mxu0 %vm9700_vm0, %v9701_v1 }
 0x24e   : > { %v7610_v45 = vpop.f32.mrb[5].mxu0  ;;  %v10441_v46 = vpop.f32.mrb[4].mxu1  ;;  %8159 = vmatprep.mubr.msk.f32.mxu1 %vm9700_vm0, %v9701_v1 }
 0x24f   : > { %v7629_v48 = vpop.f32.mrb[5].mxu1  ;;  %8937 = vmatpush3.bf16.msra.mxu0 %v8936_v39  ;;  %v1218_v45 = vadd.f32 %v6908_v38, %v10396_v47  ;;  %v6923_v47 = vld [vmem:[#allocation11 + $0xf] ss:$0 sm:$0xff] }
 0x250   : > { %8949 = vmatpush3.bf16.msra.mxu1 %v8948_v40  ;;  %8938 = vmatprep.subr.bf16.mxu0 %v9699_v0  ;;  %v1288_v48 = vadd.f32 %v6909_v41, %v10401_v51  ;;  %v6911_v51 = vld [vmem:[#allocation11 + $0x3] ss:$0 sm:$0xff] }
 0x251   : > { %8950 = vmatprep.subr.bf16.mxu1 %v9699_v0  ;;  %v1428_v60 = vadd.f32 %v6911_v51, %v10421_v18  ;;  %v6913_v18 = vld [vmem:[#allocation11 + $0x5] ss:$0 sm:$0xff] }
 0x253   : > { %8940 = vmatpush3.bf16.msra.mxu0 %v8939_v49  ;;  %v6922_v49 = vld [vmem:[#allocation11 + $0xe] ss:$0 sm:$0xff] }
 0x254   : > { %8952 = vmatpush3.bf16.msra.mxu1 %v8951_v50  ;;  %8941 = vmatprep.subr.bf16.mxu0 %v9699_v0 }
 0x255   : > { %8953 = vmatprep.subr.bf16.mxu1 %v9699_v0 }
 0x257   : > { %8943 = vmatpush3.bf16.msra.mxu0 %v8942_v57 }
 0x258   : > { %8955 = vmatpush3.bf16.msra.mxu1 %v8954_v58  ;;  %8956 = vmatprep.subr.bf16.mxu0 %v9699_v0 }
 0x259   : > { %8968 = vmatprep.subr.bf16.mxu1 %v9699_v0 }
 0x25a   : > { %8141 = vmatmul.mubr.msk.f32.vlgmr.msra.gmra.mrb[32].mxu0 %vm1147_vm1, %v10371_v12 }
 0x25b   : > { %8160 = vmatmul.mubr.msk.f32.vlgmr.msra.gmra.mrb[32].mxu1 %vm1147_vm1, %v10371_v12  ;;  %8958 = vmatpush3.bf16.msra.mxu0 %v8957_v52  ;;  %v6912_v52 = vld [vmem:[#allocation11 + $0x4] ss:$0 sm:$0xff] }
 0x25c   : > { %8970 = vmatpush3.bf16.msra.mxu1 %v8969_v63  ;;  %8959 = vmatprep.subr.bf16.mxu0 %v9699_v0 }
 0x25d   : > { %v10456_v10 = vpop.f32.mrb[6].mxu0  ;;  %8971 = vmatprep.subr.bf16.mxu1 %v9699_v0  ;;  %8178 = vmatprep.mubr.msk.f32.mxu0 %vm9700_vm0, %v9701_v1 }
 0x25e   : > { %v7648_v15 = vpop.f32.mrb[7].mxu0  ;;  %v10461_v16 = vpop.f32.mrb[6].mxu1  ;;  %8197 = vmatprep.mubr.msk.f32.mxu1 %vm9700_vm0, %v9701_v1  ;;  %v1638_v21 = vadd.f32 %v6914_v11, %v10456_v10  ;;  %v6929_v10 = vld [vmem:[#allocation11 + $0x15] ss:$0 sm:$0xff] }
 0x25f   : > { %v7667_v17 = vpop.f32.mrb[7].mxu1  ;;  %8961 = vmatpush3.bf16.msra.mxu0 %v8960_v6  ;;  %v1498_v6 = vadd.f32 %v6912_v52, %v10436_v42  ;;  %v6927_v42 = vld [vmem:[#allocation11 + $0x13] ss:$0 sm:$0xff] }
 0x260   : > { %8973 = vmatpush3.bf16.msra.mxu1 %v8972_v7  ;;  %8962 = vmatprep.subr.bf16.mxu0 %v9699_v0  ;;  %v1568_v7 = vadd.f32 %v6913_v18, %v10441_v46  ;;  %v6915_v46 = vld [vmem:[#allocation11 + $0x7] ss:$0 sm:$0xff] }
 0x261   : > { %8974 = vmatprep.subr.bf16.mxu1 %v9699_v0  ;;  %v1708_v22 = vadd.f32 %v6915_v46, %v10461_v16  ;;  %v6917_v16 = vld [vmem:[#allocation11 + $0x9] ss:$0 sm:$0xff] }
 0x263   : > { %8964 = vmatpush3.bf16.msra.mxu0 %v8963_v19 }
 0x264   : > { %8976 = vmatpush3.bf16.msra.mxu1 %v8975_v20  ;;  %8965 = vmatprep.subr.bf16.mxu0 %v9699_v0 }
 0x265   : > { %8977 = vmatprep.subr.bf16.mxu1 %v9699_v0 }
 0x267   : > { %8967 = vmatpush3.bf16.msra.mxu0 %v8966_v25  ;;  %v6916_v25 = vld [vmem:[#allocation11 + $0x8] ss:$0 sm:$0xff] }
 0x268   : > { %8979 = vmatpush3.bf16.msra.mxu1 %v8978_v26  ;;  %8200 = vmatprep.subr.mxu0 %v9701_v1 }
 0x269   : > { %8205 = vmatprep.subr.mxu1 %v9701_v1 }
 0x26a   : > { %8179 = vmatmul.mubr.msk.f32.vlgmr.msra.gmra.mrb[34].mxu0 %vm1147_vm1, %v10371_v12 }
 0x26b   : > { %8198 = vmatmul.mubr.msk.f32.vlgmr.msra.gmra.mrb[34].mxu1 %vm1147_vm1, %v10371_v12  ;;  %8202 = vmatprep.mubr.msk.f32.mxu0 %vm9700_vm0, %v9701_v1  ;;  %v6921_v12 = vld [vmem:[#allocation11 + $0xd] ss:$0 sm:$0xff] }
 0x26c   : > { %8207 = vmatprep.mubr.msk.f32.mxu1 %vm9700_vm0, %v9701_v1 }
 0x26d   : > { %v10479_v27 = vpop.f32.mrb[8].mxu0 }
 0x26e   : > { %v7686_v28 = vpop.f32.mrb[9].mxu0  ;;  %v10481_v29 = vpop.f32.mrb[8].mxu1 }
 0x26f   : > { %v7705_v31 = vpop.f32.mrb[9].mxu1 }
 0x27d   : > { %v10483_v32 = vpop.f32.mrb[10].mxu0 }
 0x27e   : > { %v7724_v33 = vpop.f32.mrb[11].mxu0  ;;  %v10485_v34 = vpop.f32.mrb[10].mxu1 }
 0x27f   : > { %v7743_v35 = vpop.f32.mrb[11].mxu1 }
 0x28d   : > { %v2060_v37 = vpop.f32.mrb[12].mxu0 }
 0x28e   : > { %v2061_v39 = vadd.f32 %v6920_v36, %v2060_v37  ;;  %v2130_v40 = vpop.f32.mrb[12].mxu1  ;;  %v7762_v30 = vpop.f32.mrb[13].mxu0  ;;  %v1778_v36 = vadd.f32 %v6916_v25, %v10479_v27  ;;  %v6930_v37 = vld [vmem:[#allocation11 + $0x16] ss:$0 sm:$0xff]  ;;  %v6931_v27 = vld [vmem:[#allocation11 + $0x17] ss:$0 sm:$0xff] }
 0x28f   : > { %v2131_v43 = vadd.f32 %v6921_v12, %v2130_v40  ;;  %v7781_v44 = vpop.f32.mrb[13].mxu1  ;;  %v1848_v12 = vadd.f32 %v6917_v16, %v10481_v29  ;;  %v6919_v29 = vld [vmem:[#allocation11 + $0xb] ss:$0 sm:$0xff] }
 0x290   : > { %8201 = vmatpush3.xpose.msk.msra.mxu0 %vm1147_vm1, %v2061_v39  ;;  %v6918_v39 = vld [vmem:[#allocation11 + $0xa] ss:$0 sm:$0xff] }
 0x291   : > { %8206 = vmatpush3.xpose.msk.msra.mxu1 %vm1147_vm1, %v2131_v43  ;;  %8210 = vmatprep.subr.mxu0 %v9701_v1 }
 0x292   : > { %8215 = vmatprep.subr.mxu1 %v9701_v1 }
 0x293   : > { %8203 = vmatmul.mubr.msk.f32.vlgmr.msra.gmra.mrb[36].mxu0 %vm1147_vm1, %v1218_v45  ;;  %v1918_v45 = vadd.f32 %v6918_v39, %v10483_v32  ;;  %v6933_v32 = vld [vmem:[#allocation11 + $0x19] ss:$0 sm:$0xff] }
 0x294   : > { %8208 = vmatmul.mubr.msk.f32.vlgmr.msra.gmra.mrb[36].mxu1 %vm1147_vm1, %v1288_v48  ;;  %8212 = vmatprep.mubr.msk.f32.mxu0 %vm9700_vm0, %v9701_v1  ;;  %v1988_v48 = vadd.f32 %v6919_v29, %v10485_v34 }
 0x295   : > { %8217 = vmatprep.mubr.msk.f32.mxu1 %vm9700_vm0, %v9701_v1 }
 0x29d   : > { %v2200_v50 = vpop.f32.mrb[14].mxu0 }
 0x29e   : > { %v2201_v54 = vadd.f32 %v6922_v49, %v2200_v50  ;;  %v2270_v55 = vpop.f32.mrb[14].mxu1  ;;  %v7800_v56 = vpop.f32.mrb[15].mxu0  ;;  %v6932_v49 = vld [vmem:[#allocation11 + $0x18] ss:$0 sm:$0xff] }
 0x29f   : > { %v2271_v57 = vadd.f32 %v6923_v47, %v2270_v55  ;;  %v7819_v58 = vpop.f32.mrb[15].mxu1 }
 0x2a0   : > { %8211 = vmatpush3.xpose.msk.msra.mxu0 %vm1147_vm1, %v2201_v54 }
 0x2a1   : > { %8216 = vmatpush3.xpose.msk.msra.mxu1 %vm1147_vm1, %v2271_v57  ;;  %8220 = vmatprep.subr.mxu0 %v9701_v1 }
 0x2a2   : > { %8225 = vmatprep.subr.mxu1 %v9701_v1 }
 0x2a3   : > { %8213 = vmatmul.mubr.msk.f32.vlgmr.msra.gmra.mrb[38].mxu0 %vm1147_vm1, %v1358_v59 }
 0x2a4   : > { %8218 = vmatmul.mubr.msk.f32.vlgmr.msra.gmra.mrb[38].mxu1 %vm1147_vm1, %v1428_v60  ;;  %8222 = vmatprep.mubr.msk.f32.mxu0 %vm9700_vm0, %v9701_v1 }
 0x2a5   : > { %8227 = vmatprep.mubr.msk.f32.mxu1 %vm9700_vm0, %v9701_v1 }
 0x2ad   : > { %v2340_v62 = vpop.f32.mrb[16].mxu0 }
 0x2ae   : > { %v2341_v63 = vadd.f32 %v6924_v61, %v2340_v62  ;;  %v2410_v2 = vpop.f32.mrb[16].mxu1  ;;  %v7838_v3 = vpop.f32.mrb[17].mxu0 }
 0x2af   : > { %v2411_v4 = vadd.f32 %v6925_v14, %v2410_v2  ;;  %v7857_v5 = vpop.f32.mrb[17].mxu1 }
 0x2b0   : > { %8221 = vmatpush3.xpose.msk.msra.mxu0 %vm1147_vm1, %v2341_v63 }
 0x2b1   : > { %8226 = vmatpush3.xpose.msk.msra.mxu1 %vm1147_vm1, %v2411_v4  ;;  %8230 = vmatprep.subr.mxu0 %v9701_v1 }
 0x2b2   : > { %8235 = vmatprep.subr.mxu1 %v9701_v1 }
 0x2b3   : > { %8223 = vmatmul.mubr.msk.f32.vlgmr.msra.gmra.mrb[40].mxu0 %vm1147_vm1, %v1498_v6 }
 0x2b4   : > { %8228 = vmatmul.mubr.msk.f32.vlgmr.msra.gmra.mrb[40].mxu1 %vm1147_vm1, %v1568_v7  ;;  %8232 = vmatprep.mubr.msk.f32.mxu0 %vm9700_vm0, %v9701_v1 }
 0x2b5   : > { %8237 = vmatprep.mubr.msk.f32.mxu1 %vm9700_vm0, %v9701_v1 }
 0x2bd   : > { %v2480_v9 = vpop.f32.mrb[18].mxu0 }
 0x2be   : > { %v2481_v13 = vadd.f32 %v6926_v8, %v2480_v9  ;;  %v2550_v15 = vpop.f32.mrb[18].mxu1  ;;  %v7876_v17 = vpop.f32.mrb[19].mxu0  ;;  %v3677_v9 = vld [vmem:[%s516_s30] sm:$0xff] }
 0x2bf   : > { %v2551_v19 = vadd.f32 %v6927_v42, %v2550_v15  ;;  %v7895_v20 = vpop.f32.mrb[19].mxu1 }
 0x2c0   : > { %8231 = vmatpush3.xpose.msk.msra.mxu0 %vm1147_vm1, %v2481_v13 }
 0x2c1   : > { %8236 = vmatpush3.xpose.msk.msra.mxu1 %vm1147_vm1, %v2551_v19  ;;  %8240 = vmatprep.subr.mxu0 %v9701_v1 }
 0x2c2   : > { %8245 = vmatprep.subr.mxu1 %v9701_v1 }
 0x2c3   : > { %8233 = vmatmul.mubr.msk.f32.vlgmr.msra.gmra.mrb[42].mxu0 %vm1147_vm1, %v1638_v21 }
 0x2c4   : > { %8238 = vmatmul.mubr.msk.f32.vlgmr.msra.gmra.mrb[42].mxu1 %vm1147_vm1, %v1708_v22  ;;  %8242 = vmatprep.mubr.msk.f32.mxu0 %vm9700_vm0, %v9701_v1 }
 0x2c5   : > { %8247 = vmatprep.mubr.msk.f32.mxu1 %vm9700_vm0, %v9701_v1 }
 0x2cd   : > { %v2620_v24 = vpop.f32.mrb[20].mxu0 }
 0x2ce   : > { %v2621_v26 = vadd.f32 %v6928_v23, %v2620_v24  ;;  %v2690_v28 = vpop.f32.mrb[20].mxu1  ;;  %v7914_v31 = vpop.f32.mrb[21].mxu0 }
 0x2cf   : > { %v2691_v33 = vadd.f32 %v6929_v10, %v2690_v28  ;;  %v7933_v35 = vpop.f32.mrb[21].mxu1 }
 0x2d0   : > { %8241 = vmatpush3.xpose.msk.msra.mxu0 %vm1147_vm1, %v2621_v26 }
 0x2d1   : > { %8246 = vmatpush3.xpose.msk.msra.mxu1 %vm1147_vm1, %v2691_v33  ;;  %8250 = vmatprep.subr.mxu0 %v9701_v1 }
 0x2d2   : > { %8255 = vmatprep.subr.mxu1 %v9701_v1 }
 0x2d3   : > { %8243 = vmatmul.mubr.msk.f32.vlgmr.msra.gmra.mrb[44].mxu0 %vm1147_vm1, %v1778_v36 }
 0x2d4   : > { %8248 = vmatmul.mubr.msk.f32.vlgmr.msra.gmra.mrb[44].mxu1 %vm1147_vm1, %v1848_v12  ;;  %8252 = vmatprep.mubr.msk.f32.mxu0 %vm9700_vm0, %v9701_v1 }
 0x2d5   : > { %8257 = vmatprep.mubr.msk.f32.mxu1 %vm9700_vm0, %v9701_v1 }
 0x2dd   : > { %v2760_v38 = vpop.f32.mrb[22].mxu0 }
 0x2de   : > { %v2761_v40 = vadd.f32 %v6930_v37, %v2760_v38  ;;  %v2830_v30 = vpop.f32.mrb[22].mxu1  ;;  %v7952_v41 = vpop.f32.mrb[23].mxu0 }
 0x2df   : > { %v2831_v43 = vadd.f32 %v6931_v27, %v2830_v30  ;;  %v7971_v44 = vpop.f32.mrb[23].mxu1 }
 0x2e0   : > { %8251 = vmatpush3.xpose.msk.msra.mxu0 %vm1147_vm1, %v2761_v40 }
 0x2e1   : > { %8256 = vmatpush3.xpose.msk.msra.mxu1 %vm1147_vm1, %v2831_v43  ;;  %8260 = vmatprep.subr.mxu0 %v9701_v1 }
 0x2e2   : > { %8265 = vmatprep.subr.mxu1 %v9701_v1 }
 0x2e3   : > { %8253 = vmatmul.mubr.msk.f32.vlgmr.msra.gmra.mrb[46].mxu0 %vm1147_vm1, %v1918_v45 }
 0x2e4   : > { %8258 = vmatmul.mubr.msk.f32.vlgmr.msra.gmra.mrb[46].mxu1 %vm1147_vm1, %v1988_v48  ;;  %8262 = vmatprep.mubr.msk.f32.mxu0 %vm9700_vm0, %v9701_v1 }
 0x2e5   : > { %8267 = vmatprep.mubr.msk.f32.mxu1 %vm9700_vm0, %v9701_v1 }
 0x2ed   : > { %v2903_v47 = vpop.f32.mrb[24].mxu0 }
 0x2ee   : > { %v2904_v50 = vadd.f32 %v6932_v49, %v2903_v47  ;;  %v7990_v53 = vpop.f32.mrb[25].mxu0  ;;  %v2973_v54 = vpop.f32.mrb[24].mxu1 }
 0x2ef   : > { %v2974_v55 = vadd.f32 %v6933_v32, %v2973_v54  ;;  %v8009_v34 = vpop.f32.mrb[25].mxu1 }
 0x2f0   : > { %8261 = vmatpush3.msra.mxu0 %v2904_v50 }
 0x2f1   : > { %8266 = vmatpush3.msra.mxu1 %v2974_v55  ;;  %8270 = vmatprep.subr.mxu0 %v9701_v1 }
 0x2f2   : > { %8275 = vmatprep.subr.mxu1 %v9701_v1 }
 0x2fd   : > { %v10561_v56 = vpop.f32.mrb[26].mxu0 }
 0x2fe   : > { %v8028_v51 = vpop.f32.mrb[27].mxu0  ;;  %v10563_v57 = vpop.f32.mrb[26].mxu1 }
 0x2ff   : > { %v8047_v58 = vpop.f32.mrb[27].mxu1 }
 0x30d   : > { %v10565_v59 = vpop.f32.mrb[28].mxu0 }
 0x30e   : > { %v8066_v60 = vpop.f32.mrb[29].mxu0  ;;  %v10567_v61 = vpop.f32.mrb[28].mxu1 }
 0x30f   : > { %v8085_v14 = vpop.f32.mrb[29].mxu1 }
 0x31d   : > { %v10569_v62 = vpop.f32.mrb[30].mxu0 }
 0x31e   : > { %v8104_v52 = vpop.f32.mrb[31].mxu0  ;;  %v10571_v63 = vpop.f32.mrb[30].mxu1 }
 0x31f   : > { %v8123_v2 = vpop.f32.mrb[31].mxu1 }
 0x32d   : > { %v10573_v3 = vpop.f32.mrb[32].mxu0 }
 0x32e   : > { %v8142_v18 = vpop.f32.mrb[33].mxu0  ;;  %v10575_v4 = vpop.f32.mrb[32].mxu1 }
 0x32f   : > { %v8161_v5 = vpop.f32.mrb[33].mxu1 }
 0x33d   : > { %v10577_v6 = vpop.f32.mrb[34].mxu0 }
 0x33e   : > { %v8180_v7 = vpop.f32.mrb[35].mxu0  ;;  %v10579_v8 = vpop.f32.mrb[34].mxu1 }
 0x33f   : > { %v8199_v42 = vpop.f32.mrb[35].mxu1 }
 0x366   : > { %v3750_v11 = vpop.f32.mrb[36].mxu0 }
 0x367   : > { %v3751_v13 = vadd.f32 %v3750_v11, %v3677_v9  ;;  %v3826_v15 = vpop.f32.mrb[36].mxu1  ;;  %v8204_v17 = vpop.f32.mrb[37].mxu0 }
 0x368   : > { %v8209_v46 = vpop.f32.mrb[37].mxu1  ;;  %v3827_v19 = vadd.f32 %v3826_v15, %v3677_v9 }
 0x369   : > { %v4591_v20 = vsel %vm4590_vm2, %v3751_v13, -inf }
 0x36a   : > { %4592 = vmax.xlane.f32.xlu0 %v4591_v20  ;;  %v4594_v21 = vsel %vm4590_vm2, %v3827_v19, -inf }
 0x36e   : > { %4595 = vmax.xlane.f32.xlu0 %v4594_v21 }
 0x376   : > { %v3902_v22 = vpop.f32.mrb[38].mxu0 }
 0x377   : > { %v10585_v23 = vadd.f32 %v3902_v22, %v3677_v9  ;;  %v3978_v10 = vpop.f32.mrb[38].mxu1  ;;  %v8214_v24 = vpop.f32.mrb[39].mxu0 }
 0x378   : > { %v8219_v25 = vpop.f32.mrb[39].mxu1  ;;  %v10587_v26 = vadd.f32 %v3978_v10, %v3677_v9 }
 0x379   : > { %v4597_v28 = vsel %vm4590_vm2, %v10585_v23, -inf }
 0x37a   : > { %4598 = vmax.xlane.f32.xlu1 %v4597_v28  ;;  %v4600_v31 = vsel %vm4590_vm2, %v10587_v26, -inf }
 0x37e   : > { %4601 = vmax.xlane.f32.xlu1 %v4600_v31 }
 0x386   : > { %v4054_v16 = vpop.f32.mrb[40].mxu0 }
 0x387   : > { %v10593_v33 = vadd.f32 %v4054_v16, %v3677_v9  ;;  %v4130_v35 = vpop.f32.mrb[40].mxu1  ;;  %v8224_v36 = vpop.f32.mrb[41].mxu0 }
 0x388   : > { %v10595_v12 = vadd.f32 %v4130_v35, %v3677_v9  ;;  %v8229_v37 = vpop.f32.mrb[41].mxu1 }
 0x389   : > { %v4603_v27 = vsel %vm4590_vm2, %v10593_v33, -inf }
 0x38a   : > { %v4606_v38 = vsel %vm4590_vm2, %v10595_v12, -inf  ;;  %4604 = vmax.xlane.f32.xlu0 %v4603_v27 }
 0x38b   : > { %4607 = vmax.xlane.f32.xlu1 %v4606_v38 }
 0x396   : > { %v4206_v39 = vpop.f32.mrb[42].mxu0 }
 0x397   : > { %v10601_v40 = vadd.f32 %v4206_v39, %v3677_v9  ;;  %v4282_v30 = vpop.f32.mrb[42].mxu1  ;;  %v8234_v41 = vpop.f32.mrb[43].mxu0 }
 0x398   : > { %v10603_v29 = vadd.f32 %v4282_v30, %v3677_v9  ;;  %v8239_v43 = vpop.f32.mrb[43].mxu1 }
 0x399   : > { %v4609_v44 = vsel %vm4590_vm2, %v10601_v40, -inf }
 0x39a   : > { %v4612_v45 = vsel %vm4590_vm2, %v10603_v29, -inf  ;;  %4610 = vmax.xlane.f32.xlu0 %v4609_v44 }
 0x39b   : > { %4613 = vmax.xlane.f32.xlu1 %v4612_v45 }
 0x3a6   : > { %v4358_v48 = vpop.f32.mrb[44].mxu0 }
 0x3a7   : > { %v10609_v49 = vadd.f32 %v4358_v48, %v3677_v9  ;;  %v4434_v32 = vpop.f32.mrb[44].mxu1  ;;  %v8244_v47 = vpop.f32.mrb[45].mxu0 }
 0x3a8   : > { %v10611_v50 = vadd.f32 %v4434_v32, %v3677_v9  ;;  %v8249_v53 = vpop.f32.mrb[45].mxu1 }
 0x3a9   : > { %v4615_v54 = vsel %vm4590_vm2, %v10609_v49, -inf }
 0x3aa   : > { %v4618_v55 = vsel %vm4590_vm2, %v10611_v50, -inf  ;;  %4616 = vmax.xlane.f32.xlu0 %v4615_v54 }
 0x3ab   : > { %4619 = vmax.xlane.f32.xlu1 %v4618_v55 }
 0x3b6   : > { %v4510_v34 = vpop.f32.mrb[46].mxu0 }
 0x3b7   : > { %v10617_v51 = vadd.f32 %v4510_v34, %v3677_v9  ;;  %v4586_v58 = vpop.f32.mrb[46].mxu1  ;;  %v8254_v60 = vpop.f32.mrb[47].mxu0 }
 0x3b8   : > { %v10619_v14 = vadd.f32 %v4586_v58, %v3677_v9  ;;  %v8259_v52 = vpop.f32.mrb[47].mxu1 }
 0x3b9   : > { %v4621_v2 = vsel %vm4590_vm2, %v10617_v51, -inf }
 0x3ba   : > { %v4624_v18 = vsel %vm4590_vm2, %v10619_v14, -inf  ;;  %4622 = vmax.xlane.f32.xlu0 %v4621_v2 }
 0x3bb   : > { %4625 = vmax.xlane.f32.xlu1 %v4624_v18 }
 0x3f7   : > { %v4593_v5 = vpop.xlane.xlu0 %4592 }
 0x3f8   : > { %v4627_v7 = vsub.f32 %v3751_v13, %v4593_v5 }
 0x3fa   : > { %v4639_v42 = vmul.f32 1.442695, %v4627_v7 }
 0x3fb   : > { %v4596_v11 = vpop.xlane.xlu0 %4595 }
 0x3fc   : > { %9254 = vpow2.f32 %v4639_v42  ;;  %v4628_v15 = vsub.f32 %v3827_v19, %v4596_v11 }
 0x3fe   : > { %v4641_v17 = vmul.f32 1.442695, %v4628_v15 }
 0x400   : > { %9256 = vpow2.f32 %v4641_v17 }
 0x406   : > { %v10625_v46 = vpop.eup %9254 }
 0x407   : > { %v4599_v9 = vpop.xlane.xlu1 %4598  ;;  %v4663_v20 = vsel %vm4590_vm2, %v10625_v46, 0.0 }
 0x408   : > { %v4629_v21 = vsub.f32 %v10585_v23, %v4599_v9  ;;  %4664 = vadd.xlane.f32.xlu0 %v4663_v20 }
 0x40a   : > { %v10630_v22 = vpop.eup %9256  ;;  %v4643_v10 = vmul.f32 1.442695, %v4629_v21 }
 0x40b   : > { %v4602_v24 = vpop.xlane.xlu1 %4601  ;;  %v4666_v13 = vsel %vm4590_vm2, %v10630_v22, 0.0 }
 0x40c   : > { %9258 = vpow2.f32 %v4643_v10  ;;  %v4630_v19 = vsub.f32 %v10587_v26, %v4602_v24  ;;  %4667 = vadd.xlane.f32.xlu1 %v4666_v13  ;;  %v6934_v24 = vld [vmem:[#allocation11 + $0x1a] ss:$0 sm:$0xff] }
 0x40e   : > { %v4645_v25 = vmul.f32 1.442695, %v4630_v19 }
 0x410   : > { %9260 = vpow2.f32 %v4645_v25  ;;  %v3044_v25 = vadd.f32 %v6934_v24, %v10561_v56  ;;  %v5614_v24 = vld [vmem:[#allocation13 + $0x18] sm:$0xff] }
 0x416   : > { %v10635_v28 = vpop.eup %9258 }
 0x417   : > { %v4605_v31 = vpop.xlane.xlu0 %4604  ;;  %v4669_v23 = vsel %vm4590_vm2, %v10635_v28, 0.0 }
 0x418   : > { %v4608_v16 = vpop.xlane.xlu1 %4607  ;;  %v4631_v35 = vsub.f32 %v10593_v33, %v4605_v31  ;;  %4670 = vadd.xlane.f32.xlu0 %v4669_v23  ;;  %v6935_v31 = vld [vmem:[#allocation11 + $0x1b] ss:$0 sm:$0xff] }
 0x419   : > { %v4632_v36 = vsub.f32 %v10595_v12, %v4608_v16 }
 0x41a   : > { %v10641_v37 = vpop.eup %9260  ;;  %v4647_v27 = vmul.f32 1.442695, %v4631_v35 }
 0x41b   : > { %v4649_v38 = vmul.f32 1.442695, %v4632_v36  ;;  %v4672_v26 = vsel %vm4590_vm2, %v10641_v37, 0.0 }
 0x41c   : > { %9262 = vpow2.f32 %v4647_v27  ;;  %4673 = vadd.xlane.f32.xlu1 %v4672_v26 }
 0x41d   : > { %9264 = vpow2.f32 %v4649_v38  ;;  %v6937_v38 = vld [vmem:[#allocation11 + $0x1d] ss:$0 sm:$0xff] }
 0x426   : > { %v10645_v39 = vpop.eup %9262 }
 0x427   : > { %v10647_v30 = vpop.eup %9264  ;;  %v4611_v41 = vpop.xlane.xlu0 %4610  ;;  %v4675_v33 = vsel %vm4590_vm2, %v10645_v39, 0.0 }
 0x428   : > { %v4614_v43 = vpop.xlane.xlu1 %4613  ;;  %v4633_v12 = vsub.f32 %v10601_v40, %v4611_v41  ;;  %v4678_v44 = vsel %vm4590_vm2, %v10647_v30, 0.0  ;;  %4676 = vadd.xlane.f32.xlu0 %v4675_v33 }
 0x429   : > { %v4634_v45 = vsub.f32 %v10603_v29, %v4614_v43  ;;  %4679 = vadd.xlane.f32.xlu1 %v4678_v44  ;;  %v3254_v43 = vadd.f32 %v6937_v38, %v10567_v61 }
 0x42a   : > { %v4651_v48 = vmul.f32 1.442695, %v4633_v12  ;;  %v6939_v12 = vld [vmem:[#allocation11 + $0x1f] ss:$0 sm:$0xff] }
 0x42b   : > { %v4653_v32 = vmul.f32 1.442695, %v4634_v45 }
 0x42c   : > { %9266 = vpow2.f32 %v4651_v48 }
 0x42d   : > { %9268 = vpow2.f32 %v4653_v32  ;;  %v3394_v32 = vadd.f32 %v6939_v12, %v10571_v63  ;;  %v6940_v63 = vld [vmem:[#allocation11 + $0x20] ss:$0 sm:$0xff] }
 0x42e   : > { %v5630_v12 = vld [vmem:[#allocation13 + $0x98] sm:$0xff] }
 0x436   : > { %v10655_v47 = vpop.eup %9266 }
 0x437   : > { %v10657_v53 = vpop.eup %9268  ;;  %v4617_v54 = vpop.xlane.xlu0 %4616  ;;  %v4681_v55 = vsel %vm4590_vm2, %v10655_v47, 0.0 }
 0x438   : > { %v4620_v40 = vpop.xlane.xlu1 %4619  ;;  %v4635_v34 = vsub.f32 %v10609_v49, %v4617_v54  ;;  %v4684_v58 = vsel %vm4590_vm2, %v10657_v53, 0.0  ;;  %4682 = vadd.xlane.f32.xlu0 %v4681_v55 }
 0x439   : > { %v4636_v29 = vsub.f32 %v10611_v50, %v4620_v40  ;;  %4685 = vadd.xlane.f32.xlu1 %v4684_v58 }
 0x43a   : > { %v4655_v60 = vmul.f32 1.442695, %v4635_v34  ;;  %v3464_v34 = vadd.f32 %v6940_v63, %v10573_v3  ;;  %v5632_v63 = vld [vmem:[#allocation13 + $0xa8] sm:$0xff] }
 0x43b   : > { %v4657_v52 = vmul.f32 1.442695, %v4636_v29 }
 0x43c   : > { %9270 = vpow2.f32 %v4655_v60 }
 0x43d   : > { %9272 = vpow2.f32 %v4657_v52 }
 0x446   : > { %v10665_v2 = vpop.eup %9270 }
 0x447   : > { %v10667_v18 = vpop.eup %9272  ;;  %v4623_v5 = vpop.xlane.xlu0 %4622  ;;  %v4687_v7 = vsel %vm4590_vm2, %v10665_v2, 0.0 }
 0x448   : > { %v4626_v49 = vpop.xlane.xlu1 %4625  ;;  %v4637_v42 = vsub.f32 %v10617_v51, %v4623_v5  ;;  %v4690_v50 = vsel %vm4590_vm2, %v10667_v18, 0.0  ;;  %4688 = vadd.xlane.f32.xlu0 %v4687_v7 }
 0x449   : > { %v4638_v11 = vsub.f32 %v10619_v14, %v4626_v49  ;;  %4691 = vadd.xlane.f32.xlu1 %v4690_v50 }
 0x44a   : > { %v4659_v15 = vmul.f32 1.442695, %v4637_v42 }
 0x44b   : > { %v4661_v17 = vmul.f32 1.442695, %v4638_v11  ;;  %v5620_v11 = vld [vmem:[#allocation13 + $0x48] sm:$0xff] }
 0x44c   : > { %9274 = vpow2.f32 %v4659_v15 }
 0x44d   : > { %9276 = vpow2.f32 %v4661_v17 }
 0x456   : > { %v10675_v9 = vpop.eup %9274 }
 0x457   : > { %v10677_v20 = vpop.eup %9276  ;;  %v4693_v21 = vsel %vm4590_vm2, %v10675_v9, 0.0 }
 0x458   : > { %v4696_v51 = vsel %vm4590_vm2, %v10677_v20, 0.0  ;;  %4694 = vadd.xlane.f32.xlu0 %v4693_v21 }
 0x459   : > { %4697 = vadd.xlane.f32.xlu1 %v4696_v51 }
 0x495   : > { %v4665_v10 = vpop.xlane.xlu0 %4664 }
 0x496   : > { %9278 = vrcp.f32 %v4665_v10 }
 0x499   : > { %v4668_v14 = vpop.xlane.xlu1 %4667 }
 0x49a   : > { %9280 = vrcp.f32 %v4668_v14  ;;  %v5613_v14 = vld [vmem:[#allocation13 + $0x10] sm:$0xff] }
 0x4a0   : > { %v9279_v13 = vpop.eup %9278 }
 0x4a1   : > { %v4711_v19 = vmul.f32 %v9279_v13, %v10625_v46  ;;  %v3114_v46 = vadd.f32 %v6935_v31, %v10563_v57  ;;  %v8984_v31 = vpack.c.bf16 %v5614_v24, %v5613_v14 }
 0x4a3   : > { %4723 = vst.msk [vmem:[%s10688_s26] sm:$0xff] %vm4590_vm2, %v4711_v19  ;;  %8263 = vmatmul.mubr.msk.f32.vlgmr.msra.gmra.mrb[48].mxu0 %vm4590_vm2, %v4711_v19  ;;  %v5621_v19 = vld [vmem:[#allocation13 + $0x50] sm:$0xff] }
 0x4a4   : > { %v9281_v23 = vpop.eup %9280  ;;  %8271 = vmatpush3.msra.mxu0 %v3044_v25  ;;  %8272 = vmatprep.mubr.msk.f32.mxu0 %vm9700_vm0, %v9701_v1  ;;  %v5622_v25 = vld [vmem:[#allocation13 + $0x58] sm:$0xff] }
 0x4a5   : > { %v4712_v16 = vmul.f32 %v9281_v23, %v10630_v22  ;;  %v4671_v35 = vpop.xlane.xlu0 %4670  ;;  %8280 = vmatprep.subr.mxu0 %v9701_v1  ;;  %v6936_v22 = vld [vmem:[#allocation11 + $0x1c] ss:$0 sm:$0xff]  ;;  %v5615_v23 = vld [vmem:[#allocation13 + $0x20] sm:$0xff] }
 0x4a6   : > { %9282 = vrcp.f32 %v4671_v35  ;;  %v3184_v57 = vadd.f32 %v6936_v22, %v10565_v59  ;;  %v6938_v59 = vld [vmem:[#allocation11 + $0x1e] ss:$0 sm:$0xff]  ;;  %v5624_v35 = vld [vmem:[#allocation13 + $0x68] sm:$0xff]  ;;  %v5617_v22 = vld [vmem:[#allocation13 + $0x30] sm:$0xff] }
 0x4a7   : > { %4724 = vst.msk [vmem:[%s10688_s26 + $0x8] sm:$0xff] %vm4590_vm2, %v4712_v16  ;;  %8268 = vmatmul.mubr.msk.f32.vlgmr.msra.gmra.mrb[48].mxu1 %vm4590_vm2, %v4712_v16  ;;  %v3324_v45 = vadd.f32 %v6938_v59, %v10569_v62  ;;  %v5616_v16 = vld [vmem:[#allocation13 + $0x28] sm:$0xff] }
 0x4a8   : > { %8276 = vmatpush3.msra.mxu1 %v3114_v46  ;;  %8277 = vmatprep.mubr.msk.f32.mxu1 %vm9700_vm0, %v9701_v1  ;;  %v8987_v46 = vpack.c.bf16 %v5616_v16, %v5615_v23  ;;  %v5636_v59 = vld [vmem:[#allocation13 + $0xc8] sm:$0xff]  ;;  %v5650_v23 = vld [vmem:[#allocation13 + $0x138] sm:$0xff] }
 0x4a9   : > { %v4674_v56 = vpop.xlane.xlu1 %4673  ;;  %8285 = vmatprep.subr.mxu1 %v9701_v1 }
 0x4aa   : > { %9284 = vrcp.f32 %v4674_v56 }
 0x4b0   : > { %v9283_v36 = vpop.eup %9282 }
 0x4b1   : > { %v4713_v27 = vmul.f32 %v9283_v36, %v10635_v28  ;;  %v5618_v36 = vld [vmem:[#allocation13 + $0x38] sm:$0xff] }
 0x4b2   : > { %v8990_v38 = vpack.c.bf16 %v5618_v36, %v5617_v22  ;;  %v5660_v22 = vld [vmem:[#allocation13 + $0x188] sm:$0xff] }
 0x4b3   : > { %4725 = vst.msk [vmem:[%s10688_s26 + $0x10] sm:$0xff] %vm4590_vm2, %v4713_v27  ;;  %8273 = vmatmul.mubr.msk.f32.vlgmr.msra.gmra.mrb[50].mxu0 %vm4590_vm2, %v4713_v27  ;;  %v5625_v27 = vld [vmem:[#allocation13 + $0x70] sm:$0xff] }
 0x4b4   : > { %v9285_v26 = vpop.eup %9284  ;;  %8281 = vmatpush3.msra.mxu0 %v3184_v57  ;;  %8282 = vmatprep.mubr.msk.f32.mxu0 %vm9700_vm0, %v9701_v1  ;;  %v5626_v57 = vld [vmem:[#allocation13 + $0x78] sm:$0xff] }
 0x4b5   : > { %v4714_v41 = vmul.f32 %v9285_v26, %v10641_v37  ;;  %v4677_v33 = vpop.xlane.xlu0 %4676  ;;  %8290 = vmatprep.subr.mxu0 %v9701_v1  ;;  %v9002_v26 = vpack.c.bf16 %v5626_v57, %v5625_v27  ;;  %v5667_v57 = vld [vmem:[#allocation13 + $0x1c0] sm:$0xff] }
 0x4b6   : > { %v4680_v28 = vpop.xlane.xlu1 %4679  ;;  %9286 = vrcp.f32 %v4677_v33  ;;  %v5628_v33 = vld [vmem:[#allocation13 + $0x88] sm:$0xff] }
 0x4b7   : > { %4726 = vst.msk [vmem:[%s10688_s26 + $0x18] sm:$0xff] %vm4590_vm2, %v4714_v41  ;;  %9288 = vrcp.f32 %v4680_v28  ;;  %8278 = vmatmul.mubr.msk.f32.vlgmr.msra.gmra.mrb[50].mxu1 %vm4590_vm2, %v4714_v41  ;;  %v5627_v41 = vld [vmem:[#allocation13 + $0x80] sm:$0xff] }
 0x4b8   : > { %8286 = vmatpush3.msra.mxu1 %v3254_v43  ;;  %8287 = vmatprep.mubr.msk.f32.mxu1 %vm9700_vm0, %v9701_v1  ;;  %v9005_v43 = vpack.c.bf16 %v5628_v33, %v5627_v41  ;;  %v5635_v28 = vld [vmem:[#allocation13 + $0xc0] sm:$0xff]  ;;  %v5662_v41 = vld [vmem:[#allocation13 + $0x198] sm:$0xff] }
 0x4b9   : > { %8295 = vmatprep.subr.mxu1 %v9701_v1 }
 0x4c0   : > { %v9287_v37 = vpop.eup %9286 }
 0x4c1   : > { %v9289_v44 = vpop.eup %9288  ;;  %v4715_v61 = vmul.f32 %v9287_v37, %v10645_v39  ;;  %v5629_v37 = vld [vmem:[#allocation13 + $0x90] sm:$0xff] }
 0x4c2   : > { %v4716_v48 = vmul.f32 %v9289_v44, %v10647_v30  ;;  %v6941_v30 = vld [vmem:[#allocation11 + $0x21] ss:$0 sm:$0xff] }
 0x4c3   : > { %4727 = vst.msk [vmem:[%s10688_s26 + $0x20] sm:$0xff] %vm4590_vm2, %v4715_v61  ;;  %8283 = vmatmul.mubr.msk.f32.vlgmr.msra.gmra.mrb[52].mxu0 %vm4590_vm2, %v4715_v61  ;;  %v3534_v29 = vadd.f32 %v6941_v30, %v10575_v4  ;;  %v6942_v4 = vld [vmem:[#allocation11 + $0x22] ss:$0 sm:$0xff] }
 0x4c4   : > { %4728 = vst.msk [vmem:[%s10688_s26 + $0x28] sm:$0xff] %vm4590_vm2, %v4716_v48  ;;  %8288 = vmatmul.mubr.msk.f32.vlgmr.msra.gmra.mrb[52].mxu1 %vm4590_vm2, %v4716_v48  ;;  %8291 = vmatpush3.msra.mxu0 %v3324_v45  ;;  %v3604_v7 = vadd.f32 %v6942_v4, %v10577_v6  ;;  %v5611_v6 = vld [vmem:[#allocation13] sm:$0xff]  ;;  %v9017_v45 = vpack.c.bf16 %v5636_v59, %v5635_v28 }
 0x4c5   : > { %8296 = vmatpush3.msra.mxu1 %v3394_v32  ;;  %v4683_v54 = vpop.xlane.xlu0 %4682  ;;  %8292 = vmatprep.mubr.msk.f32.mxu0 %vm9700_vm0, %v9701_v1  ;;  %v9008_v48 = vpack.c.bf16 %v5630_v12, %v5629_v37  ;;  %v5637_v32 = vld [vmem:[#allocation13 + $0xd0] sm:$0xff] }
 0x4c6   : > { %v4686_v62 = vpop.xlane.xlu1 %4685  ;;  %9290 = vrcp.f32 %v4683_v54  ;;  %8297 = vmatprep.mubr.msk.f32.mxu1 %vm9700_vm0, %v9701_v1  ;;  %8300 = vmatprep.subr.mxu0 %v9701_v1  ;;  %v5638_v54 = vld [vmem:[#allocation13 + $0xd8] sm:$0xff] }
 0x4c7   : > { %9292 = vrcp.f32 %v4686_v62  ;;  %8305 = vmatprep.subr.mxu1 %v9701_v1  ;;  %v5631_v62 = vld [vmem:[#allocation13 + $0xa0] sm:$0xff] }
 0x4d0   : > { %v9291_v39 = vpop.eup %9290 }
 0x4d1   : > { %v9293_v55 = vpop.eup %9292  ;;  %v4717_v40 = vmul.f32 %v9291_v39, %v10655_v47 }
 0x4d2   : > { %v4718_v58 = vmul.f32 %v9293_v55, %v10657_v53  ;;  %v6943_v53 = vld [vmem:[#allocation11 + $0x23] ss:$0 sm:$0xff]  ;;  %v9020_v55 = vpack.c.bf16 %v5638_v54, %v5637_v32 }
 0x4d3   : > { %4729 = vst.msk [vmem:[%s10688_s26 + $0x30] sm:$0xff] %vm4590_vm2, %v4717_v40  ;;  %8293 = vmatmul.mubr.msk.f32.vlgmr.msra.gmra.mrb[54].mxu0 %vm4590_vm2, %v4717_v40  ;;  %v3674_v42 = vadd.f32 %v6943_v53, %v10579_v8  ;;  %v5612_v8 = vld [vmem:[#allocation13 + $0x8] sm:$0xff]  ;;  %v9011_v40 = vpack.c.bf16 %v5632_v63, %v5631_v62  ;;  %v5642_v53 = vld [vmem:[#allocation13 + $0xf8] sm:$0xff]  ;;  %v5671_v62 = vld [vmem:[#allocation13 + $0x1e0] sm:$0xff] }
 0x4d4   : > { %4730 = vst.msk [vmem:[%s10688_s26 + $0x38] sm:$0xff] %vm4590_vm2, %v4718_v58  ;;  %8298 = vmatmul.mubr.msk.f32.vlgmr.msra.gmra.mrb[54].mxu1 %vm4590_vm2, %v4718_v58  ;;  %8301 = vmatpush3.msra.mxu0 %v3464_v34  ;;  %v8981_v17 = vpack.c.bf16 %v5612_v8, %v5611_v6  ;;  %v5639_v34 = vld [vmem:[#allocation13 + $0xe0] sm:$0xff]  ;;  %v5640_v58 = vld [vmem:[#allocation13 + $0xe8] sm:$0xff]  ;;  %v5646_v6 = vld [vmem:[#allocation13 + $0x118] sm:$0xff] }
 0x4d5   : > { %8306 = vmatpush3.msra.mxu1 %v3534_v29  ;;  %v4689_v60 = vpop.xlane.xlu0 %4688  ;;  %8302 = vmatprep.mubr.msk.f32.mxu0 %vm9700_vm0, %v9701_v1  ;;  %v5633_v29 = vld [vmem:[#allocation13 + $0xb0] sm:$0xff]  ;;  %v5672_v63 = vld [vmem:[#allocation13 + $0x1e8] sm:$0xff] }
 0x4d6   : > { %v4692_v3 = vpop.xlane.xlu1 %4691  ;;  %9294 = vrcp.f32 %v4689_v60  ;;  %8307 = vmatprep.mubr.msk.f32.mxu1 %vm9700_vm0, %v9701_v1  ;;  %8310 = vmatprep.subr.mxu0 %v9701_v1  ;;  %v5634_v60 = vld [vmem:[#allocation13 + $0xb8] sm:$0xff] }
 0x4d7   : > { %9296 = vrcp.f32 %v4692_v3  ;;  %8315 = vmatprep.subr.mxu1 %v9701_v1  ;;  %v9023_v3 = vpack.c.bf16 %v5640_v58, %v5639_v34  ;;  %v9014_v4 = vpack.c.bf16 %v5634_v60, %v5633_v29  ;;  %v5673_v34 = vld [vmem:[#allocation13 + $0x1f0] sm:$0xff]  ;;  %v5674_v58 = vld [vmem:[#allocation13 + $0x1f8] sm:$0xff]  ;;  %v5675_v29 = vld [vmem:[#allocation13 + $0x200] sm:$0xff] }
 0x4d8   : > { %v5676_v60 = vld [vmem:[#allocation13 + $0x208] sm:$0xff] }
 0x4e0   : > { %v9295_v47 = vpop.eup %9294 }
 0x4e1   : > { %v9297_v52 = vpop.eup %9296  ;;  %v4719_v5 = vmul.f32 %v9295_v47, %v10665_v2  ;;  %v5641_v47 = vld [vmem:[#allocation13 + $0xf0] sm:$0xff] }
 0x4e2   : > { %v4720_v49 = vmul.f32 %v9297_v52, %v10667_v18  ;;  %v5619_v18 = vld [vmem:[#allocation13 + $0x40] sm:$0xff] }
 0x4e3   : > { %4731 = vst.msk [vmem:[%s10688_s26 + $0x40] sm:$0xff] %vm4590_vm2, %v4719_v5  ;;  %8303 = vmatmul.mubr.msk.f32.vlgmr.msra.gmra.mrb[56].mxu0 %vm4590_vm2, %v4719_v5  ;;  %v8993_v10 = vpack.c.bf16 %v5620_v11, %v5619_v18  ;;  %v5643_v52 = vld [vmem:[#allocation13 + $0x100] sm:$0xff]  ;;  %v5644_v5 = vld [vmem:[#allocation13 + $0x108] sm:$0xff] }
 0x4e4   : > { %4732 = vst.msk [vmem:[%s10688_s26 + $0x48] sm:$0xff] %vm4590_vm2, %v4720_v49  ;;  %8308 = vmatmul.mubr.msk.f32.vlgmr.msra.gmra.mrb[56].mxu1 %vm4590_vm2, %v4720_v49  ;;  %8311 = vmatpush3.msra.mxu0 %v3604_v7  ;;  %v9026_v7 = vpack.c.bf16 %v5642_v53, %v5641_v47  ;;  %v9029_v49 = vpack.c.bf16 %v5644_v5, %v5643_v52  ;;  %v5683_v47 = vld [vmem:[#allocation13 + $0x240] sm:$0xff]  ;;  %v5684_v53 = vld [vmem:[#allocation13 + $0x248] sm:$0xff]  ;;  %v5677_v52 = vld [vmem:[#allocation13 + $0x210] sm:$0xff] }
 0x4e5   : > { %8316 = vmatpush3.msra.mxu1 %v3674_v42  ;;  %v4695_v50 = vpop.xlane.xlu0 %4694  ;;  %8312 = vmatprep.mubr.msk.f32.mxu0 %vm9700_vm0, %v9701_v1  ;;  %v5651_v42 = vld [vmem:[#allocation13 + $0x140] sm:$0xff]  ;;  %v5678_v5 = vld [vmem:[#allocation13 + $0x218] sm:$0xff] }
 0x4e6   : > { %v4698_v2 = vpop.xlane.xlu1 %4697  ;;  %9298 = vrcp.f32 %v4695_v50  ;;  %8317 = vmatprep.mubr.msk.f32.mxu1 %vm9700_vm0, %v9701_v1  ;;  %8980 = vmatprep.subr.bf16.mxu0 %v9699_v0  ;;  %v5652_v50 = vld [vmem:[#allocation13 + $0x148] sm:$0xff] }
 0x4e7   : > { %9300 = vrcp.f32 %v4698_v2  ;;  %8992 = vmatprep.subr.bf16.mxu1 %v9699_v0  ;;  %v5645_v2 = vld [vmem:[#allocation13 + $0x110] sm:$0xff]  ;;  %v9041_v11 = vpack.c.bf16 %v5652_v50, %v5651_v42 }
 0x4f0   : > { %v9299_v15 = vpop.eup %9298 }
 0x4f1   : > { %v9301_v21 = vpop.eup %9300  ;;  %v4721_v51 = vmul.f32 %v9299_v15, %v10675_v9  ;;  %v8996_v9 = vpack.c.bf16 %v5622_v25, %v5621_v19  ;;  %v9032_v15 = vpack.c.bf16 %v5646_v6, %v5645_v2  ;;  %v5655_v25 = vld [vmem:[#allocation13 + $0x160] sm:$0xff]  ;;  %v9089_v2 = vpack.c.bf16 %v5684_v53, %v5683_v47 }
 0x4f2   : > { %v4722_v13 = vmul.f32 %v9301_v21, %v10677_v20  ;;  %v5623_v20 = vld [vmem:[#allocation13 + $0x60] sm:$0xff]  ;;  %v5654_v21 = vld [vmem:[#allocation13 + $0x158] sm:$0xff]  ;;  %v9080_v6 = vpack.c.bf16 %v5678_v5, %v5677_v52 }
 0x4f3   : > { %4733 = vst.msk [vmem:[%s10688_s26 + $0x50] sm:$0xff] %vm4590_vm2, %v4721_v51  ;;  %8313 = vmatmul.mubr.msk.f32.vlgmr.msra.gmra.mrb[58].mxu0 %vm4590_vm2, %v4721_v51  ;;  %v8999_v56 = vpack.c.bf16 %v5624_v35, %v5623_v20  ;;  %v5647_v51 = vld [vmem:[#allocation13 + $0x120] sm:$0xff]  ;;  %v5657_v35 = vld [vmem:[#allocation13 + $0x170] sm:$0xff] }
 0x4f4   : > { %4734 = vst.msk [vmem:[%s10688_s26 + $0x58] sm:$0xff] %vm4590_vm2, %v4722_v13  ;;  %8318 = vmatmul.mubr.msk.f32.vlgmr.msra.gmra.mrb[58].mxu1 %vm4590_vm2, %v4722_v13  ;;  %8982 = vmatpush3.bf16.msra.mxu0 %v8981_v17  ;;  %v5653_v17 = vld [vmem:[#allocation13 + $0x150] sm:$0xff] }
 0x4f5   : > { %8983 = vmatprep.subr.bf16.mxu0 %v9699_v0  ;;  %8994 = vmatpush3.bf16.msra.mxu1 %v8993_v10  ;;  %v5648_v10 = vld [vmem:[#allocation13 + $0x128] sm:$0xff]  ;;  %v9044_v13 = vpack.c.bf16 %v5654_v21, %v5653_v17 }
 0x4f6   : > { %8995 = vmatprep.subr.bf16.mxu1 %v9699_v0  ;;  %8336 = vmatprep.mubr.msk.f32.mxu0 %vm9700_vm0, %v9701_v1  ;;  %v9035_v19 = vpack.c.bf16 %v5648_v10, %v5647_v51  ;;  %v5687_v51 = vld [vmem:[#allocation13 + $0x260] sm:$0xff]  ;;  %v5688_v10 = vld [vmem:[#allocation13 + $0x268] sm:$0xff] }
 0x4f7   : > { %8355 = vmatprep.mubr.msk.f32.mxu1 %vm9700_vm0, %v9701_v1 }
 0x4f8   : > { %8985 = vmatpush3.bf16.msra.mxu0 %v8984_v31  ;;  %v5656_v31 = vld [vmem:[#allocation13 + $0x168] sm:$0xff] }
 0x4f9   : > { %8986 = vmatprep.subr.bf16.mxu0 %v9699_v0  ;;  %8997 = vmatpush3.bf16.msra.mxu1 %v8996_v9  ;;  %v5649_v9 = vld [vmem:[#allocation13 + $0x130] sm:$0xff]  ;;  %v9047_v16 = vpack.c.bf16 %v5656_v31, %v5655_v25  ;;  %v5690_v31 = vld [vmem:[#allocation13 + $0x278] sm:$0xff] }
 0x4fa   : > { %8998 = vmatprep.subr.bf16.mxu1 %v9699_v0  ;;  %v9038_v20 = vpack.c.bf16 %v5650_v23, %v5649_v9  ;;  %v5689_v25 = vld [vmem:[#allocation13 + $0x270] sm:$0xff]  ;;  %v5691_v9 = vld [vmem:[#allocation13 + $0x280] sm:$0xff]  ;;  %v5692_v23 = vld [vmem:[#allocation13 + $0x288] sm:$0xff] }
 0x4fc   : > { %8988 = vmatpush3.bf16.msra.mxu0 %v8987_v46  ;;  %v5658_v46 = vld [vmem:[#allocation13 + $0x178] sm:$0xff] }
 0x4fd   : > { %8989 = vmatprep.subr.bf16.mxu0 %v9699_v0  ;;  %9000 = vmatpush3.bf16.msra.mxu1 %v8999_v56  ;;  %v5659_v56 = vld [vmem:[#allocation13 + $0x180] sm:$0xff]  ;;  %v9050_v36 = vpack.c.bf16 %v5658_v46, %v5657_v35  ;;  %v5700_v46 = vld [vmem:[#allocation13 + $0x2c8] sm:$0xff] }
 0x4fe   : > { %9001 = vmatprep.subr.bf16.mxu1 %v9699_v0  ;;  %v9053_v27 = vpack.c.bf16 %v5660_v22, %v5659_v56  ;;  %v5699_v35 = vld [vmem:[#allocation13 + $0x2c0] sm:$0xff]  ;;  %v5693_v56 = vld [vmem:[#allocation13 + $0x290] sm:$0xff]  ;;  %v5694_v22 = vld [vmem:[#allocation13 + $0x298] sm:$0xff] }
 0x500   : > { %8991 = vmatpush3.bf16.msra.mxu0 %v8990_v38  ;;  %v5668_v38 = vld [vmem:[#allocation13 + $0x1c8] sm:$0xff] }
 0x501   : > { %9003 = vmatpush3.bf16.msra.mxu1 %v9002_v26  ;;  %9004 = vmatprep.subr.bf16.mxu0 %v9699_v0  ;;  %v5661_v26 = vld [vmem:[#allocation13 + $0x190] sm:$0xff]  ;;  %v9065_v37 = vpack.c.bf16 %v5668_v38, %v5667_v57 }
 0x502   : > { %9016 = vmatprep.subr.bf16.mxu1 %v9699_v0  ;;  %v9056_v12 = vpack.c.bf16 %v5662_v41, %v5661_v26  ;;  %v9113_v26 = vpack.c.bf16 %v5700_v46, %v5699_v35  ;;  %v9104_v41 = vpack.c.bf16 %v5694_v22, %v5693_v56  ;;  %v7028_v46 = vld [vmem:[#allocation14] ss:$0 sm:$0xff] }
 0x576   : > { %v4804_v44 = vpop.f32.mrb[48].mxu0 }
 0x577   : > { %v8264_v61 = vpop.f32.mrb[49].mxu0  ;;  %8337 = vmatmul.mubr.msk.f32.vlgmr.msra.gmra.mrb[60].mxu0 %vm1147_vm1, %v4804_v44  ;;  %v5669_v44 = vld [vmem:[#allocation13 + $0x1d0] sm:$0xff] }
 0x578   : > { %9006 = vmatpush3.bf16.msra.mxu0 %v9005_v43  ;;  %8374 = vmatprep.mubr.msk.f32.mxu0 %vm9700_vm0, %v9701_v1  ;;  %v5670_v61 = vld [vmem:[#allocation13 + $0x1d8] sm:$0xff] }
 0x579   : > { %9007 = vmatprep.subr.bf16.mxu0 %v9699_v0  ;;  %v9068_v32 = vpack.c.bf16 %v5670_v61, %v5669_v44  ;;  %v5703_v44 = vld [vmem:[#allocation13 + $0x2e0] sm:$0xff]  ;;  %v5704_v61 = vld [vmem:[#allocation13 + $0x2e8] sm:$0xff] }
 0x57a   : > { %v4877_v39 = vpop.f32.mrb[48].mxu1 }
 0x57b   : > { %v8269_v30 = vpop.f32.mrb[49].mxu1  ;;  %8356 = vmatmul.mubr.msk.f32.vlgmr.msra.gmra.mrb[60].mxu1 %vm1147_vm1, %v4877_v39  ;;  %v5665_v39 = vld [vmem:[#allocation13 + $0x1b0] sm:$0xff] }
 0x57c   : > { %9018 = vmatpush3.bf16.msra.mxu1 %v9017_v45  ;;  %9009 = vmatpush3.bf16.msra.mxu0 %v9008_v48  ;;  %v5663_v45 = vld [vmem:[#allocation13 + $0x1a0] sm:$0xff]  ;;  %v5664_v48 = vld [vmem:[#allocation13 + $0x1a8] sm:$0xff]  ;;  %v5666_v30 = vld [vmem:[#allocation13 + $0x1b8] sm:$0xff] }
 0x57d   : > { %9019 = vmatprep.subr.bf16.mxu1 %v9699_v0  ;;  %9010 = vmatprep.subr.bf16.mxu0 %v9699_v0  ;;  %v9059_v54 = vpack.c.bf16 %v5664_v48, %v5663_v45  ;;  %v5697_v45 = vld [vmem:[#allocation13 + $0x2b0] sm:$0xff]  ;;  %v5698_v48 = vld [vmem:[#allocation13 + $0x2b8] sm:$0xff] }
 0x57e   : > { %8393 = vmatprep.mubr.msk.f32.mxu1 %vm9700_vm0, %v9701_v1 }
 0x580   : > { %9021 = vmatpush3.bf16.msra.mxu1 %v9020_v55  ;;  %9012 = vmatpush3.bf16.msra.mxu0 %v9011_v40  ;;  %v9071_v55 = vpack.c.bf16 %v5672_v63, %v5671_v62  ;;  %v9062_v40 = vpack.c.bf16 %v5666_v30, %v5665_v39  ;;  %v5705_v62 = vld [vmem:[#allocation13 + $0x2f0] sm:$0xff]  ;;  %v5706_v63 = vld [vmem:[#allocation13 + $0x2f8] sm:$0xff] }
 0x581   : > { %9022 = vmatprep.subr.bf16.mxu1 %v9699_v0  ;;  %9013 = vmatprep.subr.bf16.mxu0 %v9699_v0  ;;  %v9122_v39 = vpack.c.bf16 %v5706_v63, %v5705_v62 }
 0x584   : > { %9024 = vmatpush3.bf16.msra.mxu1 %v9023_v3  ;;  %9015 = vmatpush3.bf16.msra.mxu0 %v9014_v4  ;;  %v9074_v3 = vpack.c.bf16 %v5674_v58, %v5673_v34  ;;  %v9077_v4 = vpack.c.bf16 %v5676_v60, %v5675_v29 }
 0x585   : > { %9025 = vmatprep.subr.bf16.mxu1 %v9699_v0  ;;  %9028 = vmatprep.subr.bf16.mxu0 %v9699_v0 }
 0x586   : > { %v4950_v8 = vpop.f32.mrb[50].mxu0 }
 0x587   : > { %v8274_v18 = vpop.f32.mrb[51].mxu0  ;;  %8375 = vmatmul.mubr.msk.f32.vlgmr.msra.gmra.mrb[62].mxu0 %vm1147_vm1, %v4950_v8  ;;  %v5685_v8 = vld [vmem:[#allocation13 + $0x250] sm:$0xff] }
 0x588   : > { %9027 = vmatpush3.bf16.msra.mxu1 %v9026_v7  ;;  %9030 = vmatpush3.bf16.msra.mxu0 %v9029_v49  ;;  %v5686_v18 = vld [vmem:[#allocation13 + $0x258] sm:$0xff] }
 0x589   : > { %9040 = vmatprep.subr.bf16.mxu1 %v9699_v0  ;;  %9031 = vmatprep.subr.bf16.mxu0 %v9699_v0  ;;  %v9092_v17 = vpack.c.bf16 %v5686_v18, %v5685_v8 }
 0x58a   : > { %v5023_v14 = vpop.f32.mrb[50].mxu1  ;;  %8412 = vmatprep.mubr.msk.f32.mxu0 %vm9700_vm0, %v9701_v1 }
 0x58b   : > { %v8279_v24 = vpop.f32.mrb[51].mxu1  ;;  %8394 = vmatmul.mubr.msk.f32.vlgmr.msra.gmra.mrb[62].mxu1 %vm1147_vm1, %v5023_v14  ;;  %v5681_v14 = vld [vmem:[#allocation13 + $0x230] sm:$0xff] }
 0x58c   : > { %9042 = vmatpush3.bf16.msra.mxu1 %v9041_v11  ;;  %9033 = vmatpush3.bf16.msra.mxu0 %v9032_v15  ;;  %v5679_v11 = vld [vmem:[#allocation13 + $0x220] sm:$0xff]  ;;  %v5680_v15 = vld [vmem:[#allocation13 + $0x228] sm:$0xff]  ;;  %v5682_v24 = vld [vmem:[#allocation13 + $0x238] sm:$0xff] }
 0x58d   : > { %9043 = vmatprep.subr.bf16.mxu1 %v9699_v0  ;;  %9034 = vmatprep.subr.bf16.mxu0 %v9699_v0  ;;  %v9083_v21 = vpack.c.bf16 %v5680_v15, %v5679_v11 }
 0x58e   : > { %8431 = vmatprep.mubr.msk.f32.mxu1 %vm9700_vm0, %v9701_v1 }
 0x590   : > { %9045 = vmatpush3.bf16.msra.mxu1 %v9044_v13  ;;  %9036 = vmatpush3.bf16.msra.mxu0 %v9035_v19  ;;  %v9095_v13 = vpack.c.bf16 %v5688_v10, %v5687_v51  ;;  %v9086_v19 = vpack.c.bf16 %v5682_v24, %v5681_v14 }
 0x591   : > { %9046 = vmatprep.subr.bf16.mxu1 %v9699_v0  ;;  %9037 = vmatprep.subr.bf16.mxu0 %v9699_v0 }
 0x594   : > { %9048 = vmatpush3.bf16.msra.mxu1 %v9047_v16  ;;  %9039 = vmatpush3.bf16.msra.mxu0 %v9038_v20  ;;  %v9098_v16 = vpack.c.bf16 %v5690_v31, %v5689_v25  ;;  %v9101_v20 = vpack.c.bf16 %v5692_v23, %v5691_v9  ;;  %v6603_v31 = vlaneseq }
 0x595   : > { %9049 = vmatprep.subr.bf16.mxu1 %v9699_v0  ;;  %9052 = vmatprep.subr.bf16.mxu0 %v9699_v0 }
 0x596   : > { %v5096_v33 = vpop.f32.mrb[52].mxu0 }
 0x597   : > { %v5169_v43 = vpop.f32.mrb[52].mxu1  ;;  %v8284_v28 = vpop.f32.mrb[53].mxu0  ;;  %8413 = vmatmul.mubr.msk.f32.vlgmr.msra.gmra.mrb[64].mxu0 %vm1147_vm1, %v5096_v33  ;;  %v5701_v33 = vld [vmem:[#allocation13 + $0x2d0] sm:$0xff] }
 0x598   : > { %v8289_v59 = vpop.f32.mrb[53].mxu1  ;;  %9051 = vmatpush3.bf16.msra.mxu1 %v9050_v36  ;;  %9054 = vmatpush3.bf16.msra.mxu0 %v9053_v27  ;;  %v5695_v28 = vld [vmem:[#allocation13 + $0x2a0] sm:$0xff] }
 0x599   : > { %9064 = vmatprep.subr.bf16.mxu1 %v9699_v0  ;;  %9055 = vmatprep.subr.bf16.mxu0 %v9699_v0  ;;  %v5696_v59 = vld [vmem:[#allocation13 + $0x2a8] sm:$0xff] }
 0x59a   : > { %8450 = vmatprep.mubr.msk.f32.mxu0 %vm9700_vm0, %v9701_v1 }
 0x59b   : > { %8432 = vmatmul.mubr.msk.f32.vlgmr.msra.gmra.mrb[64].mxu1 %vm1147_vm1, %v5169_v43  ;;  %v5702_v43 = vld [vmem:[#allocation13 + $0x2d8] sm:$0xff] }
 0x59c   : > { %9066 = vmatpush3.bf16.msra.mxu1 %v9065_v37  ;;  %9057 = vmatpush3.bf16.msra.mxu0 %v9056_v12  ;;  %v9116_v37 = vpack.c.bf16 %v5702_v43, %v5701_v33  ;;  %v9107_v12 = vpack.c.bf16 %v5696_v59, %v5695_v28 }
 0x59d   : > { %9067 = vmatprep.subr.bf16.mxu1 %v9699_v0  ;;  %9058 = vmatprep.subr.bf16.mxu0 %v9699_v0 }
 0x59e   : > { %8469 = vmatprep.mubr.msk.f32.mxu1 %vm9700_vm0, %v9701_v1 }
 0x5a0   : > { %9069 = vmatpush3.bf16.msra.mxu1 %v9068_v32  ;;  %9060 = vmatpush3.bf16.msra.mxu0 %v9059_v54  ;;  %v9119_v32 = vpack.c.bf16 %v5704_v61, %v5703_v44  ;;  %v9110_v54 = vpack.c.bf16 %v5698_v48, %v5697_v45  ;;  %v7030_v61 = vld [vmem:[#allocation16] ss:$0 sm:$0xff]  ;;  %v7031_v48 = vld [vmem:[#allocation17] ss:$0 sm:$0xff] }
 0x5a1   : > { %9070 = vmatprep.subr.bf16.mxu1 %v9699_v0  ;;  %9061 = vmatprep.subr.bf16.mxu0 %v9699_v0 }
 0x5a4   : > { %9072 = vmatpush3.bf16.msra.mxu1 %v9071_v55  ;;  %9063 = vmatpush3.bf16.msra.mxu0 %v9062_v40 }
 0x5a5   : > { %9073 = vmatprep.subr.bf16.mxu1 %v9699_v0  ;;  %9076 = vmatprep.subr.bf16.mxu0 %v9699_v0 }
 0x5a6   : > { %v5242_v7 = vpop.f32.mrb[54].mxu0 }
 0x5a7   : > { %v5315_v49 = vpop.f32.mrb[54].mxu1  ;;  %v8294_v42 = vpop.f32.mrb[55].mxu0  ;;  %8451 = vmatmul.mubr.msk.f32.vlgmr.msra.gmra.mrb[66].mxu0 %vm1147_vm1, %v5242_v7 }
 0x5a8   : > { %v8299_v50 = vpop.f32.mrb[55].mxu1  ;;  %9075 = vmatpush3.bf16.msra.mxu1 %v9074_v3  ;;  %9078 = vmatpush3.bf16.msra.mxu0 %v9077_v4 }
 0x5a9   : > { %9088 = vmatprep.subr.bf16.mxu1 %v9699_v0  ;;  %9079 = vmatprep.subr.bf16.mxu0 %v9699_v0 }
 0x5aa   : > { %8488 = vmatprep.mubr.msk.f32.mxu0 %vm9700_vm0, %v9701_v1 }
 0x5ab   : > { %8470 = vmatmul.mubr.msk.f32.vlgmr.msra.gmra.mrb[66].mxu1 %vm1147_vm1, %v5315_v49 }
 0x5ac   : > { %9090 = vmatpush3.bf16.msra.mxu1 %v9089_v2  ;;  %9081 = vmatpush3.bf16.msra.mxu0 %v9080_v6 }
 0x5ad   : > { %9091 = vmatprep.subr.bf16.mxu1 %v9699_v0  ;;  %9082 = vmatprep.subr.bf16.mxu0 %v9699_v0 }
 0x5ae   : > { %8507 = vmatprep.mubr.msk.f32.mxu1 %vm9700_vm0, %v9701_v1 }
 0x5b0   : > { %9093 = vmatpush3.bf16.msra.mxu1 %v9092_v17  ;;  %9084 = vmatpush3.bf16.msra.mxu0 %v9083_v21 }
 0x5b1   : > { %9094 = vmatprep.subr.bf16.mxu1 %v9699_v0  ;;  %9085 = vmatprep.subr.bf16.mxu0 %v9699_v0 }
 0x5b4   : > { %9096 = vmatpush3.bf16.msra.mxu1 %v9095_v13  ;;  %9087 = vmatpush3.bf16.msra.mxu0 %v9086_v19 }
 0x5b5   : > { %9097 = vmatprep.subr.bf16.mxu1 %v9699_v0  ;;  %9100 = vmatprep.subr.bf16.mxu0 %v9699_v0 }
 0x5b6   : > { %v5388_v36 = vpop.f32.mrb[56].mxu0 }
 0x5b7   : > { %v5461_v27 = vpop.f32.mrb[56].mxu1  ;;  %v8304_v57 = vpop.f32.mrb[57].mxu0  ;;  %8489 = vmatmul.mubr.msk.f32.vlgmr.msra.gmra.mrb[68].mxu0 %vm1147_vm1, %v5388_v36 }
 0x5b8   : > { %v8309_v38 = vpop.f32.mrb[57].mxu1  ;;  %9099 = vmatpush3.bf16.msra.mxu1 %v9098_v16  ;;  %9102 = vmatpush3.bf16.msra.mxu0 %v9101_v20  ;;  %v6604_v20 = vand.u32 127, %v6603_v31  ;;  %v9304_v57 = vld [vmem:[%s489_s21] sm:$0xff]  ;;  %s10996_s21 = sld [smem:[#allocation38_spill]] }
 0x5b9   : > { %9112 = vmatprep.subr.bf16.mxu1 %v9699_v0  ;;  %9103 = vmatprep.subr.bf16.mxu0 %v9699_v0 }
 0x5ba   : > { %8526 = vmatprep.mubr.msk.f32.mxu0 %vm9700_vm0, %v9701_v1  ;;  %vm6605_vm3 = vcmp.lt.s32.totalorder %v6604_v20, 50 }
 0x5bb   : > { %8508 = vmatmul.mubr.msk.f32.vlgmr.msra.gmra.mrb[68].mxu1 %vm1147_vm1, %v5461_v27  ;;  %v7029_v27 = vsel %vm6605_vm3, 1.0, %v9701_v1 }
 0x5bc   : > { %9114 = vmatpush3.bf16.msra.mxu1 %v9113_v26  ;;  %9105 = vmatpush3.bf16.msra.mxu0 %v9104_v41 }
 0x5bd   : > { %9115 = vmatprep.subr.bf16.mxu1 %v9699_v0  ;;  %9106 = vmatprep.subr.bf16.mxu0 %v9699_v0 }
 0x5be   : > { %8545 = vmatprep.mubr.msk.f32.mxu1 %vm9700_vm0, %v9701_v1  ;;  %s10868_s10 = scalar_lea.hbm %s10996_s21, %s7033_s24 }
 0x5c0   : > { %9117 = vmatpush3.bf16.msra.mxu1 %v9116_v37  ;;  %9108 = vmatpush3.bf16.msra.mxu0 %v9107_v12 }
 0x5c1   : > { %9118 = vmatprep.subr.bf16.mxu1 %v9699_v0  ;;  %9109 = vmatprep.subr.bf16.mxu0 %v9699_v0 }
 0x5c4   : > { %9120 = vmatpush3.bf16.msra.mxu1 %v9119_v32  ;;  %9111 = vmatpush3.bf16.msra.mxu0 %v9110_v54 }
 0x5c5   : > { %9121 = vmatprep.subr.bf16.mxu1 %v9699_v0 }
 0x5c6   : > { %v5534_v30 = vpop.f32.mrb[58].mxu0 }
 0x5c7   : > { %v5607_v55 = vpop.f32.mrb[58].mxu1  ;;  %v8314_v40 = vpop.f32.mrb[59].mxu0  ;;  %8527 = vmatmul.mubr.msk.f32.vlgmr.msra.gmra.mrb[70].mxu0 %vm1147_vm1, %v5534_v30 }
 0x5c8   : > { %v8319_v34 = vpop.f32.mrb[59].mxu1  ;;  %9123 = vmatpush3.bf16.msra.mxu1 %v9122_v39 }
 0x5cb   : > { %8546 = vmatmul.mubr.msk.f32.vlgmr.msra.gmra.mrb[70].mxu1 %vm1147_vm1, %v5607_v55 }
 0x64a   : > { %v5776_v58 = vpop.f32.mrb[60].mxu0 }
 0x64b   : > { %v8338_v29 = vpop.f32.mrb[61].mxu0 }
 0x64e   : > { %v5849_v60 = vpop.f32.mrb[60].mxu1 }
 0x64f   : > { %v6583_v3 = vadd.f32 %v5849_v60, %v5776_v58  ;;  %v8357_v4 = vpop.f32.mrb[61].mxu1 }
 0x65a   : > { %v5922_v47 = vpop.f32.mrb[62].mxu0 }
 0x65b   : > { %v6584_v53 = vadd.f32 %v6583_v3, %v5922_v47  ;;  %v8376_v52 = vpop.f32.mrb[63].mxu0 }
 0x65e   : > { %v5995_v5 = vpop.f32.mrb[62].mxu1 }
 0x65f   : > { %v6585_v7 = vadd.f32 %v6584_v53, %v5995_v5  ;;  %v8395_v0 = vpop.f32.mrb[63].mxu1 }
 0x66a   : > { %v6068_v49 = vpop.f32.mrb[64].mxu0 }
 0x66b   : > { %v6586_v42 = vadd.f32 %v6585_v7, %v6068_v49  ;;  %v8414_v50 = vpop.f32.mrb[65].mxu0 }
 0x66e   : > { %v6141_v2 = vpop.f32.mrb[64].mxu1 }
 0x66f   : > { %v6587_v6 = vadd.f32 %v6586_v42, %v6141_v2  ;;  %v8433_v8 = vpop.f32.mrb[65].mxu1 }
 0x67a   : > { %v6214_v18 = vpop.f32.mrb[66].mxu0 }
 0x67b   : > { %v6588_v11 = vadd.f32 %v6587_v6, %v6214_v18  ;;  %v8452_v15 = vpop.f32.mrb[67].mxu0 }
 0x67e   : > { %v6287_v17 = vpop.f32.mrb[66].mxu1 }
 0x67f   : > { %v6589_v21 = vadd.f32 %v6588_v11, %v6287_v17  ;;  %v8471_v51 = vpop.f32.mrb[67].mxu1 }
 0x68a   : > { %v6360_v10 = vpop.f32.mrb[68].mxu0 }
 0x68b   : > { %v6590_v14 = vadd.f32 %v6589_v21, %v6360_v10  ;;  %v8490_v24 = vpop.f32.mrb[69].mxu0 }
 0x68e   : > { %v6433_v13 = vpop.f32.mrb[68].mxu1 }
 0x68f   : > { %v6591_v19 = vadd.f32 %v6590_v14, %v6433_v13  ;;  %v8509_v25 = vpop.f32.mrb[69].mxu1 }
 0x69a   : > { %v6506_v9 = vpop.f32.mrb[70].mxu0 }
 0x69b   : > { %v6592_v23 = vadd.f32 %v6591_v19, %v6506_v9  ;;  %v8528_v16 = vpop.f32.mrb[71].mxu0 }
 0x69e   : > { %v6579_v35 = vpop.f32.mrb[70].mxu1 }
 0x69f   : > { %v6593_v56 = vadd.f32 %v6592_v23, %v6579_v35  ;;  %v8547_v22 = vpop.f32.mrb[71].mxu1 }
 0x6a1   : > { %v6601_v36 = vadd.f32 %v7028_v46, %v6593_v56 }
 0x6a3   : > { %v6602_v38 = vadd.f32 %v9304_v57, %v6601_v36 }
 0x6a5   : > { %v6608_v26 = vmul.f32 %v7029_v27, %v6602_v38 }
 0x6a7   : > { %6609 = vadd.xlane.f32.xlu0 %v6608_v26 }
 0x734   : > { %v6610_v41 = vpop.xlane.xlu0 %6609 }
 0x735   : > { %v6611_v33 = vmul.f32 0.02, %v6610_v41 }
 0x737   : > { %v6612_v43 = vsub.f32 %v6602_v38, %v6611_v33 }
 0x739   : > { %v6613_v28 = vmul.f32 %v7029_v27, %v6612_v43 }
 0x73b   : > { %v6614_v59 = vmul.f32 %v6613_v28, %v6613_v28 }
 0x73d   : > { %6615 = vadd.xlane.f32.xlu1 %v6614_v59 }
 0x7ca   : > { %v6616_v37 = vpop.xlane.xlu1 %6615 }
 0x7cb   : > { %v6617_v12 = vmul.f32 0.02, %v6616_v37 }
 0x7cd   : > { %v6618_v44 = vadd.f32 1e-05, %v6617_v12 }
 0x7cf   : > { %9302 = vrsqrt.f32 %v6618_v44 }
 0x7d9   : > { %v9303_v1 = vpop.eup %9302 }
 0x7da   : > { %v6620_v45 = vmul.f32 %v9303_v1, %v6613_v28 }
 0x7dc   : > { %v6628_v32 = vmul.f32 %v7030_v61, %v6620_v45 }
 0x7de   : > { %v6636_v54 = vadd.f32 %v7031_v48, %v6628_v32 }
 0x7e0   : > { %6637 = vst [vmem:[%s591_s27] sm:$0xff] %v6636_v54 }
 0x7e1   : > { %9606 = shalt.err (!%p9603_p11)
}
 0x7e2   : > { %s9607_s7 = scalar_lea.hbm %s10868_s10, 128  ;;  %s9611_s29 = scalar_lea.hbm %s10996_s21, 256 }
 0x7e3   : > { %p9608_p3 = scmp.ne.s32.totalorder %s10868_s10, %s9607_s7  ;;  %p9612_p13 = scmp.lt.u32.totalorder %s10868_s10, %s10996_s21 }
 0x7e4   : > { %p9613_p1 = scmp.lt.u32.totalorder %s9611_s29, %s9607_s7  ;;  %p9615_p9 = scmp.lt.u32.totalorder %s9607_s7, %s10868_s10 }
 0x7e5   : > { %p9609_p6 = pnand %p9608_p3, %p10997_p0 }
 0x7e6   : > { %p9614_p7 = por %p9613_p1, %p9612_p13 }
 0x7e7   : > { %p9610_p10 = pneg %p9609_p6 }
 0x7e8   : > { %p9616_p2 = por %p9615_p9, %p9614_p7 }
 0x7ea   : > { %p9617_p12 = pnand %p9616_p2, %p9610_p10 }
 0x7ec   : > { %9620 = shalt.err (!%p9617_p12)
}
 0x7ed   : > { %9157 = dma.vmem_to_hbm [thread:$0]  (%p10997_p0), %s10870_s1, 128, %s10868_s10, %s6639_s28  }
 0x7ee PF: > { %s10998_s12 = sld [smem:[#allocation28_spill]]  ;;  %s10999_s15 = sld [smem:[#allocation33_spill]] }
 0x7ef   : > { %p11001_p4 = scmp.ge.s32.totalorder %s9683_s20, 2 }
 0x7f4   : > { %s6672_s26 = sand.u32 1, %s10998_s12   ;;  %p11000_p8 = scmp.ne.s32.totalorder %s10999_s15, 0 }
 0x7f5   : > { %s6673_s24 = scalar_lea.sflag [#allocation4], %s6672_s26 }
 0x7f6   : > { %p9192_p5 = pnand %p11001_p4, %p11000_p8 }
 0x7f8   : > { %9666 = dma.done.wait (!%p9192_p5), %s6673_s24, 128  }
 0x7f9   : > { %9668 = vsyncadd (!%p9192_p5), %s6673_s24, 4294967168  ;;  %s11002_s20 = sld [smem:[#allocation30_spill]]  ;;  %s11003_s27 = sld [smem:[#allocation31_spill]] }
 0x7fa   : > { %s11004_s17 = smov %s9675_s18  ;;  %s11005_s18 = smov %s9679_s19 }
 0x7ff   : > { %p34_p11 = scmp.ge.s32.totalorder %s11002_s20, 4   ;;  %s11006_s19 = smov %s11003_s27 }
 0x801   :  { %36 = sbr.rel (!%p34_p11) target bundleno = 19 (0x13), region = 178 }
 0x808   :  { %6686 = vsyncpa [#allocation3], 1 }
 0x809   :  { %6688 = vsyncpa [#allocation3 + $0x1], 1 }
 0x80a   :  { %6689 = vsyncpa [#allocation6], 1 }
 0x80b   :  { %6691 = vsyncpa [#allocation6 + $0x1], 1 }
 0x80c   :  { %6692 = vsyncpa [#allocation9], 1 }
 0x80d   :  { %6694 = vsyncpa [#allocation9 + $0x1], 1 }
 0x80e   :  { %6695 = vsyncpa [#allocation12], 1 }
 0x80f   :  { %6696 = vsyncpa [#allocation15], 1 }
 0x810   :  { %6697 = vsyncpa [#allocation18], 1 }
 0x811   :  { %6698 = vsyncpa [#allocation4], 1 }
 0x812   :  { %6700 = vsyncpa [#allocation4 + $0x1], 1 }

</bundles_post_ra>
